<compile_context>
chip_gen: v6e
topology: v6e:2x2x1
jax: 0.10.0
libtpu: 0.0.40
codegen_flags: <defaults>
</compile_context>

<pallas_src>
import functools

import jax
import jax.numpy as jnp
from jax import lax
from jax.experimental import pallas as pl
from jax.experimental.pallas import tpu as pltpu

BN_EPS = 1e-5        # nn.BatchNorm2d default eps
LANE = 128           # lane width: pad the matmul N dim to a multiple of this
BN_ROW_TILE = 512    # target row tile for the memory-bound BN+ReLU pass


# --------------------------------------------------------------------------------------
# Pallas kernels
# --------------------------------------------------------------------------------------

def _make_conv_stats_kernel(src_meta, oh, ow, n_cols):
    """Fused conv (implicit im2col) + per-channel sum / sum-of-squares kernel.

    src_meta: tuple of (kh, kw, c) per input source.  Kernel refs (in order):
      x_0..x_{S-1}  : (hp, wp, c_s)       bf16  spatially pre-padded NHWC image (1 batch)
      w_0..w_{S-1}  : (kh*kw, c_s, n_cols) bf16 per-tap weight matrices
      y_ref         : (oh*ow, n_cols)      f32  conv output (row = oy*ow + ox)
      stats_ref     : (8, n_cols)          f32  row0 = sum, row1 = sum of squares
    """
    n_src = len(src_meta)

    def kernel(*refs):
        x_refs = refs[:n_src]
        w_refs = refs[n_src:2 * n_src]
        y_ref = refs[2 * n_src]
        stats_ref = refs[2 * n_src + 1]

        def row_body(oy, carry):
            acc = jnp.zeros((ow, n_cols), jnp.float32)
            for s in range(n_src):
                kh, kw, _c = src_meta[s]
                xr = x_refs[s]
                wr = w_refs[s]
                for ky in range(kh):
                    # one padded input row slab for this tap row: (wp, c)
                    slab = xr[pl.ds(oy + ky, 1), :, :][0]
                    for kx in range(kw):
                        patch = slab[kx:kx + ow, :]             # (ow, c)  bf16
                        acc = acc + jnp.dot(
                            patch, wr[ky * kw + kx],
                            preferred_element_type=jnp.float32)  # MXU, f32 accum
            start = oy * ow
            if ow % 8 == 0:
                start = pl.multiple_of(start, 8)                 # aligned sublane store
            y_ref[pl.ds(start, ow), :] = acc
            return carry

        lax.fori_loop(0, oh, row_body, 0)

        # Fused BatchNorm statistics (epilogue) -- avoids a second full HBM read of y.
        y = y_ref[...]
        s = jnp.sum(y, axis=0, keepdims=True)
        sq = jnp.sum(y * y, axis=0, keepdims=True)
        stats_ref[...] = jnp.concatenate(
            [s, sq, jnp.zeros((6, n_cols), jnp.float32)], axis=0)

    return kernel


def _bn_relu_kernel(y_ref, mean_ref, invstd_ref, o_ref, *, relu):
    out = (y_ref[...] - mean_ref[...]) * invstd_ref[...]
    if relu:
        out = jnp.maximum(out, 0.0)
    o_ref[...] = out.astype(o_ref.dtype)


# --------------------------------------------------------------------------------------
# Pallas wrappers
# --------------------------------------------------------------------------------------

def _conv_stats_pallas(sources, *, oh, ow, n_cols):
    """sources: list of (x_pad, w_taps):
         x_pad : (B, oh+kh-1, ow+kw-1, C)   spatially pre-padded NHWC input
         w_taps: (kh*kw, C, n_cols)         per-tap weight matrices (lane-dense N)
       Returns y (B, oh*ow, n_cols) f32 and stats (B, 8, n_cols) f32 per-batch partials
       (row0 = column sums, row1 = column sums of squares)."""
    assert n_cols % LANE == 0
    b = sources[0][0].shape[0]
    xs, ws, meta, x_specs, w_specs = [], [], [], [], []
    for x_pad, w_taps in sources:
        bb, hp, wp, c = x_pad.shape
        assert bb == b
        nt = w_taps.shape[0]
        kh, kw = hp - oh + 1, wp - ow + 1
        assert kh >= 1 and kw >= 1 and kh * kw == nt
        assert w_taps.shape[1] == c and w_taps.shape[2] == n_cols
        xs.append(x_pad.astype(jnp.bfloat16))
        ws.append(w_taps.astype(jnp.bfloat16))
        meta.append((kh, kw, c))
        x_specs.append(pl.BlockSpec((None, hp, wp, c), lambda i: (i, 0, 0, 0)))
        w_specs.append(pl.BlockSpec((nt, c, n_cols), lambda i: (0, 0, 0)))

    kernel = _make_conv_stats_kernel(tuple(meta), oh, ow, n_cols)
    y, stats = pl.pallas_call(
        kernel,
        out_shape=(jax.ShapeDtypeStruct((b, oh * ow, n_cols), jnp.float32),
                   jax.ShapeDtypeStruct((b, 8, n_cols), jnp.float32)),
        grid=(b,),
        in_specs=x_specs + w_specs,
        out_specs=(pl.BlockSpec((None, oh * ow, n_cols), lambda i: (i, 0, 0)),
                   pl.BlockSpec((None, 8, n_cols), lambda i: (i, 0, 0))),
        compiler_params=pltpu.CompilerParams(dimension_semantics=("parallel",)),
    )(*xs, *ws)
    return y, stats


def _pick_row_tile(m, target=BN_ROW_TILE):
    t = min(target, m)
    t -= t % 8
    while t >= 8:
        if m % t == 0:
            return t
        t -= 8
    return None


def _bn_relu_pallas(y2d, mean, invstd, relu, out_dtype):
    m, n = y2d.shape
    tm = _pick_row_tile(m)
    if tm is None:                      # rare: pad rows up to an 8-multiple tile
        tm = min(BN_ROW_TILE, ((m + 7) // 8) * 8)
        mp = ((m + tm - 1) // tm) * tm
        y2d = jnp.pad(y2d, ((0, mp - m), (0, 0)))
    else:
        mp = m
    out = pl.pallas_call(
        functools.partial(_bn_relu_kernel, relu=relu),
        out_shape=jax.ShapeDtypeStruct((mp, n), out_dtype),
        grid=(mp // tm,),
        in_specs=[pl.BlockSpec((tm, n), lambda i: (i, 0)),
                  pl.BlockSpec((1, n), lambda i: (0, 0)),
                  pl.BlockSpec((1, n), lambda i: (0, 0))],
        out_specs=pl.BlockSpec((tm, n), lambda i: (i, 0)),
        compiler_params=pltpu.CompilerParams(dimension_semantics=("parallel",)),
    )(y2d, mean, invstd)
    # padded rows (if any) carry garbage BN values; they are sliced off here and never
    # enter the statistics (stats come from the conv kernel over the exact M rows).
    return out[:m] if mp != m else out


def _finalize_stats(stats, count, groups):
    """stats: (B, 8, groups*coutp), row0 = sums, row1 = sums of squares per column.
       Returns (mean, invstd) of shape (1, groups*coutp), per-channel values tiled over
       the phase groups."""
    n_cols = stats.shape[-1]
    coutp = n_cols // groups
    s = stats[:, 0, :].reshape(-1, groups, coutp).sum(axis=(0, 1))
    sq = stats[:, 1, :].reshape(-1, groups, coutp).sum(axis=(0, 1))
    mean = s / count
    # clamp to guard against catastrophic cancellation in E[y^2] - E[y]^2 (review note)
    var = jnp.maximum(sq / count - mean * mean, 0.0)
    invstd = lax.rsqrt(var + BN_EPS)
    if groups > 1:
        mean, invstd = jnp.tile(mean, groups), jnp.tile(invstd, groups)
    return mean[None, :].astype(jnp.float32), invstd[None, :].astype(jnp.float32)


# --------------------------------------------------------------------------------------
# Weight packing (host-side, tiny)
# --------------------------------------------------------------------------------------

def _round_up(x, m):
    return ((x + m - 1) // m) * m


def _conv_weight_taps(w, coutp):
    """nn.Conv2d weight slice (Cout, Cin, kH, kW) -> (kH*kW, Cin, coutp) tap matrices."""
    cout, cin, kh, kw = w.shape
    wt = jnp.transpose(w, (2, 3, 1, 0)).reshape(kh * kw, cin, cout)
    return jnp.pad(wt, ((0, 0), (0, 0), (0, coutp - cout)))


def _deconv_phase_weight(w_t, coutp):
    """ConvTranspose2d weight (Cin, Cout, 3, 3), stride 2, padding 1, output_padding 1
       -> 4-phase (sub-pixel) weight of shape (4 taps, Cin, 4*coutp).
       Output column group p = py*2+px holds phase (py, px); tap t = ty*2+tx reads
       x[m+ty, n+tx] (x zero-padded by one row/col at the bottom/right)."""
    cin, cout, kh, kw = w_t.shape
    taps = []
    for ty in range(2):
        for tx in range(2):
            phases = []
            for py in range(2):
                for px in range(2):
                    ky, kx = py - 2 * ty + 1, px - 2 * tx + 1
                    if 0 <= ky < kh and 0 <= kx < kw:
                        blk = w_t[:, :, ky, kx]                 # (Cin, Cout)
                    else:
                        blk = jnp.zeros((cin, cout), w_t.dtype)
                    phases.append(blk)
            taps.append(jnp.stack(phases, axis=1))              # (Cin, 4, Cout)
    w4 = jnp.stack(taps, axis=0)                                # (4, Cin, 4, Cout)
    w4 = jnp.pad(w4, ((0, 0), (0, 0), (0, 0), (0, coutp - cout)))
    return w4.reshape(4, cin, 4 * coutp)


# --------------------------------------------------------------------------------------
# DeConv2dFuse forward
# --------------------------------------------------------------------------------------

def deconv2d_fuse_forward(x_pre_nchw, x_nchw, w_deconv, w_conv, relu=True):
    """x_pre: (B, Cout, 2H, 2W), x: (B, Cin, H, W), NCHW.  Returns (B, Cout, 2H, 2W)."""
    x = jnp.transpose(x_nchw, (0, 2, 3, 1)).astype(jnp.float32)        # NHWC
    x_pre = jnp.transpose(x_pre_nchw, (0, 2, 3, 1)).astype(jnp.float32)
    b, h, w, cin = x.shape
    cout = w_deconv.shape[1]
    oh, ow = 2 * h, 2 * w
    coutp = _round_up(cout, LANE)          # lane-dense matmul N / store width

    # --- Deconv2d(3x3, stride 2, pad 1, outpad 1) + BN + ReLU, 4-phase decomposition ---
    x_halo = jnp.pad(x, ((0, 0), (0, 1), (0, 1), (0, 0))).astype(jnp.bfloat16)
    w_ph = _deconv_phase_weight(w_deconv, coutp).astype(jnp.bfloat16)   # (4, Cin, 4*coutp)
    y1, st1 = _conv_stats_pallas([(x_halo, w_ph)], oh=h, ow=w, n_cols=4 * coutp)
    mean1, invstd1 = _finalize_stats(st1, count=float(b * h * w * 4), groups=4)
    z1 = _bn_relu_pallas(y1.reshape(b * h * w, 4 * coutp), mean1, invstd1, relu,
                         out_dtype=jnp.bfloat16)
    # interleave the 4 phases -> (B, 2H, 2W, coutp); keep the real channels
    d = z1.reshape(b, h, w, 2, 2, coutp)
    d = jnp.transpose(d, (0, 1, 3, 2, 4, 5)).reshape(b, oh, ow, coutp)[..., :cout]
    # (torch slices y[:, :, :2h, :2w]; the phase form already yields exactly (2h, 2w))

    # --- Conv2d(2*Cout -> Cout, 3x3, pad 1) + BN + ReLU on concat([deconv_out, x_pre]) ---
    # the concat is never materialized: the kernel accumulates both sources directly.
    d_pad = jnp.pad(d, ((0, 0), (1, 1), (1, 1), (0, 0)))                 # bf16
    xp_pad = jnp.pad(x_pre.astype(jnp.bfloat16), ((0, 0), (1, 1), (1, 1), (0, 0)))
    w2a = _conv_weight_taps(w_conv[:, :cout], coutp).astype(jnp.bfloat16)
    w2b = _conv_weight_taps(w_conv[:, cout:], coutp).astype(jnp.bfloat16)
    y2, st2 = _conv_stats_pallas([(d_pad, w2a), (xp_pad, w2b)],
                                 oh=oh, ow=ow, n_cols=coutp)
    mean2, invstd2 = _finalize_stats(st2, count=float(b * oh * ow), groups=1)
    z2 = _bn_relu_pallas(y2.reshape(b * oh * ow, coutp), mean2, invstd2, relu,
                         out_dtype=jnp.float32)
    out = z2.reshape(b, oh, ow, coutp)[..., :cout]
    return jnp.transpose(out, (0, 3, 1, 2))                             # back to NCHW


# --------------------------------------------------------------------------------------
# Pure-XLA reference (mirrors the bf16 casts so both paths see identical operands)
# --------------------------------------------------------------------------------------

def _bn_relu_ref(y, relu):
    mean = jnp.mean(y, axis=(0, 1, 2), keepdims=True)
    var = jnp.mean(jnp.square(y - mean), axis=(0, 1, 2), keepdims=True)
    out = (y - mean) / jnp.sqrt(var + BN_EPS)
    return jnp.maximum(out, 0.0) if relu else out


def reference_forward(x_pre_nchw, x_nchw, w_deconv, w_conv, relu=True):
    x = jnp.transpose(x_nchw, (0, 2, 3, 1)).astype(jnp.bfloat16)
    w_eq = jnp.transpose(jnp.flip(w_deconv, (2, 3)), (2, 3, 0, 1)).astype(jnp.bfloat16)
    y = lax.conv_general_dilated(
        x, w_eq, window_strides=(1, 1), padding=((1, 2), (1, 2)), lhs_dilation=(2, 2),
        dimension_numbers=("NHWC", "HWIO", "NHWC"), preferred_element_type=jnp.float32)
    y = _bn_relu_ref(y, relu).astype(jnp.bfloat16)
    x_pre = jnp.transpose(x_pre_nchw, (0, 2, 3, 1)).astype(jnp.bfloat16)
    cat = jnp.concatenate([y, x_pre], axis=-1)
    w2 = jnp.transpose(w_conv, (2, 3, 1, 0)).astype(jnp.bfloat16)
    z = lax.conv_general_dilated(
        cat, w2, window_strides=(1, 1), padding=((1, 1), (1, 1)),
        dimension_numbers=("NHWC", "HWIO", "NHWC"), preferred_element_type=jnp.float32)
    z = _bn_relu_ref(z, relu)
    return jnp.transpose(z, (0, 3, 1, 2))


# --------------------------------------------------------------------------------------
# demo
# --------------------------------------------------------------------------------------

if __name__ == "__main__":
    B, Cin, Cout, H, W = 2, 8, 8, 8, 8
    key = jax.random.PRNGKey(0)
    k1, k2, k3, k4 = jax.random.split(key, 4)

    x = jax.random.normal(k1, (B, Cin, H, W), jnp.float32)
    x_pre = jax.random.normal(k2, (B, Cout, 2 * H, 2 * W), jnp.float32)

    def xavier_uniform(k, shape, fan_in, fan_out):
        limit = (6.0 / (fan_in + fan_out)) ** 0.5
        return jax.random.uniform(k, shape, jnp.float32, -limit, limit)

    # ConvTranspose2d(Cin, Cout, 3) weight: (Cin, Cout, 3, 3)
    w_deconv = xavier_uniform(k3, (Cin, Cout, 3, 3), Cin * 9, Cout * 9)
    # Conv2d(2*Cout, Cout, 3) weight: (Cout, 2*Cout, 3, 3)
    w_conv = xavier_uniform(k4, (Cout, 2 * Cout, 3, 3), 2 * Cout * 9, Cout * 9)

    out = jax.block_until_ready(jax.jit(deconv2d_fuse_forward)(x_pre, x, w_deconv, w_conv))
    ref = jax.block_until_ready(jax.jit(reference_forward)(x_pre, x, w_deconv, w_conv))

    assert out.shape == (B, Cout, 2 * H, 2 * W), out.shape
    max_err = float(jnp.max(jnp.abs(out - ref)))
    assert jnp.allclose(out, ref, atol=1e-2, rtol=1e-2), max_err
    print("KERNEL_OK")
</pallas_src>

<mosaic_0001>
module attributes {stable_mosaic.version = 11 : i64} {
  func.func @kernel(%arg0: i32, %arg1: memref<1x9x9x8xbf16, #tpu.memory_space<vmem>>, %arg2: memref<4x8x512xbf16, #tpu.memory_space<vmem>>, %arg3: memref<1x64x512xf32, #tpu.memory_space<vmem>>, %arg4: memref<1x8x512xf32, #tpu.memory_space<vmem>>) attributes {dimension_semantics = [#tpu.dimension_semantics<parallel>], iteration_bounds = array<i64: 2>, scalar_prefetch = 0 : i64, scratch_operands = 0 : i64, tpu.core_type = #tpu.core_type<tc>, window_params = [{transform_indices = @transform_0, window_bounds = array<i64: 1, 9, 9, 8>}, {pipeline_mode = #tpu.pipeline_mode<synchronous>, transform_indices = @transform_1, window_bounds = array<i64: 4, 8, 512>}, {transform_indices = @transform_2, window_bounds = array<i64: 1, 64, 512>}, {transform_indices = @transform_3, window_bounds = array<i64: 1, 8, 512>}]} {
    %c0_i32 = arith.constant 0 : i32
    %c8_i32 = arith.constant 8 : i32
    %0 = arith.addi %c0_i32, %c8_i32 : i32
    %c1_i32 = arith.constant 1 : i32
    scf.for %arg5 = %c0_i32 to %0 step %c1_i32  : i32 {
      %cst_8 = arith.constant 0.000000e+00 : f32
      %13 = vector.broadcast %cst_8 : f32 to vector<8x512xf32>
      %c0_i32_9 = arith.constant 0 : i32
      %14 = arith.addi %arg5, %c0_i32_9 : i32
      %c0_10 = arith.constant 0 : index
      %15 = arith.index_cast %14 : i32 to index
      %c0_11 = arith.constant 0 : index
      %c0_12 = arith.constant 0 : index
      %16 = vector.load %arg1[%c0_10, %15, %c0_11, %c0_12] : memref<1x9x9x8xbf16, #tpu.memory_space<vmem>>, vector<1x1x9x8xbf16>
      %17 = vector.shape_cast %16 : vector<1x1x9x8xbf16> to vector<1x9x8xbf16>
      %18 = vector.shape_cast %17 : vector<1x9x8xbf16> to vector<9x8xbf16>
      %19 = vector.extract_strided_slice %18 {offsets = [0, 0], sizes = [8, 8], strides = [1, 1]} : vector<9x8xbf16> to vector<8x8xbf16>
      %c0_13 = arith.constant 0 : index
      %c0_14 = arith.constant 0 : index
      %c0_15 = arith.constant 0 : index
      %20 = vector.load %arg2[%c0_13, %c0_14, %c0_15] : memref<4x8x512xbf16, #tpu.memory_space<vmem>>, vector<1x8x512xbf16>
      %21 = vector.shape_cast %20 : vector<1x8x512xbf16> to vector<8x512xbf16>
      %cst_16 = arith.constant dense<0.000000e+00> : vector<8x512xf32>
      %22 = tpu.matmul %19, %21, %cst_16 {dimension_numbers = #tpu.dot_dimension_numbers<[1], [0], [0], [1], [0, 0, 1, 1], [], []>} : vector<8x8xbf16>, vector<8x512xbf16>, vector<8x512xf32> -> vector<8x512xf32>
      %23 = arith.addf %13, %22 : vector<8x512xf32>
      %24 = vector.extract_strided_slice %18 {offsets = [1, 0], sizes = [8, 8], strides = [1, 1]} : vector<9x8xbf16> to vector<8x8xbf16>
      %c1 = arith.constant 1 : index
      %c0_17 = arith.constant 0 : index
      %c0_18 = arith.constant 0 : index
      %25 = vector.load %arg2[%c1, %c0_17, %c0_18] : memref<4x8x512xbf16, #tpu.memory_space<vmem>>, vector<1x8x512xbf16>
      %26 = vector.shape_cast %25 : vector<1x8x512xbf16> to vector<8x512xbf16>
      %cst_19 = arith.constant dense<0.000000e+00> : vector<8x512xf32>
      %27 = tpu.matmul %24, %26, %cst_19 {dimension_numbers = #tpu.dot_dimension_numbers<[1], [0], [0], [1], [0, 0, 1, 1], [], []>} : vector<8x8xbf16>, vector<8x512xbf16>, vector<8x512xf32> -> vector<8x512xf32>
      %28 = arith.addf %23, %27 : vector<8x512xf32>
      %c1_i32_20 = arith.constant 1 : i32
      %29 = arith.addi %arg5, %c1_i32_20 : i32
      %c0_21 = arith.constant 0 : index
      %30 = arith.index_cast %29 : i32 to index
      %c0_22 = arith.constant 0 : index
      %c0_23 = arith.constant 0 : index
      %31 = vector.load %arg1[%c0_21, %30, %c0_22, %c0_23] : memref<1x9x9x8xbf16, #tpu.memory_space<vmem>>, vector<1x1x9x8xbf16>
      %32 = vector.shape_cast %31 : vector<1x1x9x8xbf16> to vector<1x9x8xbf16>
      %33 = vector.shape_cast %32 : vector<1x9x8xbf16> to vector<9x8xbf16>
      %34 = vector.extract_strided_slice %33 {offsets = [0, 0], sizes = [8, 8], strides = [1, 1]} : vector<9x8xbf16> to vector<8x8xbf16>
      %c2 = arith.constant 2 : index
      %c0_24 = arith.constant 0 : index
      %c0_25 = arith.constant 0 : index
      %35 = vector.load %arg2[%c2, %c0_24, %c0_25] : memref<4x8x512xbf16, #tpu.memory_space<vmem>>, vector<1x8x512xbf16>
      %36 = vector.shape_cast %35 : vector<1x8x512xbf16> to vector<8x512xbf16>
      %cst_26 = arith.constant dense<0.000000e+00> : vector<8x512xf32>
      %37 = tpu.matmul %34, %36, %cst_26 {dimension_numbers = #tpu.dot_dimension_numbers<[1], [0], [0], [1], [0, 0, 1, 1], [], []>} : vector<8x8xbf16>, vector<8x512xbf16>, vector<8x512xf32> -> vector<8x512xf32>
      %38 = arith.addf %28, %37 : vector<8x512xf32>
      %39 = vector.extract_strided_slice %33 {offsets = [1, 0], sizes = [8, 8], strides = [1, 1]} : vector<9x8xbf16> to vector<8x8xbf16>
      %c3 = arith.constant 3 : index
      %c0_27 = arith.constant 0 : index
      %c0_28 = arith.constant 0 : index
      %40 = vector.load %arg2[%c3, %c0_27, %c0_28] : memref<4x8x512xbf16, #tpu.memory_space<vmem>>, vector<1x8x512xbf16>
      %41 = vector.shape_cast %40 : vector<1x8x512xbf16> to vector<8x512xbf16>
      %cst_29 = arith.constant dense<0.000000e+00> : vector<8x512xf32>
      %42 = tpu.matmul %39, %41, %cst_29 {dimension_numbers = #tpu.dot_dimension_numbers<[1], [0], [0], [1], [0, 0, 1, 1], [], []>} : vector<8x8xbf16>, vector<8x512xbf16>, vector<8x512xf32> -> vector<8x512xf32>
      %43 = arith.addf %38, %42 : vector<8x512xf32>
      %c8_i32_30 = arith.constant 8 : i32
      %44 = arith.muli %arg5, %c8_i32_30 : i32
      %45 = tpu.assume_multiple %44, 8 : i32
      %c0_31 = arith.constant 0 : index
      %46 = arith.index_cast %45 : i32 to index
      %c0_32 = arith.constant 0 : index
      %47 = vector.load %arg3[%c0_31, %46, %c0_32] : memref<1x64x512xf32, #tpu.memory_space<vmem>>, vector<1x8x512xf32>
      %48 = vector.shape_cast %47 : vector<1x8x512xf32> to vector<8x512xf32>
      %49 = vector.shape_cast %43 : vector<8x512xf32> to vector<1x8x512xf32>
      tpu.vector_store %arg3[%c0_31, %46, %c0_32], %49 {strides = array<i32>} : memref<1x64x512xf32, #tpu.memory_space<vmem>>, vector<1x8x512xf32>,
    }
    %c8_i32_0 = arith.constant 8 : i32
    %c0 = arith.constant 0 : index
    %c0_1 = arith.constant 0 : index
    %c0_2 = arith.constant 0 : index
    %1 = vector.load %arg3[%c0, %c0_1, %c0_2] : memref<1x64x512xf32, #tpu.memory_space<vmem>>, vector<1x64x512xf32>
    %2 = vector.shape_cast %1 : vector<1x64x512xf32> to vector<64x512xf32>
    %cst = arith.constant dense<0.000000e+00> : vector<512xf32>
    %3 = vector.multi_reduction <add>, %2, %cst [0] : vector<64x512xf32> to vector<512xf32>
    %4 = vector.shape_cast %3 : vector<512xf32> to vector<1x512xf32>
    %5 = arith.mulf %2, %2 : vector<64x512xf32>
    %cst_3 = arith.constant dense<0.000000e+00> : vector<512xf32>
    %6 = vector.multi_reduction <add>, %5, %cst_3 [0] : vector<64x512xf32> to vector<512xf32>
    %7 = vector.shape_cast %6 : vector<512xf32> to vector<1x512xf32>
    %cst_4 = arith.constant 0.000000e+00 : f32
    %8 = vector.broadcast %cst_4 : f32 to vector<6x512xf32>
    %9 = tpu.concatenate %4, %7, %8 in 0 : vector<1x512xf32>, vector<1x512xf32>, vector<6x512xf32> -> vector<8x512xf32>
    %c0_5 = arith.constant 0 : index
    %c0_6 = arith.constant 0 : index
    %c0_7 = arith.constant 0 : index
    %10 = vector.load %arg4[%c0_5, %c0_6, %c0_7] : memref<1x8x512xf32, #tpu.memory_space<vmem>>, vector<1x8x512xf32>
    %11 = vector.shape_cast %10 : vector<1x8x512xf32> to vector<8x512xf32>
    %12 = vector.shape_cast %9 : vector<8x512xf32> to vector<1x8x512xf32>
    tpu.vector_store %arg4[%c0_5, %c0_6, %c0_7], %12 {strides = array<i32>} : memref<1x8x512xf32, #tpu.memory_space<vmem>>, vector<1x8x512xf32>,
    return
  }
  func.func @transform_0(%arg0: i32) -> (i32, i32, i32, i32) {
    %c0_i32 = arith.constant 0 : i32
    %c0_i32_0 = arith.constant 0 : i32
    %c0_i32_1 = arith.constant 0 : i32
    %c0_i32_2 = arith.constant 0 : i32
    return %arg0, %c0_i32, %c0_i32_0, %c0_i32_1 : i32, i32, i32, i32
  }
  func.func @transform_1(%arg0: i32) -> (i32, i32, i32) {
    %c0_i32 = arith.constant 0 : i32
    %c0_i32_0 = arith.constant 0 : i32
    %c0_i32_1 = arith.constant 0 : i32
    %c0_i32_2 = arith.constant 0 : i32
    return %c0_i32, %c0_i32_0, %c0_i32_1 : i32, i32, i32
  }
  func.func @transform_2(%arg0: i32) -> (i32, i32, i32) {
    %c0_i32 = arith.constant 0 : i32
    %c0_i32_0 = arith.constant 0 : i32
    %c0_i32_1 = arith.constant 0 : i32
    return %arg0, %c0_i32, %c0_i32_0 : i32, i32, i32
  }
  func.func @transform_3(%arg0: i32) -> (i32, i32, i32) {
    %c0_i32 = arith.constant 0 : i32
    %c0_i32_0 = arith.constant 0 : i32
    %c0_i32_1 = arith.constant 0 : i32
    return %arg0, %c0_i32, %c0_i32_0 : i32, i32, i32
  }
}

module attributes {stable_mosaic.version = 11 : i64} {
  func.func @_bn_relu_kernel(%arg0: i32, %arg1: memref<128x512xf32, #tpu.memory_space<vmem>>, %arg2: memref<1x512xf32, #tpu.memory_space<vmem>>, %arg3: memref<1x512xf32, #tpu.memory_space<vmem>>, %arg4: memref<128x512xbf16, #tpu.memory_space<vmem>>) attributes {dimension_semantics = [#tpu.dimension_semantics<parallel>], iteration_bounds = array<i64: 1>, scalar_prefetch = 0 : i64, scratch_operands = 0 : i64, tpu.core_type = #tpu.core_type<tc>, window_params = [{transform_indices = @transform_0, window_bounds = array<i64: 128, 512>}, {pipeline_mode = #tpu.pipeline_mode<synchronous>, transform_indices = @transform_1, window_bounds = array<i64: 1, 512>}, {pipeline_mode = #tpu.pipeline_mode<synchronous>, transform_indices = @transform_2, window_bounds = array<i64: 1, 512>}, {transform_indices = @transform_3, window_bounds = array<i64: 128, 512>}]} {
    %c0 = arith.constant 0 : index
    %c0_0 = arith.constant 0 : index
    %0 = vector.load %arg1[%c0, %c0_0] : memref<128x512xf32, #tpu.memory_space<vmem>>, vector<128x512xf32>
    %c0_1 = arith.constant 0 : index
    %c0_2 = arith.constant 0 : index
    %1 = vector.load %arg2[%c0_1, %c0_2] : memref<1x512xf32, #tpu.memory_space<vmem>>, vector<1x512xf32>
    %2 = vector.broadcast %1 : vector<1x512xf32> to vector<128x512xf32>
    %3 = arith.subf %0, %2 : vector<128x512xf32>
    %c0_3 = arith.constant 0 : index
    %c0_4 = arith.constant 0 : index
    %4 = vector.load %arg3[%c0_3, %c0_4] : memref<1x512xf32, #tpu.memory_space<vmem>>, vector<1x512xf32>
    %5 = vector.broadcast %4 : vector<1x512xf32> to vector<128x512xf32>
    %6 = arith.mulf %3, %5 : vector<128x512xf32>
    %cst = arith.constant 0.000000e+00 : f32
    %7 = vector.broadcast %cst : f32 to vector<128x512xf32>
    %8 = arith.maximumf %6, %7 : vector<128x512xf32>
    %9 = arith.truncf %8 : vector<128x512xf32> to vector<128x512xbf16>
    %c0_5 = arith.constant 0 : index
    %c0_6 = arith.constant 0 : index
    %10 = vector.load %arg4[%c0_5, %c0_6] : memref<128x512xbf16, #tpu.memory_space<vmem>>, vector<128x512xbf16>
    tpu.vector_store %arg4[%c0_5, %c0_6], %9 {strides = array<i32>} : memref<128x512xbf16, #tpu.memory_space<vmem>>, vector<128x512xbf16>,
    return
  }
  func.func @transform_0(%arg0: i32) -> (i32, i32) {
    %c0_i32 = arith.constant 0 : i32
    %c0_i32_0 = arith.constant 0 : i32
    return %arg0, %c0_i32 : i32, i32
  }
  func.func @transform_1(%arg0: i32) -> (i32, i32) {
    %c0_i32 = arith.constant 0 : i32
    %c0_i32_0 = arith.constant 0 : i32
    %c0_i32_1 = arith.constant 0 : i32
    return %c0_i32, %c0_i32_0 : i32, i32
  }
  func.func @transform_2(%arg0: i32) -> (i32, i32) {
    %c0_i32 = arith.constant 0 : i32
    %c0_i32_0 = arith.constant 0 : i32
    %c0_i32_1 = arith.constant 0 : i32
    return %c0_i32, %c0_i32_0 : i32, i32
  }
  func.func @transform_3(%arg0: i32) -> (i32, i32) {
    %c0_i32 = arith.constant 0 : i32
    %c0_i32_0 = arith.constant 0 : i32
    return %arg0, %c0_i32 : i32, i32
  }
}

module attributes {stable_mosaic.version = 11 : i64} {
  func.func @kernel(%arg0: i32, %arg1: memref<1x18x18x8xbf16, #tpu.memory_space<vmem>>, %arg2: memref<1x18x18x8xbf16, #tpu.memory_space<vmem>>, %arg3: memref<9x8x128xbf16, #tpu.memory_space<vmem>>, %arg4: memref<9x8x128xbf16, #tpu.memory_space<vmem>>, %arg5: memref<1x256x128xf32, #tpu.memory_space<vmem>>, %arg6: memref<1x8x128xf32, #tpu.memory_space<vmem>>) attributes {dimension_semantics = [#tpu.dimension_semantics<parallel>], iteration_bounds = array<i64: 2>, scalar_prefetch = 0 : i64, scratch_operands = 0 : i64, tpu.core_type = #tpu.core_type<tc>, window_params = [{transform_indices = @transform_0, window_bounds = array<i64: 1, 18, 18, 8>}, {transform_indices = @transform_1, window_bounds = array<i64: 1, 18, 18, 8>}, {pipeline_mode = #tpu.pipeline_mode<synchronous>, transform_indices = @transform_2, window_bounds = array<i64: 9, 8, 128>}, {pipeline_mode = #tpu.pipeline_mode<synchronous>, transform_indices = @transform_3, window_bounds = array<i64: 9, 8, 128>}, {transform_indices = @transform_4, window_bounds = array<i64: 1, 256, 128>}, {transform_indices = @transform_5, window_bounds = array<i64: 1, 8, 128>}]} {
    %c0_i32 = arith.constant 0 : i32
    %c16_i32 = arith.constant 16 : i32
    %0 = arith.addi %c0_i32, %c16_i32 : i32
    %c1_i32 = arith.constant 1 : i32
    scf.for %arg7 = %c0_i32 to %0 step %c1_i32  : i32 {
      %cst_8 = arith.constant 0.000000e+00 : f32
      %13 = vector.broadcast %cst_8 : f32 to vector<16x128xf32>
      %c0_i32_9 = arith.constant 0 : i32
      %14 = arith.addi %arg7, %c0_i32_9 : i32
      %c0_10 = arith.constant 0 : index
      %15 = arith.index_cast %14 : i32 to index
      %c0_11 = arith.constant 0 : index
      %c0_12 = arith.constant 0 : index
      %16 = vector.load %arg1[%c0_10, %15, %c0_11, %c0_12] : memref<1x18x18x8xbf16, #tpu.memory_space<vmem>>, vector<1x1x18x8xbf16>
      %17 = vector.shape_cast %16 : vector<1x1x18x8xbf16> to vector<1x18x8xbf16>
      %18 = vector.shape_cast %17 : vector<1x18x8xbf16> to vector<18x8xbf16>
      %19 = vector.extract_strided_slice %18 {offsets = [0, 0], sizes = [16, 8], strides = [1, 1]} : vector<18x8xbf16> to vector<16x8xbf16>
      %c0_13 = arith.constant 0 : index
      %c0_14 = arith.constant 0 : index
      %c0_15 = arith.constant 0 : index
      %20 = vector.load %arg3[%c0_13, %c0_14, %c0_15] : memref<9x8x128xbf16, #tpu.memory_space<vmem>>, vector<1x8x128xbf16>
      %21 = vector.shape_cast %20 : vector<1x8x128xbf16> to vector<8x128xbf16>
      %cst_16 = arith.constant dense<0.000000e+00> : vector<16x128xf32>
      %22 = tpu.matmul %19, %21, %cst_16 {dimension_numbers = #tpu.dot_dimension_numbers<[1], [0], [0], [1], [0, 0, 1, 1], [], []>} : vector<16x8xbf16>, vector<8x128xbf16>, vector<16x128xf32> -> vector<16x128xf32>
      %23 = arith.addf %13, %22 : vector<16x128xf32>
      %24 = vector.extract_strided_slice %18 {offsets = [1, 0], sizes = [16, 8], strides = [1, 1]} : vector<18x8xbf16> to vector<16x8xbf16>
      %c1 = arith.constant 1 : index
      %c0_17 = arith.constant 0 : index
      %c0_18 = arith.constant 0 : index
      %25 = vector.load %arg3[%c1, %c0_17, %c0_18] : memref<9x8x128xbf16, #tpu.memory_space<vmem>>, vector<1x8x128xbf16>
      %26 = vector.shape_cast %25 : vector<1x8x128xbf16> to vector<8x128xbf16>
      %cst_19 = arith.constant dense<0.000000e+00> : vector<16x128xf32>
      %27 = tpu.matmul %24, %26, %cst_19 {dimension_numbers = #tpu.dot_dimension_numbers<[1], [0], [0], [1], [0, 0, 1, 1], [], []>} : vector<16x8xbf16>, vector<8x128xbf16>, vector<16x128xf32> -> vector<16x128xf32>
      %28 = arith.addf %23, %27 : vector<16x128xf32>
      %29 = vector.extract_strided_slice %18 {offsets = [2, 0], sizes = [16, 8], strides = [1, 1]} : vector<18x8xbf16> to vector<16x8xbf16>
      %c2 = arith.constant 2 : index
      %c0_20 = arith.constant 0 : index
      %c0_21 = arith.constant 0 : index
      %30 = vector.load %arg3[%c2, %c0_20, %c0_21] : memref<9x8x128xbf16, #tpu.memory_space<vmem>>, vector<1x8x128xbf16>
      %31 = vector.shape_cast %30 : vector<1x8x128xbf16> to vector<8x128xbf16>
      %cst_22 = arith.constant dense<0.000000e+00> : vector<16x128xf32>
      %32 = tpu.matmul %29, %31, %cst_22 {dimension_numbers = #tpu.dot_dimension_numbers<[1], [0], [0], [1], [0, 0, 1, 1], [], []>} : vector<16x8xbf16>, vector<8x128xbf16>, vector<16x128xf32> -> vector<16x128xf32>
      %33 = arith.addf %28, %32 : vector<16x128xf32>
      %c1_i32_23 = arith.constant 1 : i32
      %34 = arith.addi %arg7, %c1_i32_23 : i32
      %c0_24 = arith.constant 0 : index
      %35 = arith.index_cast %34 : i32 to index
      %c0_25 = arith.constant 0 : index
      %c0_26 = arith.constant 0 : index
      %36 = vector.load %arg1[%c0_24, %35, %c0_25, %c0_26] : memref<1x18x18x8xbf16, #tpu.memory_space<vmem>>, vector<1x1x18x8xbf16>
      %37 = vector.shape_cast %36 : vector<1x1x18x8xbf16> to vector<1x18x8xbf16>
      %38 = vector.shape_cast %37 : vector<1x18x8xbf16> to vector<18x8xbf16>
      %39 = vector.extract_strided_slice %38 {offsets = [0, 0], sizes = [16, 8], strides = [1, 1]} : vector<18x8xbf16> to vector<16x8xbf16>
      %c3 = arith.constant 3 : index
      %c0_27 = arith.constant 0 : index
      %c0_28 = arith.constant 0 : index
      %40 = vector.load %arg3[%c3, %c0_27, %c0_28] : memref<9x8x128xbf16, #tpu.memory_space<vmem>>, vector<1x8x128xbf16>
      %41 = vector.shape_cast %40 : vector<1x8x128xbf16> to vector<8x128xbf16>
      %cst_29 = arith.constant dense<0.000000e+00> : vector<16x128xf32>
      %42 = tpu.matmul %39, %41, %cst_29 {dimension_numbers = #tpu.dot_dimension_numbers<[1], [0], [0], [1], [0, 0, 1, 1], [], []>} : vector<16x8xbf16>, vector<8x128xbf16>, vector<16x128xf32> -> vector<16x128xf32>
      %43 = arith.addf %33, %42 : vector<16x128xf32>
      %44 = vector.extract_strided_slice %38 {offsets = [1, 0], sizes = [16, 8], strides = [1, 1]} : vector<18x8xbf16> to vector<16x8xbf16>
      %c4 = arith.constant 4 : index
      %c0_30 = arith.constant 0 : index
      %c0_31 = arith.constant 0 : index
      %45 = vector.load %arg3[%c4, %c0_30, %c0_31] : memref<9x8x128xbf16, #tpu.memory_space<vmem>>, vector<1x8x128xbf16>
      %46 = vector.shape_cast %45 : vector<1x8x128xbf16> to vector<8x128xbf16>
      %cst_32 = arith.constant dense<0.000000e+00> : vector<16x128xf32>
      %47 = tpu.matmul %44, %46, %cst_32 {dimension_numbers = #tpu.dot_dimension_numbers<[1], [0], [0], [1], [0, 0, 1, 1], [], []>} : vector<16x8xbf16>, vector<8x128xbf16>, vector<16x128xf32> -> vector<16x128xf32>
      %48 = arith.addf %43, %47 : vector<16x128xf32>
      %49 = vector.extract_strided_slice %38 {offsets = [2, 0], sizes = [16, 8], strides = [1, 1]} : vector<18x8xbf16> to vector<16x8xbf16>
      %c5 = arith.constant 5 : index
      %c0_33 = arith.constant 0 : index
      %c0_34 = arith.constant 0 : index
      %50 = vector.load %arg3[%c5, %c0_33, %c0_34] : memref<9x8x128xbf16, #tpu.memory_space<vmem>>, vector<1x8x128xbf16>
      %51 = vector.shape_cast %50 : vector<1x8x128xbf16> to vector<8x128xbf16>
      %cst_35 = arith.constant dense<0.000000e+00> : vector<16x128xf32>
      %52 = tpu.matmul %49, %51, %cst_35 {dimension_numbers = #tpu.dot_dimension_numbers<[1], [0], [0], [1], [0, 0, 1, 1], [], []>} : vector<16x8xbf16>, vector<8x128xbf16>, vector<16x128xf32> -> vector<16x128xf32>
      %53 = arith.addf %48, %52 : vector<16x128xf32>
      %c2_i32 = arith.constant 2 : i32
      %54 = arith.addi %arg7, %c2_i32 : i32
      %c0_36 = arith.constant 0 : index
      %55 = arith.index_cast %54 : i32 to index
      %c0_37 = arith.constant 0 : index
      %c0_38 = arith.constant 0 : index
      %56 = vector.load %arg1[%c0_36, %55, %c0_37, %c0_38] : memref<1x18x18x8xbf16, #tpu.memory_space<vmem>>, vector<1x1x18x8xbf16>
      %57 = vector.shape_cast %56 : vector<1x1x18x8xbf16> to vector<1x18x8xbf16>
      %58 = vector.shape_cast %57 : vector<1x18x8xbf16> to vector<18x8xbf16>
      %59 = vector.extract_strided_slice %58 {offsets = [0, 0], sizes = [16, 8], strides = [1, 1]} : vector<18x8xbf16> to vector<16x8xbf16>
      %c6 = arith.constant 6 : index
      %c0_39 = arith.constant 0 : index
      %c0_40 = arith.constant 0 : index
      %60 = vector.load %arg3[%c6, %c0_39, %c0_40] : memref<9x8x128xbf16, #tpu.memory_space<vmem>>, vector<1x8x128xbf16>
      %61 = vector.shape_cast %60 : vector<1x8x128xbf16> to vector<8x128xbf16>
      %cst_41 = arith.constant dense<0.000000e+00> : vector<16x128xf32>
      %62 = tpu.matmul %59, %61, %cst_41 {dimension_numbers = #tpu.dot_dimension_numbers<[1], [0], [0], [1], [0, 0, 1, 1], [], []>} : vector<16x8xbf16>, vector<8x128xbf16>, vector<16x128xf32> -> vector<16x128xf32>
      %63 = arith.addf %53, %62 : vector<16x128xf32>
      %64 = vector.extract_strided_slice %58 {offsets = [1, 0], sizes = [16, 8], strides = [1, 1]} : vector<18x8xbf16> to vector<16x8xbf16>
      %c7 = arith.constant 7 : index
      %c0_42 = arith.constant 0 : index
      %c0_43 = arith.constant 0 : index
      %65 = vector.load %arg3[%c7, %c0_42, %c0_43] : memref<9x8x128xbf16, #tpu.memory_space<vmem>>, vector<1x8x128xbf16>
      %66 = vector.shape_cast %65 : vector<1x8x128xbf16> to vector<8x128xbf16>
      %cst_44 = arith.constant dense<0.000000e+00> : vector<16x128xf32>
      %67 = tpu.matmul %64, %66, %cst_44 {dimension_numbers = #tpu.dot_dimension_numbers<[1], [0], [0], [1], [0, 0, 1, 1], [], []>} : vector<16x8xbf16>, vector<8x128xbf16>, vector<16x128xf32> -> vector<16x128xf32>
      %68 = arith.addf %63, %67 : vector<16x128xf32>
      %69 = vector.extract_strided_slice %58 {offsets = [2, 0], sizes = [16, 8], strides = [1, 1]} : vector<18x8xbf16> to vector<16x8xbf16>
      %c8 = arith.constant 8 : index
      %c0_45 = arith.constant 0 : index
      %c0_46 = arith.constant 0 : index
      %70 = vector.load %arg3[%c8, %c0_45, %c0_46] : memref<9x8x128xbf16, #tpu.memory_space<vmem>>, vector<1x8x128xbf16>
      %71 = vector.shape_cast %70 : vector<1x8x128xbf16> to vector<8x128xbf16>
      %cst_47 = arith.constant dense<0.000000e+00> : vector<16x128xf32>
      %72 = tpu.matmul %69, %71, %cst_47 {dimension_numbers = #tpu.dot_dimension_numbers<[1], [0], [0], [1], [0, 0, 1, 1], [], []>} : vector<16x8xbf16>, vector<8x128xbf16>, vector<16x128xf32> -> vector<16x128xf32>
      %73 = arith.addf %68, %72 : vector<16x128xf32>
      %c0_i32_48 = arith.constant 0 : i32
      %74 = arith.addi %arg7, %c0_i32_48 : i32
      %c0_49 = arith.constant 0 : index
      %75 = arith.index_cast %74 : i32 to index
      %c0_50 = arith.constant 0 : index
      %c0_51 = arith.constant 0 : index
      %76 = vector.load %arg2[%c0_49, %75, %c0_50, %c0_51] : memref<1x18x18x8xbf16, #tpu.memory_space<vmem>>, vector<1x1x18x8xbf16>
      %77 = vector.shape_cast %76 : vector<1x1x18x8xbf16> to vector<1x18x8xbf16>
      %78 = vector.shape_cast %77 : vector<1x18x8xbf16> to vector<18x8xbf16>
      %79 = vector.extract_strided_slice %78 {offsets = [0, 0], sizes = [16, 8], strides = [1, 1]} : vector<18x8xbf16> to vector<16x8xbf16>
      %c0_52 = arith.constant 0 : index
      %c0_53 = arith.constant 0 : index
      %c0_54 = arith.constant 0 : index
      %80 = vector.load %arg4[%c0_52, %c0_53, %c0_54] : memref<9x8x128xbf16, #tpu.memory_space<vmem>>, vector<1x8x128xbf16>
      %81 = vector.shape_cast %80 : vector<1x8x128xbf16> to vector<8x128xbf16>
      %cst_55 = arith.constant dense<0.000000e+00> : vector<16x128xf32>
      %82 = tpu.matmul %79, %81, %cst_55 {dimension_numbers = #tpu.dot_dimension_numbers<[1], [0], [0], [1], [0, 0, 1, 1], [], []>} : vector<16x8xbf16>, vector<8x128xbf16>, vector<16x128xf32> -> vector<16x128xf32>
      %83 = arith.addf %73, %82 : vector<16x128xf32>
      %84 = vector.extract_strided_slice %78 {offsets = [1, 0], sizes = [16, 8], strides = [1, 1]} : vector<18x8xbf16> to vector<16x8xbf16>
      %c1_56 = arith.constant 1 : index
      %c0_57 = arith.constant 0 : index
      %c0_58 = arith.constant 0 : index
      %85 = vector.load %arg4[%c1_56, %c0_57, %c0_58] : memref<9x8x128xbf16, #tpu.memory_space<vmem>>, vector<1x8x128xbf16>
      %86 = vector.shape_cast %85 : vector<1x8x128xbf16> to vector<8x128xbf16>
      %cst_59 = arith.constant dense<0.000000e+00> : vector<16x128xf32>
      %87 = tpu.matmul %84, %86, %cst_59 {dimension_numbers = #tpu.dot_dimension_numbers<[1], [0], [0], [1], [0, 0, 1, 1], [], []>} : vector<16x8xbf16>, vector<8x128xbf16>, vector<16x128xf32> -> vector<16x128xf32>
      %88 = arith.addf %83, %87 : vector<16x128xf32>
      %89 = vector.extract_strided_slice %78 {offsets = [2, 0], sizes = [16, 8], strides = [1, 1]} : vector<18x8xbf16> to vector<16x8xbf16>
      %c2_60 = arith.constant 2 : index
      %c0_61 = arith.constant 0 : index
      %c0_62 = arith.constant 0 : index
      %90 = vector.load %arg4[%c2_60, %c0_61, %c0_62] : memref<9x8x128xbf16, #tpu.memory_space<vmem>>, vector<1x8x128xbf16>
      %91 = vector.shape_cast %90 : vector<1x8x128xbf16> to vector<8x128xbf16>
      %cst_63 = arith.constant dense<0.000000e+00> : vector<16x128xf32>
      %92 = tpu.matmul %89, %91, %cst_63 {dimension_numbers = #tpu.dot_dimension_numbers<[1], [0], [0], [1], [0, 0, 1, 1], [], []>} : vector<16x8xbf16>, vector<8x128xbf16>, vector<16x128xf32> -> vector<16x128xf32>
      %93 = arith.addf %88, %92 : vector<16x128xf32>
      %c1_i32_64 = arith.constant 1 : i32
      %94 = arith.addi %arg7, %c1_i32_64 : i32
      %c0_65 = arith.constant 0 : index
      %95 = arith.index_cast %94 : i32 to index
      %c0_66 = arith.constant 0 : index
      %c0_67 = arith.constant 0 : index
      %96 = vector.load %arg2[%c0_65, %95, %c0_66, %c0_67] : memref<1x18x18x8xbf16, #tpu.memory_space<vmem>>, vector<1x1x18x8xbf16>
      %97 = vector.shape_cast %96 : vector<1x1x18x8xbf16> to vector<1x18x8xbf16>
      %98 = vector.shape_cast %97 : vector<1x18x8xbf16> to vector<18x8xbf16>
      %99 = vector.extract_strided_slice %98 {offsets = [0, 0], sizes = [16, 8], strides = [1, 1]} : vector<18x8xbf16> to vector<16x8xbf16>
      %c3_68 = arith.constant 3 : index
      %c0_69 = arith.constant 0 : index
      %c0_70 = arith.constant 0 : index
      %100 = vector.load %arg4[%c3_68, %c0_69, %c0_70] : memref<9x8x128xbf16, #tpu.memory_space<vmem>>, vector<1x8x128xbf16>
      %101 = vector.shape_cast %100 : vector<1x8x128xbf16> to vector<8x128xbf16>
      %cst_71 = arith.constant dense<0.000000e+00> : vector<16x128xf32>
      %102 = tpu.matmul %99, %101, %cst_71 {dimension_numbers = #tpu.dot_dimension_numbers<[1], [0], [0], [1], [0, 0, 1, 1], [], []>} : vector<16x8xbf16>, vector<8x128xbf16>, vector<16x128xf32> -> vector<16x128xf32>
      %103 = arith.addf %93, %102 : vector<16x128xf32>
      %104 = vector.extract_strided_slice %98 {offsets = [1, 0], sizes = [16, 8], strides = [1, 1]} : vector<18x8xbf16> to vector<16x8xbf16>
      %c4_72 = arith.constant 4 : index
      %c0_73 = arith.constant 0 : index
      %c0_74 = arith.constant 0 : index
      %105 = vector.load %arg4[%c4_72, %c0_73, %c0_74] : memref<9x8x128xbf16, #tpu.memory_space<vmem>>, vector<1x8x128xbf16>
      %106 = vector.shape_cast %105 : vector<1x8x128xbf16> to vector<8x128xbf16>
      %cst_75 = arith.constant dense<0.000000e+00> : vector<16x128xf32>
      %107 = tpu.matmul %104, %106, %cst_75 {dimension_numbers = #tpu.dot_dimension_numbers<[1], [0], [0], [1], [0, 0, 1, 1], [], []>} : vector<16x8xbf16>, vector<8x128xbf16>, vector<16x128xf32> -> vector<16x128xf32>
      %108 = arith.addf %103, %107 : vector<16x128xf32>
      %109 = vector.extract_strided_slice %98 {offsets = [2, 0], sizes = [16, 8], strides = [1, 1]} : vector<18x8xbf16> to vector<16x8xbf16>
      %c5_76 = arith.constant 5 : index
      %c0_77 = arith.constant 0 : index
      %c0_78 = arith.constant 0 : index
      %110 = vector.load %arg4[%c5_76, %c0_77, %c0_78] : memref<9x8x128xbf16, #tpu.memory_space<vmem>>, vector<1x8x128xbf16>
      %111 = vector.shape_cast %110 : vector<1x8x128xbf16> to vector<8x128xbf16>
      %cst_79 = arith.constant dense<0.000000e+00> : vector<16x128xf32>
      %112 = tpu.matmul %109, %111, %cst_79 {dimension_numbers = #tpu.dot_dimension_numbers<[1], [0], [0], [1], [0, 0, 1, 1], [], []>} : vector<16x8xbf16>, vector<8x128xbf16>, vector<16x128xf32> -> vector<16x128xf32>
      %113 = arith.addf %108, %112 : vector<16x128xf32>
      %c2_i32_80 = arith.constant 2 : i32
      %114 = arith.addi %arg7, %c2_i32_80 : i32
      %c0_81 = arith.constant 0 : index
      %115 = arith.index_cast %114 : i32 to index
      %c0_82 = arith.constant 0 : index
      %c0_83 = arith.constant 0 : index
      %116 = vector.load %arg2[%c0_81, %115, %c0_82, %c0_83] : memref<1x18x18x8xbf16, #tpu.memory_space<vmem>>, vector<1x1x18x8xbf16>
      %117 = vector.shape_cast %116 : vector<1x1x18x8xbf16> to vector<1x18x8xbf16>
      %118 = vector.shape_cast %117 : vector<1x18x8xbf16> to vector<18x8xbf16>
      %119 = vector.extract_strided_slice %118 {offsets = [0, 0], sizes = [16, 8], strides = [1, 1]} : vector<18x8xbf16> to vector<16x8xbf16>
      %c6_84 = arith.constant 6 : index
      %c0_85 = arith.constant 0 : index
      %c0_86 = arith.constant 0 : index
      %120 = vector.load %arg4[%c6_84, %c0_85, %c0_86] : memref<9x8x128xbf16, #tpu.memory_space<vmem>>, vector<1x8x128xbf16>
      %121 = vector.shape_cast %120 : vector<1x8x128xbf16> to vector<8x128xbf16>
      %cst_87 = arith.constant dense<0.000000e+00> : vector<16x128xf32>
      %122 = tpu.matmul %119, %121, %cst_87 {dimension_numbers = #tpu.dot_dimension_numbers<[1], [0], [0], [1], [0, 0, 1, 1], [], []>} : vector<16x8xbf16>, vector<8x128xbf16>, vector<16x128xf32> -> vector<16x128xf32>
      %123 = arith.addf %113, %122 : vector<16x128xf32>
      %124 = vector.extract_strided_slice %118 {offsets = [1, 0], sizes = [16, 8], strides = [1, 1]} : vector<18x8xbf16> to vector<16x8xbf16>
      %c7_88 = arith.constant 7 : index
      %c0_89 = arith.constant 0 : index
      %c0_90 = arith.constant 0 : index
      %125 = vector.load %arg4[%c7_88, %c0_89, %c0_90] : memref<9x8x128xbf16, #tpu.memory_space<vmem>>, vector<1x8x128xbf16>
      %126 = vector.shape_cast %125 : vector<1x8x128xbf16> to vector<8x128xbf16>
      %cst_91 = arith.constant dense<0.000000e+00> : vector<16x128xf32>
      %127 = tpu.matmul %124, %126, %cst_91 {dimension_numbers = #tpu.dot_dimension_numbers<[1], [0], [0], [1], [0, 0, 1, 1], [], []>} : vector<16x8xbf16>, vector<8x128xbf16>, vector<16x128xf32> -> vector<16x128xf32>
      %128 = arith.addf %123, %127 : vector<16x128xf32>
      %129 = vector.extract_strided_slice %118 {offsets = [2, 0], sizes = [16, 8], strides = [1, 1]} : vector<18x8xbf16> to vector<16x8xbf16>
      %c8_92 = arith.constant 8 : index
      %c0_93 = arith.constant 0 : index
      %c0_94 = arith.constant 0 : index
      %130 = vector.load %arg4[%c8_92, %c0_93, %c0_94] : memref<9x8x128xbf16, #tpu.memory_space<vmem>>, vector<1x8x128xbf16>
      %131 = vector.shape_cast %130 : vector<1x8x128xbf16> to vector<8x128xbf16>
      %cst_95 = arith.constant dense<0.000000e+00> : vector<16x128xf32>
      %132 = tpu.matmul %129, %131, %cst_95 {dimension_numbers = #tpu.dot_dimension_numbers<[1], [0], [0], [1], [0, 0, 1, 1], [], []>} : vector<16x8xbf16>, vector<8x128xbf16>, vector<16x128xf32> -> vector<16x128xf32>
      %133 = arith.addf %128, %132 : vector<16x128xf32>
      %c16_i32_96 = arith.constant 16 : i32
      %134 = arith.muli %arg7, %c16_i32_96 : i32
      %135 = tpu.assume_multiple %134, 8 : i32
      %c0_97 = arith.constant 0 : index
      %136 = arith.index_cast %135 : i32 to index
      %c0_98 = arith.constant 0 : index
      %137 = vector.load %arg5[%c0_97, %136, %c0_98] : memref<1x256x128xf32, #tpu.memory_space<vmem>>, vector<1x16x128xf32>
      %138 = vector.shape_cast %137 : vector<1x16x128xf32> to vector<16x128xf32>
      %139 = vector.shape_cast %133 : vector<16x128xf32> to vector<1x16x128xf32>
      tpu.vector_store %arg5[%c0_97, %136, %c0_98], %139 {strides = array<i32>} : memref<1x256x128xf32, #tpu.memory_space<vmem>>, vector<1x16x128xf32>,
    }
    %c16_i32_0 = arith.constant 16 : i32
    %c0 = arith.constant 0 : index
    %c0_1 = arith.constant 0 : index
    %c0_2 = arith.constant 0 : index
    %1 = vector.load %arg5[%c0, %c0_1, %c0_2] : memref<1x256x128xf32, #tpu.memory_space<vmem>>, vector<1x256x128xf32>
    %2 = vector.shape_cast %1 : vector<1x256x128xf32> to vector<256x128xf32>
    %cst = arith.constant dense<0.000000e+00> : vector<128xf32>
    %3 = vector.multi_reduction <add>, %2, %cst [0] : vector<256x128xf32> to vector<128xf32>
    %4 = vector.shape_cast %3 : vector<128xf32> to vector<1x128xf32>
    %5 = arith.mulf %2, %2 : vector<256x128xf32>
    %cst_3 = arith.constant dense<0.000000e+00> : vector<128xf32>
    %6 = vector.multi_reduction <add>, %5, %cst_3 [0] : vector<256x128xf32> to vector<128xf32>
    %7 = vector.shape_cast %6 : vector<128xf32> to vector<1x128xf32>
    %cst_4 = arith.constant 0.000000e+00 : f32
    %8 = vector.broadcast %cst_4 : f32 to vector<6x128xf32>
    %9 = tpu.concatenate %4, %7, %8 in 0 : vector<1x128xf32>, vector<1x128xf32>, vector<6x128xf32> -> vector<8x128xf32>
    %c0_5 = arith.constant 0 : index
    %c0_6 = arith.constant 0 : index
    %c0_7 = arith.constant 0 : index
    %10 = vector.load %arg6[%c0_5, %c0_6, %c0_7] : memref<1x8x128xf32, #tpu.memory_space<vmem>>, vector<1x8x128xf32>
    %11 = vector.shape_cast %10 : vector<1x8x128xf32> to vector<8x128xf32>
    %12 = vector.shape_cast %9 : vector<8x128xf32> to vector<1x8x128xf32>
    tpu.vector_store %arg6[%c0_5, %c0_6, %c0_7], %12 {strides = array<i32>} : memref<1x8x128xf32, #tpu.memory_space<vmem>>, vector<1x8x128xf32>,
    return
  }
  func.func @transform_0(%arg0: i32) -> (i32, i32, i32, i32) {
    %c0_i32 = arith.constant 0 : i32
    %c0_i32_0 = arith.constant 0 : i32
    %c0_i32_1 = arith.constant 0 : i32
    %c0_i32_2 = arith.constant 0 : i32
    return %arg0, %c0_i32, %c0_i32_0, %c0_i32_1 : i32, i32, i32, i32
  }
  func.func @transform_1(%arg0: i32) -> (i32, i32, i32, i32) {
    %c0_i32 = arith.constant 0 : i32
    %c0_i32_0 = arith.constant 0 : i32
    %c0_i32_1 = arith.constant 0 : i32
    %c0_i32_2 = arith.constant 0 : i32
    return %arg0, %c0_i32, %c0_i32_0, %c0_i32_1 : i32, i32, i32, i32
  }
  func.func @transform_2(%arg0: i32) -> (i32, i32, i32) {
    %c0_i32 = arith.constant 0 : i32
    %c0_i32_0 = arith.constant 0 : i32
    %c0_i32_1 = arith.constant 0 : i32
    %c0_i32_2 = arith.constant 0 : i32
    return %c0_i32, %c0_i32_0, %c0_i32_1 : i32, i32, i32
  }
  func.func @transform_3(%arg0: i32) -> (i32, i32, i32) {
    %c0_i32 = arith.constant 0 : i32
    %c0_i32_0 = arith.constant 0 : i32
    %c0_i32_1 = arith.constant 0 : i32
    %c0_i32_2 = arith.constant 0 : i32
    return %c0_i32, %c0_i32_0, %c0_i32_1 : i32, i32, i32
  }
  func.func @transform_4(%arg0: i32) -> (i32, i32, i32) {
    %c0_i32 = arith.constant 0 : i32
    %c0_i32_0 = arith.constant 0 : i32
    %c0_i32_1 = arith.constant 0 : i32
    return %arg0, %c0_i32, %c0_i32_0 : i32, i32, i32
  }
  func.func @transform_5(%arg0: i32) -> (i32, i32, i32) {
    %c0_i32 = arith.constant 0 : i32
    %c0_i32_0 = arith.constant 0 : i32
    %c0_i32_1 = arith.constant 0 : i32
    return %arg0, %c0_i32, %c0_i32_0 : i32, i32, i32
  }
}

module attributes {stable_mosaic.version = 11 : i64} {
  func.func @_bn_relu_kernel(%arg0: i32, %arg1: memref<512x128xf32, #tpu.memory_space<vmem>>, %arg2: memref<1x128xf32, #tpu.memory_space<vmem>>, %arg3: memref<1x128xf32, #tpu.memory_space<vmem>>, %arg4: memref<512x128xf32, #tpu.memory_space<vmem>>) attributes {dimension_semantics = [#tpu.dimension_semantics<parallel>], iteration_bounds = array<i64: 1>, scalar_prefetch = 0 : i64, scratch_operands = 0 : i64, tpu.core_type = #tpu.core_type<tc>, window_params = [{transform_indices = @transform_0, window_bounds = array<i64: 512, 128>}, {pipeline_mode = #tpu.pipeline_mode<synchronous>, transform_indices = @transform_1, window_bounds = array<i64: 1, 128>}, {pipeline_mode = #tpu.pipeline_mode<synchronous>, transform_indices = @transform_2, window_bounds = array<i64: 1, 128>}, {transform_indices = @transform_3, window_bounds = array<i64: 512, 128>}]} {
    %c0 = arith.constant 0 : index
    %c0_0 = arith.constant 0 : index
    %0 = vector.load %arg1[%c0, %c0_0] : memref<512x128xf32, #tpu.memory_space<vmem>>, vector<512x128xf32>
    %c0_1 = arith.constant 0 : index
    %c0_2 = arith.constant 0 : index
    %1 = vector.load %arg2[%c0_1, %c0_2] : memref<1x128xf32, #tpu.memory_space<vmem>>, vector<1x128xf32>
    %2 = vector.broadcast %1 : vector<1x128xf32> to vector<512x128xf32>
    %3 = arith.subf %0, %2 : vector<512x128xf32>
    %c0_3 = arith.constant 0 : index
    %c0_4 = arith.constant 0 : index
    %4 = vector.load %arg3[%c0_3, %c0_4] : memref<1x128xf32, #tpu.memory_space<vmem>>, vector<1x128xf32>
    %5 = vector.broadcast %4 : vector<1x128xf32> to vector<512x128xf32>
    %6 = arith.mulf %3, %5 : vector<512x128xf32>
    %cst = arith.constant 0.000000e+00 : f32
    %7 = vector.broadcast %cst : f32 to vector<512x128xf32>
    %8 = arith.maximumf %6, %7 : vector<512x128xf32>
    %c0_5 = arith.constant 0 : index
    %c0_6 = arith.constant 0 : index
    %9 = vector.load %arg4[%c0_5, %c0_6] : memref<512x128xf32, #tpu.memory_space<vmem>>, vector<512x128xf32>
    tpu.vector_store %arg4[%c0_5, %c0_6], %8 {strides = array<i32>} : memref<512x128xf32, #tpu.memory_space<vmem>>, vector<512x128xf32>,
    return
  }
  func.func @transform_0(%arg0: i32) -> (i32, i32) {
    %c0_i32 = arith.constant 0 : i32
    %c0_i32_0 = arith.constant 0 : i32
    return %arg0, %c0_i32 : i32, i32
  }
  func.func @transform_1(%arg0: i32) -> (i32, i32) {
    %c0_i32 = arith.constant 0 : i32
    %c0_i32_0 = arith.constant 0 : i32
    %c0_i32_1 = arith.constant 0 : i32
    return %c0_i32, %c0_i32_0 : i32, i32
  }
  func.func @transform_2(%arg0: i32) -> (i32, i32) {
    %c0_i32 = arith.constant 0 : i32
    %c0_i32_0 = arith.constant 0 : i32
    %c0_i32_1 = arith.constant 0 : i32
    return %c0_i32, %c0_i32_0 : i32, i32
  }
  func.func @transform_3(%arg0: i32) -> (i32, i32) {
    %c0_i32 = arith.constant 0 : i32
    %c0_i32_0 = arith.constant 0 : i32
    return %arg0, %c0_i32 : i32, i32
  }
}

</mosaic_0001>

<bundles_post_ra>
// kernel: tile.17
= control target key start
LH: loop header
LB: loop body
LE: loop exit
PB: predicated region body
PF: predicated region fallthrough
CT: control target
= control target key end

     0   :  { %s22_s0 = inlined_call_operand.vmem [shape: f32[128], index: 0, kind: input, shape index: {}]   ;;  %s23_s1 = inlined_call_operand.vmem [shape: f32[4,128], index: 1, kind: output, shape index: {}]  }
   0x1   :  { %v4_v0 = vld [vmem:[%s22_s0] ss:$0 sm:$0xff] }
   0x2   :  { %5 = vst [vmem:[%s23_s1] sm:$0xf] %v4_v0 }

// kernel: deconv2d_fuse_forward.4
= control target key start
LH: loop header
LB: loop body
LE: loop exit
PB: predicated region body
PF: predicated region fallthrough
CT: control target
= control target key end

     0   :  { %s1104_s12 = smov 0   ;;  %s1251_s0 = inlined_call_operand.vmem [shape: bf16[2,9,9,8], index: 0, kind: input, shape index: {}]   ;;  %s1252_s1 = inlined_call_operand.vmem [shape: bf16[4,8,512], index: 1, kind: input, shape index: {}]   ;;  %s1253_s2 = inlined_call_operand.vmem [shape: f32[2,64,512], index: 2, kind: output, shape index: {0}]   ;;  %s1254_s3 = inlined_call_operand.vmem [shape: f32[2,8,512], index: 3, kind: output, shape index: {1}]  }
   0x1 LB: > { %s967_s13 = sadd.s32 4294967295, %s1077_s12   ;;  %p971_p0 = scmp.ge.s32.totalorder %s1077_s12, 1  ;;  %s1077_s12 = sphi %s1104_s12, %s14_s12  }
   0x2   : > { %p140_p1 = scmp.lt.s32.totalorder %s1077_s12, 3 }
   0x4   : > { %p141_p2 = pnand %p971_p0, %p140_p1 }
   0x5   : > { %p169_p3 = scmp.lt.s32.totalorder (!%p141_p2), %s967_s13, 1  ;;  %s1127_s26 = smov (!%p141_p2), 0  }
   0x6   : > { %144 = sbr.rel (%p141_p2) target bundleno = 310 (0x136), region = 28 }
   0xb   : > { %s1256_s13 = smov (!%p169_p3, %s967_s13), 1 }
   0xc   : > { %s1031_s14 = smul.u32 72, %s1256_s13  ;;  %s1027_s15 = sshll.u32 %s1256_s13, 8 }
   0xd   : > { %s1115_s18 = scalar_lea.vmem %s1253_s2, %s1027_s15  ;;  %s1028_s19 = sshll.u32 %s1256_s13, 5 }
   0xe   : > { %s1120_s22 = scalar_lea.vmem %s1251_s0, %s1031_s14  ;;  %s1125_s25 = scalar_lea.vmem %s1254_s3, %s1028_s19 }
   0xf LB: >> { %v979_v0 = vld [vmem:[%s1252_s1 + $0x10] sm:$0xff]  ;;  %vm227_vm0 = vcmask 1043456   ;;  %v980_v1 = vld [vmem:[%s1252_s1 + $0x18] sm:$0xff]  ;;  %v196_v2 = vld [vmem:[%s1252_s1] sm:$0xff]  ;;  %v1083_v7 = vmov 0   ;;  %s1029_s8 = sshll.u32 %s1081_s26, 3  ;;  %s1081_s26 = sphi %s1127_s26, %s190_s26  }
  0x10   : >> { %v983_v3 = vcombine.high %v979_v0, %v979_v0  ;;  %v985_v4 = vcombine.high %v980_v1, %v980_v1  ;;  %v982_v5 = vcombine.low %v979_v0, %v979_v0  ;;  %v984_v6 = vcombine.low %v980_v1, %v980_v1  ;;  %272 = vmatprep.mubr.bf16.mxu0 %v1083_v7  ;;  %v197_v8 = vld [vmem:[%s1252_s1 + $0x8] sm:$0xff]  ;;  %s1154_s9 = scalar_lea.vmem %s1120_s22, %s1029_s8  ;;  %v1001_v21 = vld [vmem:[%s1252_s1 + $0x20] sm:$0xff]  ;;  %v1011_v30 = vld [vmem:[%s1252_s1 + $0x30] sm:$0xff]  ;;  %s676_s20 = sshra.s32 %s1029_s8, 3 }
  0x11   : >> { %313 = vmatprep.mubr.bf16.mxu1 %v1083_v7  ;;  %v991_v9 = vcombine.high %v196_v2, %v196_v2  ;;  %v993_v10 = vcombine.high %v197_v8, %v197_v8  ;;  %v194_v13 = vld [vmem:[%s1154_s9] sm:$0xf]  ;;  %v195_v14 = vld [vmem:[%s1154_s9 + $0x4] sm:$0x1]  ;;  %v990_v18 = vcombine.low %v196_v2, %v196_v2  ;;  %v992_v19 = vcombine.low %v197_v8, %v197_v8  ;;  %v1002_v22 = vld [vmem:[%s1252_s1 + $0x28] sm:$0xff]  ;;  %s1030_s21 = sshll.u32 %s676_s20, 5 }
  0x12   : >> { %986 = vmatprep.subr.msk.bf16.mxu0 %vm227_vm0, %v983_v3  ;;  %988 = vmatprep.subr.msk.bf16.mxu1 %vm227_vm0, %v985_v4  ;;  %v229_v11 = vsel %vm227_vm0, %v982_v5, 0  ;;  %v235_v12 = vsel %vm227_vm0, %v984_v6, 0  ;;  %v981_v15 = vcombine.low %v194_v13, %v195_v14  ;;  %vm223_vm1 = vcmask 64512   ;;  %v1012_v31 = vld [vmem:[%s1252_s1 + $0x38] sm:$0xff]  ;;  %v999_v32 = vld [vmem:[%s1154_s9 + $0x8] sm:$0xf]  ;;  %s680_s23 = scalar_lea.vmem %s1115_s18, %s1030_s21 }
  0x13   : >> { %255 = vmatpush1.bf16.msra.mxu0 %v229_v11  ;;  %296 = vmatpush1.bf16.msra.mxu1 %v235_v12  ;;  %v336_v24 = vsel %vm227_vm0, %v990_v18, 0  ;;  %v342_v25 = vsel %vm227_vm0, %v992_v19, 0  ;;  %v1004_v26 = vcombine.high %v1001_v21, %v1001_v21  ;;  %v1006_v27 = vcombine.high %v1002_v22, %v1002_v22  ;;  %v1000_v33 = vld [vmem:[%s1154_s9 + $0xc] sm:$0x1]  ;;  %s190_s26 = sadd.s32 1, %s1081_s26  }
  0x14   : >> { %994 = vmatprep.subr.msk.bf16.mxu0 %vm227_vm0, %v991_v9  ;;  %996 = vmatprep.subr.msk.bf16.mxu1 %vm227_vm0, %v993_v10  ;;  %v207_v16 = vshrl.u32 %v981_v15, 16  ;;  %v209_v17 = vshll.u32 %v981_v15, 16  ;;  %v1003_v28 = vcombine.low %v1001_v21, %v1001_v21  ;;  %v1005_v29 = vcombine.low %v1002_v22, %v1002_v22  ;;  %p187_p4 = scmp.ge.s32.totalorder %s190_s26, 8  }
  0x15   : >> { %v1015_v36 = vcombine.high %v1011_v30, %v1011_v30  ;;  %v1017_v37 = vcombine.high %v1012_v31, %v1012_v31  ;;  %v1013_v38 = vcombine.low %v999_v32, %v1000_v33  ;;  %v1014_v39 = vcombine.low %v1011_v30, %v1011_v30 }
  0x16   : >> { %v211_v20 = vrot.slane %v209_v17, 1  ;;  %v452_v34 = vsel %vm227_vm0, %v1003_v28, 0  ;;  %v458_v35 = vsel %vm227_vm0, %v1005_v29, 0  ;;  %v1016_v40 = vcombine.low %v1012_v31, %v1012_v31 }
  0x17   : >> { %v560_v41 = vshll.u32 %v1013_v38, 16  ;;  %v578_v42 = vsel %vm227_vm0, %v1014_v39, 0  ;;  %v558_v44 = vshrl.u32 %v1013_v38, 16  ;;  %vm853_vm2 = vcmask (%p187_p4), 1040384  }
  0x18   : >> { %v212_v23 = vor.u32 %v211_v20, %v207_v16  ;;  %v584_v43 = vsel %vm227_vm0, %v1016_v40, 0  ;;  %vm858_vm3 = vcmask (%p187_p4), 1041408  }
  0x19   : >> { %v562_v45 = vrot.slane %v560_v41, 1 }
  0x1a   : >> { %987 = vmatmul.mubr.msk.bf16.vlgmr.msra.gmra.mxu0 %vm223_vm1, %v212_v23  ;;  %989 = vmatmul.mubr.msk.bf16.vlgmr.msra.gmra.mxu1 %vm223_vm1, %v212_v23 }
  0x1b   : >> { %362 = vmatpush1.bf16.msra.mxu0 %v336_v24  ;;  %403 = vmatpush1.bf16.msra.mxu1 %v342_v25  ;;  %v563_v46 = vor.u32 %v562_v45, %v558_v44 }
  0x1c   : >> { %379 = vmatprep.mubr.bf16.mxu0 %v1083_v7  ;;  %420 = vmatprep.mubr.bf16.mxu1 %v1083_v7 }
  0x1d   : >> { %1007 = vmatprep.subr.msk.bf16.mxu0 %vm227_vm0, %v1004_v26  ;;  %1009 = vmatprep.subr.msk.bf16.mxu1 %vm227_vm0, %v1006_v27 }
  0x22   : >> { %995 = vmatmul.mubr.msk.bf16.vlgmr.msra.gmra.mxu0 %vm223_vm1, %v194_v13  ;;  %997 = vmatmul.mubr.msk.bf16.vlgmr.msra.gmra.mxu1 %vm223_vm1, %v194_v13 }
  0x23   : >> { %478 = vmatpush1.bf16.msra.mxu0 %v452_v34  ;;  %519 = vmatpush1.bf16.msra.mxu1 %v458_v35 }
  0x24   : >> { %495 = vmatprep.mubr.bf16.mxu0 %v1083_v7  ;;  %536 = vmatprep.mubr.bf16.mxu1 %v1083_v7 }
  0x25   : >> { %1018 = vmatprep.subr.msk.bf16.mxu0 %vm227_vm0, %v1015_v36  ;;  %1020 = vmatprep.subr.msk.bf16.mxu1 %vm227_vm0, %v1017_v37 }
  0x2a   : >> { %1008 = vmatmul.mubr.msk.bf16.vlgmr.msra.gmra.mxu0 %vm223_vm1, %v999_v32  ;;  %1010 = vmatmul.mubr.msk.bf16.vlgmr.msra.gmra.mxu1 %vm223_vm1, %v999_v32 }
  0x2b   : >> { %604 = vmatpush1.bf16.msra.mxu0 %v578_v42  ;;  %645 = vmatpush1.bf16.msra.mxu1 %v584_v43 }
  0x2c   : >> { %621 = vmatprep.mubr.bf16.mxu0 %v1083_v7  ;;  %662 = vmatprep.mubr.bf16.mxu1 %v1083_v7 }
  0x32   : >> { %1019 = vmatmul.mubr.msk.bf16.vlgmr.msra.gmra.mxu0 %vm223_vm1, %v563_v46  ;;  %1021 = vmatmul.mubr.msk.bf16.vlgmr.msra.gmra.mxu1 %vm223_vm1, %v563_v46 }
  0xda   : >> { %v274_v47 = vpop.f32.mrf.mxu0  ;;  %v315_v48 = vpop.f32.mrf.mxu1 }
  0xdc   : >> { %v276_v49 = vpop.f32.mrf.mxu0  ;;  %v317_v50 = vpop.f32.mrf.mxu1 }
  0xde   : >> { %v278_v51 = vpop.f32.mrf.mxu0  ;;  %v319_v52 = vpop.f32.mrf.mxu1 }
  0xe0   : >> { %v279_v53 = vpop.f32.mrf.mxu0  ;;  %v320_v54 = vpop.f32.mrf.mxu1 }
  0xe2   : >> { %v381_v55 = vpop.f32.mrf.mxu0  ;;  %v422_v56 = vpop.f32.mrf.mxu1 }
  0xe3   : >> { %v382_v5 = vadd.f32 %v381_v55, %v274_v47  ;;  %v423_v6 = vadd.f32 %v422_v56, %v315_v48 }
  0xe4   : >> { %v383_v57 = vpop.f32.mrf.mxu0  ;;  %v424_v58 = vpop.f32.mrf.mxu1 }
  0xe5   : >> { %v384_v9 = vadd.f32 %v383_v57, %v276_v49  ;;  %v425_v10 = vadd.f32 %v424_v58, %v317_v50 }
  0xe6   : >> { %v385_v59 = vpop.f32.mrf.mxu0  ;;  %v426_v60 = vpop.f32.mrf.mxu1 }
  0xe8   : >> { %v386_v61 = vpop.f32.mrf.mxu0  ;;  %v427_v62 = vpop.f32.mrf.mxu1 }
  0xea   : >> { %v497_v63 = vpop.f32.mrf.mxu0  ;;  %v538_v0 = vpop.f32.mrf.mxu1 }
  0xeb   : >> { %v545_v11 = vadd.f32 %v497_v63, %v382_v5  ;;  %v547_v12 = vadd.f32 %v538_v0, %v423_v6 }
  0xec   : >> { %v499_v1 = vpop.f32.mrf.mxu0  ;;  %v540_v2 = vpop.f32.mrf.mxu1 }
  0xed   : >> { %v546_v15 = vadd.f32 %v499_v1, %v384_v9  ;;  %v548_v16 = vadd.f32 %v540_v2, %v425_v10 }
  0xee   : >> { %v501_v3 = vpop.f32.mrf.mxu0  ;;  %v542_v4 = vpop.f32.mrf.mxu1 }
  0xf0   : >> { %v502_v7 = vpop.f32.mrf.mxu0  ;;  %v543_v8 = vpop.f32.mrf.mxu1 }
  0xf2   : >> { %v623_v13 = vpop.f32.mrf.mxu0  ;;  %v664_v14 = vpop.f32.mrf.mxu1 }
  0xf3   : >> { %v671_v17 = vadd.f32 %v623_v13, %v545_v11  ;;  %v673_v18 = vadd.f32 %v664_v14, %v547_v12 }
  0xf4   : >> { %v625_v19 = vpop.f32.mrf.mxu0  ;;  %v666_v20 = vpop.f32.mrf.mxu1  ;;  %189 = sbr.rel (!%p187_p4) target bundleno = 15 (0xf), region = 83 }
  0xf5   : >> { %681 = vst [vmem:[%s680_s23] sm:$0xff] %v671_v17  ;;  %683 = vst [vmem:[%s680_s23 + $0x10] sm:$0xff] %v673_v18  ;;  %v672_v21 = vadd.f32 %v625_v19, %v546_v15  ;;  %v674_v22 = vadd.f32 %v666_v20, %v548_v16 }
  0xf6   : >> { %v627_v23 = vpop.f32.mrf.mxu0  ;;  %v668_v24 = vpop.f32.mrf.mxu1 }
  0xf7   : >> { %682 = vst [vmem:[%s680_s23 + $0x8] sm:$0xff] %v672_v21  ;;  %684 = vst [vmem:[%s680_s23 + $0x18] sm:$0xff] %v674_v22 }
  0xf8   : >> { %v628_v25 = vpop.f32.mrf.mxu0  ;;  %v669_v26 = vpop.f32.mrf.mxu1 }
  0xfe   : > { %v685_v27 = vld [vmem:[%s1115_s18] sm:$0xff]  ;;  %v686_v39 = vld [vmem:[%s1115_s18 + $0x8] sm:$0xff]  ;;  %v687_v55 = vld [vmem:[%s1115_s18 + $0x10] sm:$0xff] }
  0xff   : > { %v689_v28 = vld [vmem:[%s1115_s18 + $0x20] sm:$0xff]  ;;  %v769_v34 = vmul.f32 %v685_v27, %v685_v27  ;;  %v690_v43 = vld [vmem:[%s1115_s18 + $0x28] sm:$0xff]  ;;  %v770_v48 = vmul.f32 %v686_v39, %v686_v39  ;;  %v691_v56 = vld [vmem:[%s1115_s18 + $0x30] sm:$0xff]  ;;  %v771_v6 = vmul.f32 %v687_v55, %v687_v55 }
 0x100   : > { %v693_v29 = vld [vmem:[%s1115_s18 + $0x40] sm:$0xff]  ;;  %v717_v33 = vadd.f32 %v689_v28, %v685_v27  ;;  %v773_v35 = vmul.f32 %v689_v28, %v689_v28  ;;  %v694_v44 = vld [vmem:[%s1115_s18 + $0x48] sm:$0xff]  ;;  %v730_v47 = vadd.f32 %v690_v43, %v686_v39  ;;  %v774_v49 = vmul.f32 %v690_v43, %v690_v43  ;;  %v695_v2 = vld [vmem:[%s1115_s18 + $0x50] sm:$0xff] }
 0x101   : > { %v697_v30 = vld [vmem:[%s1115_s18 + $0x60] sm:$0xff]  ;;  %v777_v36 = vmul.f32 %v693_v29, %v693_v29  ;;  %v698_v45 = vld [vmem:[%s1115_s18 + $0x68] sm:$0xff]  ;;  %v778_v54 = vmul.f32 %v694_v44, %v694_v44  ;;  %v743_v3 = vadd.f32 %v691_v56, %v687_v55  ;;  %v775_v7 = vmul.f32 %v691_v56, %v691_v56  ;;  %v699_v12 = vld [vmem:[%s1115_s18 + $0x70] sm:$0xff] }
 0x102   : > { %v701_v31 = vld [vmem:[%s1115_s18 + $0x80] sm:$0xff]  ;;  %v718_v40 = vadd.f32 %v717_v33, %v693_v29  ;;  %v781_v41 = vmul.f32 %v697_v30, %v697_v30  ;;  %v801_v42 = vadd.f32 %v773_v35, %v769_v34  ;;  %v702_v53 = vld [vmem:[%s1115_s18 + $0x88] sm:$0xff]  ;;  %v731_v59 = vadd.f32 %v730_v47, %v694_v44  ;;  %v703_v21 = vld [vmem:[%s1115_s18 + $0x90] sm:$0xff] }
 0x103   : > { %v705_v32 = vld [vmem:[%s1115_s18 + $0xa0] sm:$0xff]  ;;  %v785_v46 = vmul.f32 %v701_v31, %v701_v31  ;;  %v782_v60 = vmul.f32 %v698_v45, %v698_v45  ;;  %v706_v63 = vld [vmem:[%s1115_s18 + $0xa8] sm:$0xff]  ;;  %v814_v1 = vadd.f32 %v774_v49, %v770_v48  ;;  %v786_v5 = vmul.f32 %v702_v53, %v702_v53  ;;  %v692_v33 = vld [vmem:[%s1115_s18 + $0x38] sm:$0xff] }
 0x104   : > { %v709_v37 = vld [vmem:[%s1115_s18 + $0xc0] sm:$0xff]  ;;  %v719_v50 = vadd.f32 %v718_v40, %v697_v30  ;;  %v789_v51 = vmul.f32 %v705_v32, %v705_v32  ;;  %v802_v52 = vadd.f32 %v801_v42, %v777_v36  ;;  %v710_v0 = vld [vmem:[%s1115_s18 + $0xc8] sm:$0xff]  ;;  %v732_v4 = vadd.f32 %v731_v59, %v698_v45  ;;  %v707_v30 = vld [vmem:[%s1115_s18 + $0xb0] sm:$0xff] }
 0x105   : > { %v713_v38 = vld [vmem:[%s1115_s18 + $0xe0] sm:$0xff]  ;;  %v793_v57 = vmul.f32 %v709_v37, %v709_v37  ;;  %v714_v10 = vld [vmem:[%s1115_s18 + $0xe8] sm:$0xff]  ;;  %v815_v11 = vadd.f32 %v814_v1, %v778_v54  ;;  %v744_v13 = vadd.f32 %v743_v3, %v695_v2  ;;  %v790_v15 = vmul.f32 %v706_v63, %v706_v63  ;;  %v711_v42 = vld [vmem:[%s1115_s18 + $0xd0] sm:$0xff] }
 0x106   : > { %v797_v58 = vmul.f32 %v713_v38, %v713_v38  ;;  %v720_v61 = vadd.f32 %v719_v50, %v701_v31  ;;  %v803_v62 = vadd.f32 %v802_v52, %v781_v41  ;;  %v733_v14 = vadd.f32 %v732_v4, %v702_v53  ;;  %v696_v44 = vld [vmem:[%s1115_s18 + $0x58] sm:$0xff] }
 0x107   : > { %v794_v16 = vmul.f32 %v710_v0, %v710_v0  ;;  %v779_v17 = vmul.f32 %v695_v2, %v695_v2  ;;  %v816_v20 = vadd.f32 %v815_v11, %v782_v60  ;;  %v745_v22 = vadd.f32 %v744_v13, %v699_v12  ;;  %v700_v53 = vld [vmem:[%s1115_s18 + $0x78] sm:$0xff] }
 0x108   : > { %v721_v8 = vadd.f32 %v720_v61, %v705_v32  ;;  %v804_v9 = vadd.f32 %v803_v62, %v785_v46  ;;  %v734_v23 = vadd.f32 %v733_v14, %v706_v63  ;;  %v798_v24 = vmul.f32 %v714_v10, %v714_v10  ;;  %v688_v32 = vld [vmem:[%s1115_s18 + $0x18] sm:$0xff] }
 0x109   : > { %v783_v25 = vmul.f32 %v699_v12, %v699_v12  ;;  %v827_v26 = vadd.f32 %v775_v7, %v771_v6  ;;  %v817_v29 = vadd.f32 %v816_v20, %v786_v5  ;;  %v746_v31 = vadd.f32 %v745_v22, %v703_v21  ;;  %v704_v62 = vld [vmem:[%s1115_s18 + $0x98] sm:$0xff] }
 0x10a   : > { %v722_v18 = vadd.f32 %v721_v8, %v709_v37  ;;  %v805_v19 = vadd.f32 %v804_v9, %v789_v51  ;;  %v735_v34 = vadd.f32 %v734_v23, %v710_v0  ;;  %v787_v35 = vmul.f32 %v703_v21, %v703_v21  ;;  %v715_v51 = vld [vmem:[%s1115_s18 + $0xf0] sm:$0xff]  ;;  %v708_v7 = vld [vmem:[%s1115_s18 + $0xb8] sm:$0xff] }
 0x10b   : > { %v828_v36 = vadd.f32 %v827_v26, %v779_v17  ;;  %v756_v37 = vadd.f32 %v692_v33, %v688_v32  ;;  %v818_v41 = vadd.f32 %v817_v29, %v790_v15  ;;  %v747_v43 = vadd.f32 %v746_v31, %v707_v30 }
 0x10c   : > { %v723_v27 = vadd.f32 %v722_v18, %v713_v38  ;;  %v806_v28 = vadd.f32 %v805_v19, %v793_v57  ;;  %v736_v38 = vadd.f32 %v735_v34, %v714_v10  ;;  %v791_v45 = vmul.f32 %v707_v30, %v707_v30 }
 0x10d   : > { %v829_v46 = vadd.f32 %v828_v36, %v783_v25  ;;  %v757_v47 = vadd.f32 %v756_v37, %v696_v44  ;;  %v819_v50 = vadd.f32 %v818_v41, %v794_v16  ;;  %v748_v52 = vadd.f32 %v747_v43, %v711_v42  ;;  %v712_v16 = vld [vmem:[%s1115_s18 + $0xd8] sm:$0xff] }
 0x10e   : > { %v724_v39 = vrot.slane %v723_v27, 4  ;;  %v807_v40 = vadd.f32 %v806_v28, %v797_v58  ;;  %v737_v54 = vrot.slane %v736_v38, 4  ;;  %v795_v55 = vmul.f32 %v711_v42, %v711_v42  ;;  %v716_v25 = vld [vmem:[%s1115_s18 + $0xf8] sm:$0xff] }
 0x10f   : > { %v830_v56 = vadd.f32 %v829_v46, %v787_v35  ;;  %v758_v57 = vadd.f32 %v757_v47, %v700_v53  ;;  %v820_v60 = vadd.f32 %v819_v50, %v798_v24  ;;  %v749_v61 = vadd.f32 %v748_v52, %v715_v51 }
 0x110   : > { %v725_v48 = vadd.f32 %v724_v39, %v723_v27  ;;  %v808_v49 = vrot.slane %v807_v40, 4  ;;  %v738_v63 = vadd.f32 %v737_v54, %v736_v38  ;;  %v799_v0 = vmul.f32 %v715_v51, %v715_v51 }
 0x111   : > { %v831_v1 = vadd.f32 %v830_v56, %v791_v45  ;;  %v759_v2 = vadd.f32 %v758_v57, %v704_v62  ;;  %v821_v5 = vrot.slane %v820_v60, 4  ;;  %v750_v6 = vrot.slane %v749_v61, 4 }
 0x112   : > { %v726_v58 = vrot.slane %v725_v48, 2  ;;  %v809_v59 = vadd.f32 %v808_v49, %v807_v40  ;;  %v739_v8 = vrot.slane %v738_v63, 2  ;;  %v772_v11 = vmul.f32 %v688_v32, %v688_v32 }
 0x113   : > { %v832_v9 = vadd.f32 %v831_v1, %v795_v55  ;;  %v760_v10 = vadd.f32 %v759_v2, %v708_v7  ;;  %v822_v14 = vadd.f32 %v821_v5, %v820_v60  ;;  %v751_v15 = vadd.f32 %v750_v6, %v749_v61 }
 0x114   : > { %v727_v3 = vadd.f32 %v726_v58, %v725_v48  ;;  %v810_v4 = vrot.slane %v809_v59, 2  ;;  %v740_v17 = vadd.f32 %v739_v8, %v738_v63  ;;  %v776_v20 = vmul.f32 %v692_v33, %v692_v33 }
 0x115   : > { %v833_v18 = vadd.f32 %v832_v9, %v799_v0  ;;  %v761_v19 = vadd.f32 %v760_v10, %v712_v16  ;;  %v823_v23 = vrot.slane %v822_v14, 2  ;;  %v752_v24 = vrot.slane %v751_v15, 2 }
 0x116   : > { %v728_v12 = vrot.slane %v727_v3, 1  ;;  %v811_v13 = vadd.f32 %v810_v4, %v809_v59  ;;  %v741_v26 = vrot.slane %v740_v17, 1  ;;  %v780_v29 = vmul.f32 %v696_v44, %v696_v44 }
 0x117   : > { %v834_v27 = vrot.slane %v833_v18, 4  ;;  %v762_v28 = vadd.f32 %v761_v19, %v716_v25  ;;  %v824_v31 = vadd.f32 %v823_v23, %v822_v14  ;;  %v753_v32 = vadd.f32 %v752_v24, %v751_v15 }
 0x118   : > { %v729_v21 = vadd.f32 %v728_v12, %v727_v3  ;;  %v812_v22 = vrot.slane %v811_v13, 1  ;;  %v784_v35 = vmul.f32 %v700_v53, %v700_v53  ;;  %v788_v36 = vmul.f32 %v704_v62, %v704_v62 }
 0x119   : > { %v835_v34 = vadd.f32 %v834_v27, %v833_v18  ;;  %v840_v37 = vadd.f32 %v776_v20, %v772_v11  ;;  %v742_v39 = vadd.f32 %v741_v26, %v740_v17  ;;  %v825_v40 = vrot.slane %v824_v31, 1 }
 0x11a   : > { %v813_v30 = vadd.f32 %v812_v22, %v811_v13  ;;  %v763_v41 = vrot.slane %v762_v28, 4  ;;  %v754_v43 = vrot.slane %v753_v32, 1  ;;  %v792_v47 = vmul.f32 %v708_v7, %v708_v7 }
 0x11b   : > { %v836_v38 = vrot.slane %v835_v34, 2  ;;  %v841_v44 = vadd.f32 %v840_v37, %v780_v29  ;;  %v826_v45 = vadd.f32 %v825_v40, %v824_v31  ;;  %v796_v51 = vmul.f32 %v712_v16, %v712_v16 }
 0x11c   : > { %v854_v33 = vsel %vm853_vm2, %v729_v21, %v813_v30  ;;  %v764_v50 = vadd.f32 %v763_v41, %v762_v28  ;;  %v755_v53 = vadd.f32 %v754_v43, %v753_v32  ;;  %v800_v57 = vmul.f32 %v716_v25, %v716_v25 }
 0x11d   : > { %v859_v42 = vsel %vm858_vm3, %v854_v33, 0.0  ;;  %v837_v46 = vadd.f32 %v836_v38, %v835_v34  ;;  %v842_v48 = vadd.f32 %v841_v44, %v784_v35  ;;  %v855_v49 = vsel %vm853_vm2, %v742_v39, %v826_v45 }
 0x11e   : > { %863 = vst [vmem:[%s1125_s25] sm:$0xff] %v859_v42  ;;  %v860_v52 = vsel %vm858_vm3, %v855_v49, 0.0  ;;  %v765_v60 = vrot.slane %v764_v50, 2 }
 0x11f   : > { %v838_v54 = vrot.slane %v837_v46, 1  ;;  %v843_v55 = vadd.f32 %v842_v48, %v788_v36  ;;  %864 = vst [vmem:[%s1125_s25 + $0x8] sm:$0xff] %v860_v52 }
 0x120   : > { %v766_v0 = vadd.f32 %v765_v60, %v764_v50 }
 0x121   : > { %v839_v56 = vadd.f32 %v838_v54, %v837_v46  ;;  %v844_v58 = vadd.f32 %v843_v55, %v792_v47 }
 0x122   : > { %v767_v3 = vrot.slane %v766_v0, 1 }
 0x123   : > { %v856_v59 = vsel %vm853_vm2, %v755_v53, %v839_v56  ;;  %v845_v61 = vadd.f32 %v844_v58, %v796_v51 }
 0x124   : > { %v861_v62 = vsel %vm858_vm3, %v856_v59, 0.0  ;;  %v768_v6 = vadd.f32 %v767_v3, %v766_v0 }
 0x125   : > { %865 = vst [vmem:[%s1125_s25 + $0x10] sm:$0xff] %v861_v62  ;;  %v846_v63 = vadd.f32 %v845_v61, %v800_v57 }
 0x127   : > { %v847_v1 = vrot.slane %v846_v63, 4 }
 0x129   : > { %v848_v2 = vadd.f32 %v847_v1, %v846_v63 }
 0x12b   : > { %v849_v4 = vrot.slane %v848_v2, 2 }
 0x12d   : > { %v850_v5 = vadd.f32 %v849_v4, %v848_v2 }
 0x12f   : > { %v851_v7 = vrot.slane %v850_v5, 1 }
 0x131   : > { %v852_v8 = vadd.f32 %v851_v7, %v850_v5 }
 0x133   : > { %v857_v9 = vsel %vm853_vm2, %v768_v6, %v852_v8 }
 0x134   : > { %v862_v10 = vsel %vm858_vm3, %v857_v9, 0.0 }
 0x135   : > { %866 = vst [vmem:[%s1125_s25 + $0x18] sm:$0xff] %v862_v10 }
 0x136 PF: > { %s14_s12 = sadd.s32 1, %s1077_s12  }
 0x137   : > { %p11_p5 = scmp.ge.s32.totalorder %s14_s12, 4  }
 0x139   :  { %13 = sbr.rel (!%p11_p5) target bundleno = 1 (0x1), region = 94 }

// kernel: deconv2d_fuse_forward.5
= control target key start
LH: loop header
LB: loop body
LE: loop exit
PB: predicated region body
PF: predicated region fallthrough
CT: control target
= control target key end

     0   :  { %v80_v0 = vlaneseq  ;;  %s1064_s1 = inlined_call_operand.vmem [shape: f32[1,512], index: 1, kind: input, shape index: {}]   ;;  %s1065_s2 = inlined_call_operand.vmem [shape: f32[1,512], index: 2, kind: input, shape index: {}]   ;;  %s1066_s0 = inlined_call_operand.vmem [shape: f32[128,512], index: 0, kind: input, shape index: {}]   ;;  %s1067_s3 = inlined_call_operand.vmem [shape: bf16[128,512], index: 3, kind: output, shape index: {}]  }
   0x1   :  { %v78_v2 = vld [vmem:[%s1064_s1] sm:$0xf]  ;;  %v15_v5 = vld [vmem:[%s1066_s0 + $0x8] sm:$0xff]  ;;  %v16_v10 = vld [vmem:[%s1066_s0 + $0x10] sm:$0xff] }
   0x2   :  { %v81_v1 = vshrl.u32 %v80_v0, 7  ;;  %v164_v3 = vld [vmem:[%s1065_s2] sm:$0xf]  ;;  %v19_v12 = vld [vmem:[%s1066_s0 + $0x28] sm:$0xff]  ;;  %v17_v17 = vld [vmem:[%s1066_s0 + $0x18] sm:$0xff] }
   0x3   :  { %v14_v4 = vld [vmem:[%s1066_s0] sm:$0xff]  ;;  %v20_v18 = vld [vmem:[%s1066_s0 + $0x30] sm:$0xff]  ;;  %v21_v19 = vld [vmem:[%s1066_s0 + $0x38] sm:$0xff] }
   0x4   :  { %v82_v6 = vsub.s32 0, %v81_v1  ;;  %v86_v7 = vsub.s32 1, %v81_v1  ;;  %v90_v8 = vsub.s32 2, %v81_v1  ;;  %v94_v9 = vsub.s32 3, %v81_v1  ;;  %v18_v11 = vld [vmem:[%s1066_s0 + $0x20] sm:$0xff]  ;;  %v23_v41 = vld [vmem:[%s1066_s0 + $0x48] sm:$0xff] }
   0x5   :  { %v22_v40 = vld [vmem:[%s1066_s0 + $0x40] sm:$0xff]  ;;  %v24_v46 = vld [vmem:[%s1066_s0 + $0x50] sm:$0xff]  ;;  %v25_v47 = vld [vmem:[%s1066_s0 + $0x58] sm:$0xff] }
   0x6   :  { %v647_v13 = vrot.slane %v78_v2, %v82_v6  ;;  %v649_v14 = vrot.slane %v78_v2, %v86_v7  ;;  %v651_v15 = vrot.slane %v164_v3, %v82_v6  ;;  %v653_v16 = vrot.slane %v164_v3, %v86_v7  ;;  %v26_v52 = vld [vmem:[%s1066_s0 + $0x60] sm:$0xff]  ;;  %v27_v53 = vld [vmem:[%s1066_s0 + $0x68] sm:$0xff]  ;;  %v28_v58 = vld [vmem:[%s1066_s0 + $0x70] sm:$0xff] }
   0x7   :  { %v664_v20 = vrot.slane %v78_v2, %v90_v8  ;;  %v666_v21 = vrot.slane %v78_v2, %v94_v9  ;;  %v668_v22 = vrot.slane %v164_v3, %v90_v8  ;;  %v670_v23 = vrot.slane %v164_v3, %v94_v9  ;;  %v29_v59 = vld [vmem:[%s1066_s0 + $0x78] sm:$0xff]  ;;  %v30_v8 = vld [vmem:[%s1066_s0 + $0x80] sm:$0xff] }
   0x8   :  { %v100_v24 = vsub.f32 %v14_v4, %v647_v13  ;;  %v101_v25 = vsub.f32 %v15_v5, %v649_v14  ;;  %v104_v26 = vsub.f32 %v18_v11, %v647_v13  ;;  %v105_v27 = vsub.f32 %v19_v12, %v649_v14 }
   0x9   :  { %v102_v28 = vsub.f32 %v16_v10, %v664_v20  ;;  %v103_v29 = vsub.f32 %v17_v17, %v666_v21  ;;  %v106_v30 = vsub.f32 %v20_v18, %v664_v20  ;;  %v107_v31 = vsub.f32 %v21_v19, %v666_v21  ;;  %v31_v17 = vld [vmem:[%s1066_s0 + $0x88] sm:$0xff] }
   0xa   :  { %v186_v32 = vmul.f32 %v651_v15, %v100_v24  ;;  %v187_v33 = vmul.f32 %v653_v16, %v101_v25  ;;  %v190_v34 = vmul.f32 %v651_v15, %v104_v26  ;;  %v191_v35 = vmul.f32 %v653_v16, %v105_v27  ;;  %v32_v26 = vld [vmem:[%s1066_s0 + $0x90] sm:$0xff]  ;;  %v33_v27 = vld [vmem:[%s1066_s0 + $0x98] sm:$0xff] }
   0xb   :  { %v188_v36 = vmul.f32 %v668_v22, %v102_v28  ;;  %v189_v37 = vmul.f32 %v670_v23, %v103_v29  ;;  %v192_v38 = vmul.f32 %v668_v22, %v106_v30  ;;  %v193_v39 = vmul.f32 %v670_v23, %v107_v31 }
   0xc   :  { %v250_v42 = vmax.f32 %v186_v32, 0.0  ;;  %v251_v43 = vmax.f32 %v187_v33, 0.0  ;;  %v254_v44 = vmax.f32 %v190_v34, 0.0  ;;  %v255_v45 = vmax.f32 %v191_v35, 0.0  ;;  %v34_v32 = vld [vmem:[%s1066_s0 + $0xa0] sm:$0xff]  ;;  %v35_v33 = vld [vmem:[%s1066_s0 + $0xa8] sm:$0xff] }
   0xd   :  { %v252_v48 = vmax.f32 %v188_v36, 0.0  ;;  %v253_v49 = vmax.f32 %v189_v37, 0.0  ;;  %v256_v50 = vmax.f32 %v192_v38, 0.0  ;;  %v257_v51 = vmax.f32 %v193_v39, 0.0  ;;  %v36_v38 = vld [vmem:[%s1066_s0 + $0xb0] sm:$0xff] }
   0xe   :  { %v574_v54 = vpack.c.bf16 %v251_v43, %v250_v42  ;;  %v576_v55 = vpack.c.bf16 %v255_v45, %v254_v44  ;;  %v108_v56 = vsub.f32 %v22_v40, %v647_v13  ;;  %v109_v57 = vsub.f32 %v23_v41, %v649_v14  ;;  %v37_v43 = vld [vmem:[%s1066_s0 + $0xb8] sm:$0xff] }
   0xf   :  { %v575_v60 = vpack.c.bf16 %v253_v49, %v252_v48  ;;  %v577_v61 = vpack.c.bf16 %v257_v51, %v256_v50  ;;  %v110_v62 = vsub.f32 %v24_v46, %v664_v20  ;;  %v111_v63 = vsub.f32 %v25_v47, %v666_v21  ;;  %v38_v48 = vld [vmem:[%s1066_s0 + $0xc0] sm:$0xff] }
  0x10   :  { %506 = vst [vmem:[%s1067_s3] sm:$0xff] %v574_v54  ;;  %508 = vst [vmem:[%s1067_s3 + $0x10] sm:$0xff] %v576_v55  ;;  %v194_v0 = vmul.f32 %v651_v15, %v108_v56  ;;  %v195_v1 = vmul.f32 %v653_v16, %v109_v57  ;;  %v112_v2 = vsub.f32 %v26_v52, %v647_v13  ;;  %v39_v57 = vld [vmem:[%s1066_s0 + $0xc8] sm:$0xff] }
  0x11   :  { %v113_v3 = vsub.f32 %v27_v53, %v649_v14  ;;  %507 = vst [vmem:[%s1067_s3 + $0x8] sm:$0xff] %v575_v60  ;;  %509 = vst [vmem:[%s1067_s3 + $0x18] sm:$0xff] %v577_v61  ;;  %v196_v4 = vmul.f32 %v668_v22, %v110_v62  ;;  %v197_v5 = vmul.f32 %v670_v23, %v111_v63  ;;  %v40_v62 = vld [vmem:[%s1066_s0 + $0xd0] sm:$0xff]  ;;  %v41_v63 = vld [vmem:[%s1066_s0 + $0xd8] sm:$0xff] }
  0x12   :  { %v114_v6 = vsub.f32 %v28_v58, %v664_v20  ;;  %v115_v7 = vsub.f32 %v29_v59, %v666_v21  ;;  %v258_v9 = vmax.f32 %v194_v0, 0.0  ;;  %v259_v10 = vmax.f32 %v195_v1, 0.0 }
  0x13   :  { %v198_v11 = vmul.f32 %v651_v15, %v112_v2  ;;  %v199_v12 = vmul.f32 %v653_v16, %v113_v3  ;;  %v260_v18 = vmax.f32 %v196_v4, 0.0  ;;  %v261_v19 = vmax.f32 %v197_v5, 0.0  ;;  %v42_v4 = vld [vmem:[%s1066_s0 + $0xe0] sm:$0xff]  ;;  %v43_v5 = vld [vmem:[%s1066_s0 + $0xe8] sm:$0xff] }
  0x14   :  { %v200_v24 = vmul.f32 %v668_v22, %v114_v6  ;;  %v201_v25 = vmul.f32 %v670_v23, %v115_v7  ;;  %v578_v28 = vpack.c.bf16 %v259_v10, %v258_v9  ;;  %v116_v31 = vsub.f32 %v30_v8, %v647_v13  ;;  %v44_v10 = vld [vmem:[%s1066_s0 + $0xf0] sm:$0xff] }
  0x15   :  { %v262_v29 = vmax.f32 %v198_v11, 0.0  ;;  %v263_v30 = vmax.f32 %v199_v12, 0.0  ;;  %v579_v34 = vpack.c.bf16 %v261_v19, %v260_v18  ;;  %v117_v37 = vsub.f32 %v31_v17, %v649_v14  ;;  %v45_v19 = vld [vmem:[%s1066_s0 + $0xf8] sm:$0xff] }
  0x16   :  { %v264_v35 = vmax.f32 %v200_v24, 0.0  ;;  %v265_v36 = vmax.f32 %v201_v25, 0.0  ;;  %510 = vst [vmem:[%s1067_s3 + $0x20] sm:$0xff] %v578_v28  ;;  %v202_v40 = vmul.f32 %v651_v15, %v116_v31  ;;  %v118_v41 = vsub.f32 %v32_v26, %v664_v20  ;;  %v46_v28 = vld [vmem:[%s1066_s0 + $0x100] sm:$0xff] }
  0x17   :  { %v580_v39 = vpack.c.bf16 %v263_v30, %v262_v29  ;;  %v119_v42 = vsub.f32 %v33_v27, %v666_v21  ;;  %511 = vst [vmem:[%s1067_s3 + $0x28] sm:$0xff] %v579_v34  ;;  %v203_v45 = vmul.f32 %v653_v16, %v117_v37  ;;  %v120_v46 = vsub.f32 %v34_v32, %v647_v13  ;;  %v47_v37 = vld [vmem:[%s1066_s0 + $0x108] sm:$0xff] }
  0x18   :  { %v581_v44 = vpack.c.bf16 %v265_v36, %v264_v35  ;;  %v121_v47 = vsub.f32 %v35_v33, %v649_v14  ;;  %v266_v49 = vmax.f32 %v202_v40, 0.0  ;;  %v204_v50 = vmul.f32 %v668_v22, %v118_v41 }
  0x19   :  { %512 = vst [vmem:[%s1067_s3 + $0x30] sm:$0xff] %v580_v39  ;;  %v205_v51 = vmul.f32 %v670_v23, %v119_v42  ;;  %v122_v52 = vsub.f32 %v36_v38, %v664_v20  ;;  %v267_v53 = vmax.f32 %v203_v45, 0.0  ;;  %v206_v54 = vmul.f32 %v651_v15, %v120_v46  ;;  %v48_v42 = vld [vmem:[%s1066_s0 + $0x110] sm:$0xff] }
  0x1a   :  { %513 = vst [vmem:[%s1067_s3 + $0x38] sm:$0xff] %v581_v44  ;;  %v207_v55 = vmul.f32 %v653_v16, %v121_v47  ;;  %v123_v56 = vsub.f32 %v37_v43, %v666_v21  ;;  %v268_v58 = vmax.f32 %v204_v50, 0.0  ;;  %v124_v61 = vsub.f32 %v38_v48, %v647_v13  ;;  %v49_v43 = vld [vmem:[%s1066_s0 + $0x118] sm:$0xff]  ;;  %v50_v48 = vld [vmem:[%s1066_s0 + $0x120] sm:$0xff] }
  0x1b   :  { %v269_v59 = vmax.f32 %v205_v51, 0.0  ;;  %v208_v60 = vmul.f32 %v668_v22, %v122_v52  ;;  %v582_v0 = vpack.c.bf16 %v267_v53, %v266_v49  ;;  %v270_v1 = vmax.f32 %v206_v54, 0.0  ;;  %v51_v49 = vld [vmem:[%s1066_s0 + $0x128] sm:$0xff]  ;;  %v52_v54 = vld [vmem:[%s1066_s0 + $0x130] sm:$0xff] }
  0x1c   :  { %v271_v2 = vmax.f32 %v207_v55, 0.0  ;;  %v209_v3 = vmul.f32 %v670_v23, %v123_v56  ;;  %v125_v8 = vsub.f32 %v39_v57, %v649_v14  ;;  %v210_v9 = vmul.f32 %v651_v15, %v124_v61 }
  0x1d   :  { %v583_v6 = vpack.c.bf16 %v269_v59, %v268_v58  ;;  %v272_v7 = vmax.f32 %v208_v60, 0.0  ;;  %514 = vst [vmem:[%s1067_s3 + $0x40] sm:$0xff] %v582_v0  ;;  %v126_v17 = vsub.f32 %v40_v62, %v664_v20  ;;  %v127_v18 = vsub.f32 %v41_v63, %v666_v21  ;;  %v53_v59 = vld [vmem:[%s1066_s0 + $0x138] sm:$0xff]  ;;  %v54_v0 = vld [vmem:[%s1066_s0 + $0x140] sm:$0xff] }
  0x1e   :  { %v584_v11 = vpack.c.bf16 %v271_v2, %v270_v1  ;;  %v273_v12 = vmax.f32 %v209_v3, 0.0  ;;  %v211_v24 = vmul.f32 %v653_v16, %v125_v8  ;;  %v274_v25 = vmax.f32 %v210_v9, 0.0  ;;  %v55_v9 = vld [vmem:[%s1066_s0 + $0x148] sm:$0xff] }
  0x1f   :  { %515 = vst [vmem:[%s1067_s3 + $0x48] sm:$0xff] %v583_v6  ;;  %v128_v26 = vsub.f32 %v42_v4, %v647_v13  ;;  %v129_v27 = vsub.f32 %v43_v5, %v649_v14  ;;  %v212_v30 = vmul.f32 %v668_v22, %v126_v17  ;;  %v213_v31 = vmul.f32 %v670_v23, %v127_v18  ;;  %v56_v18 = vld [vmem:[%s1066_s0 + $0x150] sm:$0xff] }
  0x20   :  { %516 = vst [vmem:[%s1067_s3 + $0x50] sm:$0xff] %v584_v11  ;;  %v585_v29 = vpack.c.bf16 %v273_v12, %v272_v7  ;;  %v130_v32 = vsub.f32 %v44_v10, %v664_v20  ;;  %v275_v33 = vmax.f32 %v211_v24, 0.0  ;;  %v131_v36 = vsub.f32 %v45_v19, %v666_v21  ;;  %v57_v19 = vld [vmem:[%s1066_s0 + $0x158] sm:$0xff] }
  0x21   :  { %v214_v34 = vmul.f32 %v651_v15, %v128_v26  ;;  %v215_v35 = vmul.f32 %v653_v16, %v129_v27  ;;  %v276_v38 = vmax.f32 %v212_v30, 0.0  ;;  %v277_v39 = vmax.f32 %v213_v31, 0.0 }
  0x22   :  { %517 = vst [vmem:[%s1067_s3 + $0x58] sm:$0xff] %v585_v29  ;;  %v216_v40 = vmul.f32 %v668_v22, %v130_v32  ;;  %v132_v41 = vsub.f32 %v46_v28, %v647_v13  ;;  %v586_v44 = vpack.c.bf16 %v275_v33, %v274_v25  ;;  %v217_v47 = vmul.f32 %v670_v23, %v131_v36  ;;  %v58_v28 = vld [vmem:[%s1066_s0 + $0x160] sm:$0xff]  ;;  %v59_v29 = vld [vmem:[%s1066_s0 + $0x168] sm:$0xff] }
  0x23   :  { %v278_v45 = vmax.f32 %v214_v34, 0.0  ;;  %v279_v46 = vmax.f32 %v215_v35, 0.0  ;;  %v587_v50 = vpack.c.bf16 %v277_v39, %v276_v38  ;;  %v133_v52 = vsub.f32 %v47_v37, %v649_v14  ;;  %v60_v34 = vld [vmem:[%s1066_s0 + $0x170] sm:$0xff]  ;;  %v61_v39 = vld [vmem:[%s1066_s0 + $0x178] sm:$0xff] }
  0x24   :  { %v280_v51 = vmax.f32 %v216_v40, 0.0  ;;  %v218_v53 = vmul.f32 %v651_v15, %v132_v41  ;;  %518 = vst [vmem:[%s1067_s3 + $0x60] sm:$0xff] %v586_v44  ;;  %v281_v56 = vmax.f32 %v217_v47, 0.0  ;;  %v134_v57 = vsub.f32 %v48_v42, %v664_v20  ;;  %v62_v44 = vld [vmem:[%s1066_s0 + $0x180] sm:$0xff] }
  0x25   :  { %v588_v55 = vpack.c.bf16 %v279_v46, %v278_v45  ;;  %v135_v58 = vsub.f32 %v49_v43, %v666_v21  ;;  %519 = vst [vmem:[%s1067_s3 + $0x68] sm:$0xff] %v587_v50  ;;  %v219_v60 = vmul.f32 %v653_v16, %v133_v52  ;;  %v136_v62 = vsub.f32 %v50_v48, %v647_v13 }
  0x26   :  { %v282_v61 = vmax.f32 %v218_v53, 0.0  ;;  %v137_v63 = vsub.f32 %v51_v49, %v649_v14  ;;  %v589_v1 = vpack.c.bf16 %v281_v56, %v280_v51  ;;  %v220_v2 = vmul.f32 %v668_v22, %v134_v57  ;;  %v63_v53 = vld [vmem:[%s1066_s0 + $0x188] sm:$0xff] }
  0x27   :  { %520 = vst [vmem:[%s1067_s3 + $0x70] sm:$0xff] %v588_v55  ;;  %v221_v3 = vmul.f32 %v670_v23, %v135_v58  ;;  %v138_v4 = vsub.f32 %v52_v54, %v664_v20  ;;  %v283_v5 = vmax.f32 %v219_v60, 0.0  ;;  %v222_v6 = vmul.f32 %v651_v15, %v136_v62  ;;  %v64_v58 = vld [vmem:[%s1066_s0 + $0x190] sm:$0xff] }
  0x28   :  { %v223_v7 = vmul.f32 %v653_v16, %v137_v63  ;;  %v139_v8 = vsub.f32 %v53_v59, %v666_v21  ;;  %521 = vst [vmem:[%s1067_s3 + $0x78] sm:$0xff] %v589_v1  ;;  %v284_v10 = vmax.f32 %v220_v2, 0.0  ;;  %v140_v17 = vsub.f32 %v54_v0, %v647_v13  ;;  %v65_v59 = vld [vmem:[%s1066_s0 + $0x198] sm:$0xff]  ;;  %v66_v0 = vld [vmem:[%s1066_s0 + $0x1a0] sm:$0xff]  ;;  %v67_v1 = vld [vmem:[%s1066_s0 + $0x1a8] sm:$0xff] }
  0x29   :  { %v285_v11 = vmax.f32 %v221_v3, 0.0  ;;  %v224_v12 = vmul.f32 %v668_v22, %v138_v4  ;;  %v590_v24 = vpack.c.bf16 %v283_v5, %v282_v61  ;;  %v286_v25 = vmax.f32 %v222_v6, 0.0  ;;  %v68_v6 = vld [vmem:[%s1066_s0 + $0x1b0] sm:$0xff] }
  0x2a   :  { %v287_v26 = vmax.f32 %v223_v7, 0.0  ;;  %v225_v27 = vmul.f32 %v670_v23, %v139_v8  ;;  %v141_v32 = vsub.f32 %v55_v9, %v649_v14  ;;  %v226_v33 = vmul.f32 %v651_v15, %v140_v17 }
  0x2b   :  { %v591_v30 = vpack.c.bf16 %v285_v11, %v284_v10  ;;  %v288_v31 = vmax.f32 %v224_v12, 0.0  ;;  %522 = vst [vmem:[%s1067_s3 + $0x80] sm:$0xff] %v590_v24  ;;  %v142_v37 = vsub.f32 %v56_v18, %v664_v20  ;;  %v143_v38 = vsub.f32 %v57_v19, %v666_v21  ;;  %v69_v11 = vld [vmem:[%s1066_s0 + $0x1b8] sm:$0xff]  ;;  %v70_v24 = vld [vmem:[%s1066_s0 + $0x1c0] sm:$0xff] }
  0x2c   :  { %v592_v35 = vpack.c.bf16 %v287_v26, %v286_v25  ;;  %v289_v36 = vmax.f32 %v225_v27, 0.0  ;;  %v227_v40 = vmul.f32 %v653_v16, %v141_v32  ;;  %v290_v41 = vmax.f32 %v226_v33, 0.0  ;;  %v71_v33 = vld [vmem:[%s1066_s0 + $0x1c8] sm:$0xff] }
  0x2d   :  { %523 = vst [vmem:[%s1067_s3 + $0x88] sm:$0xff] %v591_v30  ;;  %v144_v42 = vsub.f32 %v58_v28, %v647_v13  ;;  %v145_v43 = vsub.f32 %v59_v29, %v649_v14  ;;  %v228_v46 = vmul.f32 %v668_v22, %v142_v37  ;;  %v229_v47 = vmul.f32 %v670_v23, %v143_v38  ;;  %v72_v38 = vld [vmem:[%s1066_s0 + $0x1d0] sm:$0xff] }
  0x2e   :  { %524 = vst [vmem:[%s1067_s3 + $0x90] sm:$0xff] %v592_v35  ;;  %v593_v45 = vpack.c.bf16 %v289_v36, %v288_v31  ;;  %v146_v48 = vsub.f32 %v60_v34, %v664_v20  ;;  %v291_v49 = vmax.f32 %v227_v40, 0.0  ;;  %v147_v52 = vsub.f32 %v61_v39, %v666_v21  ;;  %v73_v39 = vld [vmem:[%s1066_s0 + $0x1d8] sm:$0xff] }
  0x2f   :  { %v230_v50 = vmul.f32 %v651_v15, %v144_v42  ;;  %v231_v51 = vmul.f32 %v653_v16, %v145_v43  ;;  %v292_v54 = vmax.f32 %v228_v46, 0.0  ;;  %v293_v55 = vmax.f32 %v229_v47, 0.0 }
  0x30   :  { %525 = vst [vmem:[%s1067_s3 + $0x98] sm:$0xff] %v593_v45  ;;  %v232_v56 = vmul.f32 %v668_v22, %v146_v48  ;;  %v148_v57 = vsub.f32 %v62_v44, %v647_v13  ;;  %v594_v60 = vpack.c.bf16 %v291_v49, %v290_v41  ;;  %v233_v63 = vmul.f32 %v670_v23, %v147_v52  ;;  %v74_v44 = vld [vmem:[%s1066_s0 + $0x1e0] sm:$0xff]  ;;  %v75_v45 = vld [vmem:[%s1066_s0 + $0x1e8] sm:$0xff] }
  0x31   :  { %v294_v61 = vmax.f32 %v230_v50, 0.0  ;;  %v295_v62 = vmax.f32 %v231_v51, 0.0  ;;  %v595_v2 = vpack.c.bf16 %v293_v55, %v292_v54  ;;  %v149_v4 = vsub.f32 %v63_v53, %v649_v14  ;;  %v76_v50 = vld [vmem:[%s1066_s0 + $0x1f0] sm:$0xff]  ;;  %v77_v55 = vld [vmem:[%s1066_s0 + $0x1f8] sm:$0xff] }
  0x32   :  { %v296_v3 = vmax.f32 %v232_v56, 0.0  ;;  %v234_v5 = vmul.f32 %v651_v15, %v148_v57  ;;  %526 = vst [vmem:[%s1067_s3 + $0xa0] sm:$0xff] %v594_v60  ;;  %v297_v8 = vmax.f32 %v233_v63, 0.0  ;;  %v150_v9 = vsub.f32 %v64_v58, %v664_v20 }
  0x33   :  { %v596_v7 = vpack.c.bf16 %v295_v62, %v294_v61  ;;  %v151_v10 = vsub.f32 %v65_v59, %v666_v21  ;;  %527 = vst [vmem:[%s1067_s3 + $0xa8] sm:$0xff] %v595_v2  ;;  %v235_v12 = vmul.f32 %v653_v16, %v149_v4  ;;  %v152_v18 = vsub.f32 %v66_v0, %v647_v13 }
  0x34   :  { %v298_v17 = vmax.f32 %v234_v5, 0.0  ;;  %v153_v19 = vsub.f32 %v67_v1, %v649_v14  ;;  %v597_v25 = vpack.c.bf16 %v297_v8, %v296_v3  ;;  %v236_v26 = vmul.f32 %v668_v22, %v150_v9 }
  0x35   :  { %528 = vst [vmem:[%s1067_s3 + $0xb0] sm:$0xff] %v596_v7  ;;  %v237_v27 = vmul.f32 %v670_v23, %v151_v10  ;;  %v154_v28 = vsub.f32 %v68_v6, %v664_v20  ;;  %v299_v29 = vmax.f32 %v235_v12, 0.0  ;;  %v238_v30 = vmul.f32 %v651_v15, %v152_v18 }
  0x36   :  { %v239_v31 = vmul.f32 %v653_v16, %v153_v19  ;;  %v155_v32 = vsub.f32 %v69_v11, %v666_v21  ;;  %529 = vst [vmem:[%s1067_s3 + $0xb8] sm:$0xff] %v597_v25  ;;  %v300_v34 = vmax.f32 %v236_v26, 0.0  ;;  %v156_v37 = vsub.f32 %v70_v24, %v647_v13 }
  0x37   :  { %v301_v35 = vmax.f32 %v237_v27, 0.0  ;;  %v240_v36 = vmul.f32 %v668_v22, %v154_v28  ;;  %v598_v40 = vpack.c.bf16 %v299_v29, %v298_v17  ;;  %v302_v41 = vmax.f32 %v238_v30, 0.0 }
  0x38   :  { %v303_v42 = vmax.f32 %v239_v31, 0.0  ;;  %v241_v43 = vmul.f32 %v670_v23, %v155_v32  ;;  %v157_v48 = vsub.f32 %v71_v33, %v649_v14  ;;  %v242_v49 = vmul.f32 %v651_v15, %v156_v37 }
  0x39   :  { %v599_v46 = vpack.c.bf16 %v301_v35, %v300_v34  ;;  %v304_v47 = vmax.f32 %v240_v36, 0.0  ;;  %530 = vst [vmem:[%s1067_s3 + $0xc0] sm:$0xff] %v598_v40  ;;  %v158_v53 = vsub.f32 %v72_v38, %v664_v20  ;;  %v159_v54 = vsub.f32 %v73_v39, %v666_v21 }
  0x3a   :  { %v600_v51 = vpack.c.bf16 %v303_v42, %v302_v41  ;;  %v305_v52 = vmax.f32 %v241_v43, 0.0  ;;  %v243_v56 = vmul.f32 %v653_v16, %v157_v48  ;;  %v306_v57 = vmax.f32 %v242_v49, 0.0 }
  0x3b   :  { %531 = vst [vmem:[%s1067_s3 + $0xc8] sm:$0xff] %v599_v46  ;;  %v160_v58 = vsub.f32 %v74_v44, %v647_v13  ;;  %v161_v59 = vsub.f32 %v75_v45, %v649_v14  ;;  %v244_v61 = vmul.f32 %v668_v22, %v158_v53  ;;  %v245_v62 = vmul.f32 %v670_v23, %v159_v54 }
  0x3c   :  { %532 = vst [vmem:[%s1067_s3 + $0xd0] sm:$0xff] %v600_v51  ;;  %v601_v60 = vpack.c.bf16 %v305_v52, %v304_v47  ;;  %v162_v63 = vsub.f32 %v76_v50, %v664_v20  ;;  %v307_v0 = vmax.f32 %v243_v56, 0.0  ;;  %v163_v13 = vsub.f32 %v77_v55, %v666_v21 }
  0x3d   :  { %v246_v1 = vmul.f32 %v651_v15, %v160_v58  ;;  %v247_v2 = vmul.f32 %v653_v16, %v161_v59  ;;  %v308_v14 = vmax.f32 %v244_v61, 0.0  ;;  %v309_v3 = vmax.f32 %v245_v62, 0.0 }
  0x3e   :  { %533 = vst [vmem:[%s1067_s3 + $0xd8] sm:$0xff] %v601_v60  ;;  %v248_v4 = vmul.f32 %v668_v22, %v162_v63  ;;  %v602_v5 = vpack.c.bf16 %v307_v0, %v306_v57  ;;  %v249_v20 = vmul.f32 %v670_v23, %v163_v13 }
  0x3f   :  { %v310_v6 = vmax.f32 %v246_v1, 0.0  ;;  %v311_v7 = vmax.f32 %v247_v2, 0.0  ;;  %v603_v8 = vpack.c.bf16 %v309_v3, %v308_v14 }
  0x40   :  { %v312_v9 = vmax.f32 %v248_v4, 0.0  ;;  %534 = vst [vmem:[%s1067_s3 + $0xe0] sm:$0xff] %v602_v5  ;;  %v313_v16 = vmax.f32 %v249_v20, 0.0 }
  0x41   :  { %v604_v15 = vpack.c.bf16 %v311_v7, %v310_v6  ;;  %535 = vst [vmem:[%s1067_s3 + $0xe8] sm:$0xff] %v603_v8 }
  0x42   :  { %v605_v21 = vpack.c.bf16 %v313_v16, %v312_v9 }
  0x43   :  { %536 = vst [vmem:[%s1067_s3 + $0xf0] sm:$0xff] %v604_v15 }
  0x44   :  { %537 = vst [vmem:[%s1067_s3 + $0xf8] sm:$0xff] %v605_v21 }

// kernel: deconv2d_fuse_forward.6
= control target key start
LH: loop header
LB: loop body
LE: loop exit
PB: predicated region body
PF: predicated region fallthrough
CT: control target
= control target key end

     0   :  { %s1913_s18 = smov 0   ;;  %s2182_s0 = inlined_call_operand.vmem [shape: bf16[2,18,18,8], index: 0, kind: input, shape index: {}]   ;;  %s2183_s1 = inlined_call_operand.vmem [shape: bf16[2,18,18,8], index: 1, kind: input, shape index: {}]   ;;  %s2184_s2 = inlined_call_operand.vmem [shape: bf16[9,8,128], index: 2, kind: input, shape index: {}]   ;;  %s2185_s3 = inlined_call_operand.vmem [shape: bf16[9,8,128], index: 3, kind: input, shape index: {}]   ;;  %s2186_s4 = inlined_call_operand.vmem [shape: f32[2,256,128], index: 4, kind: output, shape index: {0}]   ;;  %s2187_s5 = inlined_call_operand.vmem [shape: f32[2,8,128], index: 5, kind: output, shape index: {1}]  }
   0x1 LB: > { %s1614_s19 = sadd.s32 4294967295, %s1875_s18   ;;  %p1618_p0 = scmp.ge.s32.totalorder %s1875_s18, 1  ;;  %s1875_s18 = sphi %s1913_s18, %s16_s18  }
   0x2   : > { %p200_p1 = scmp.lt.s32.totalorder %s1875_s18, 3 }
   0x4   : > { %p201_p2 = pnand %p1618_p0, %p200_p1 }
   0x5   : > { %p237_p3 = scmp.lt.s32.totalorder (!%p201_p2), %s1614_s19, 1  ;;  %s1941_s10 = smov (!%p201_p2), 0  }
   0x6   : > { %204 = sbr.rel (%p201_p2) target bundleno = 380 (0x17c), region = 36 }
   0xb   : > { %s2189_s19 = smov (!%p237_p3, %s1614_s19), 1 }
   0xc   : > { %s1834_s20 = smul.u32 216, %s2189_s19  ;;  %s1687_s21 = sshll.u32 %s2189_s19, 8 }
   0xd   : > { %s1924_s24 = scalar_lea.vmem %s2186_s4, %s1687_s21  ;;  %s1623_s25 = sshll.u32 %s2189_s19, 3 }
   0xe   : > { %s1929_s28 = scalar_lea.vmem %s2182_s0, %s1834_s20  ;;  %s1934_s6 = scalar_lea.vmem %s2183_s1, %s1834_s20 }
   0xf   : > { %s1939_s9 = scalar_lea.vmem %s2187_s5, %s1623_s25 }
  0x10 LB: >> { %v269_v0 = vld [vmem:[%s2184_s2] sm:$0xf]  ;;  %vm297_vm0 = vcmask 1043456   ;;  %v1881_v1 = vmov 0.0   ;;  %v1625_v3 = vld [vmem:[%s2184_s2 + $0x4] sm:$0xf]  ;;  %s1879_s10 = sphi %s1941_s10, %s262_s10  }
  0x11   : >> { %1732 = vmatprep.subr.bf16.mxu1 %v1881_v1  ;;  %v345_v2 = vsel %vm297_vm0, %v269_v0, 0  ;;  %1726 = vmatprep.subr.bf16.mxu0 %v1881_v1  ;;  %vm1882_vm1 = vmmov 0   ;;  %v299_v4 = vsel %vm297_vm0, %v1625_v3, 0  ;;  %s1688_s15 = smul.u32 12, %s1879_s10  ;;  %v1635_v5 = vld [vmem:[%s2184_s2 + $0xc] sm:$0xf] }
  0x12   : >> { %1733 = vmatpush3.bf16.msra.mxu1 %v345_v2  ;;  %1734 = vmatprep.mubr.msk.bf16.mxu1 %vm1882_vm1, %v1881_v1  ;;  %vm293_vm2 = vcmask 64512   ;;  %v461_v7 = vsel %vm297_vm0, %v1635_v5, 0  ;;  %vm280_vm3 = vsmask.f32 7424  ;;  %v1630_v13 = vld [vmem:[%s2184_s2 + $0x8] sm:$0xf] }
  0x13   : >> { %1727 = vmatpush3.bf16.msra.mxu0 %v299_v4  ;;  %1728 = vmatprep.mubr.msk.bf16.mxu0 %vm1882_vm1, %v1881_v1  ;;  %s1965_s19 = scalar_lea.vmem %s1929_s28, %s1688_s15  ;;  %v1641_v17 = vld [vmem:[%s2184_s2 + $0x14] sm:$0xf]  ;;  %s1984_s25 = scalar_lea.vmem %s1934_s6, %s1688_s15  ;;  %v398_v18 = vsel %vm297_vm0, %v1630_v13, 0  ;;  %vm390_vm4 = vcmask 1046528   ;;  %v1638_v25 = vld [vmem:[%s2184_s2 + $0x10] sm:$0xf] }
  0x14   : >> { %1738 = vmatprep.subr.bf16.mxu0 %v1881_v1  ;;  %1744 = vmatprep.subr.bf16.mxu1 %v1881_v1  ;;  %v1853_v6 = vld [vmem:[%s1965_s19] sm:$0xff]   ;;  %v1854_v8 = vld [vmem:[%s1965_s19 + $0x8] ss:$0 sps:$4 sm:$0x11]   ;;  %v1855_v16 = vld [vmem:[%s1965_s19 + $0xc] sm:$0xff]   ;;  %v580_v22 = vsel %vm297_vm0, %v1641_v17, 0 }
  0x15   : >> { %1735 = vmatmul.mubr.msk.bf16.vlgmr.msra.gmra.mxu1 %vm293_vm2, %v1853_v6  ;;  %v282_v9 = vshrl.u32 %v1853_v6, 16  ;;  %v284_v10 = vshll.u32 %v1853_v6, 16  ;;  %v289_v11 = vshll.u32 %v1854_v8, 16  ;;  %v1856_v19 = vld [vmem:[%s1965_s19 + $0x14] ss:$0 sps:$4 sm:$0x11]  }
  0x16   : >> { %1745 = vmatpush3.bf16.msra.mxu1 %v461_v7  ;;  %1746 = vmatprep.mubr.msk.bf16.mxu1 %vm1882_vm1, %v1881_v1  ;;  %v1989_v20 = vld [vmem:[%s1965_s19 + $0x18] sm:$0xff]   ;;  %v391_v23 = vrot.slane %v1853_v6, 1  ;;  %v392_v24 = vrot.slane %v1854_v8, 1  ;;  %v513_v26 = vshll.u32 %v1855_v16, 16  ;;  %v573_v27 = vrot.slane %v1855_v16, 1  ;;  %v1859_v53 = vld [vmem:[%s1984_s25] sm:$0xff]  }
  0x17   : >> { %v286_v12 = vrot.slane %v284_v10, 1  ;;  %1756 = vmatprep.subr.bf16.mxu1 %v1881_v1  ;;  %v291_v14 = vrot.slane %v289_v11, 1  ;;  %v574_v28 = vrot.slane %v1856_v19, 1  ;;  %v2002_v29 = vld [vmem:[%s1965_s19 + $0x20] ss:$0 sps:$4 sm:$0x11]  }
  0x18   : >> { %v695_v30 = vshll.u32 %v1989_v20, 16  ;;  %v526_v31 = vsel %vm297_vm0, %v1638_v25, 0  ;;  %v511_v32 = vshrl.u32 %v1855_v16, 16  ;;  %v1649_v33 = vld [vmem:[%s2184_s2 + $0x1c] sm:$0xf]  ;;  %v393_v34 = vsel %vm390_vm4, %v391_v23, %v392_v24  ;;  %v2053_v57 = vld [vmem:[%s1984_s25 + $0xc] sm:$0xff]  }
  0x19   : >> { %v287_v15 = vor.u32 %v286_v12, %v282_v9  ;;  %v515_v35 = vrot.slane %v513_v26, 1  ;;  %v518_v36 = vshll.u32 %v1856_v19, 16  ;;  %v693_v37 = vshrl.u32 %v1989_v20, 16  ;;  %v1646_v46 = vld [vmem:[%s2184_s2 + $0x18] sm:$0xf]  ;;  %s1684_s12 = sshll.u32 %s1879_s10, 4 }
  0x1a   : >> { %v575_v38 = vsel %vm390_vm4, %v573_v27, %v574_v28  ;;  %v697_v39 = vrot.slane %v695_v30, 1  ;;  %v700_v40 = vshll.u32 %v2002_v29, 16  ;;  %v708_v41 = vsel %vm297_vm0, %v1649_v33, 0  ;;  %v812_v48 = vld [vmem:[%s2185_s3] sm:$0xf]  ;;  %v1863_v26 = vld [vmem:[%s1984_s25 + $0x18] sm:$0xff]   ;;  %s1347_s13 = scalar_lea.vmem %s1924_s24, %s1684_s12 }
  0x1b   : >> { %v292_v21 = vsel %vm280_vm3, %v287_v15, %v291_v14  ;;  %v516_v42 = vor.u32 %v515_v35, %v511_v32  ;;  %v520_v43 = vrot.slane %v518_v36, 1  ;;  %v643_v49 = vsel %vm297_vm0, %v1646_v46, 0  ;;  %v1652_v52 = vld [vmem:[%s2184_s2 + $0x20] sm:$0xf]  ;;  %v1660_v54 = vld [vmem:[%s2185_s3 + $0x8] sm:$0xf] }
  0x1c   : >> { %1729 = vmatmul.mubr.msk.bf16.vlgmr.msra.gmra.mxu0 %vm293_vm2, %v292_v21  ;;  %v698_v44 = vor.u32 %v697_v39, %v693_v37  ;;  %v702_v45 = vrot.slane %v700_v40, 1  ;;  %v822_v51 = vsel %vm297_vm0, %v812_v48, 0  ;;  %v762_v55 = vsel %vm297_vm0, %v1652_v52, 0  ;;  %v1860_v56 = vld [vmem:[%s1984_s25 + $0x8] ss:$0 sps:$4 sm:$0x11]  }
  0x1d   : >> { %1739 = vmatpush3.bf16.msra.mxu0 %v398_v18  ;;  %1747 = vmatmul.mubr.msk.bf16.vlgmr.msra.gmra.mxu1 %vm293_vm2, %v1855_v16  ;;  %v521_v47 = vsel %vm280_vm3, %v516_v42, %v520_v43  ;;  %v941_v58 = vsel %vm297_vm0, %v1660_v54, 0  ;;  %v755_v59 = vrot.slane %v1989_v20, 1  ;;  %v756_v60 = vrot.slane %v2002_v29, 1  ;;  %v1657_v61 = vld [vmem:[%s2185_s3 + $0x4] sm:$0xf]  ;;  %s262_s10 = sadd.s32 1, %s1879_s10  }
  0x1e   : >> { %1740 = vmatprep.mubr.msk.bf16.mxu0 %vm1882_vm1, %v1881_v1  ;;  %1750 = vmatprep.subr.bf16.mxu0 %v1881_v1  ;;  %v703_v50 = vsel %vm280_vm3, %v698_v44, %v702_v45  ;;  %v874_v62 = vshll.u32 %v1859_v53, 16  ;;  %v934_v63 = vrot.slane %v1859_v53, 1  ;;  %v935_v0 = vrot.slane %v1860_v56, 1  ;;  %v2068_v2 = vld [vmem:[%s1984_s25 + $0x14] ss:$0 sps:$4 sm:$0x11]  }
  0x1f   : >> { %1757 = vmatpush3.bf16.msra.mxu1 %v580_v22  ;;  %1758 = vmatprep.mubr.msk.bf16.mxu1 %vm1882_vm1, %v1881_v1  ;;  %v1054_v3 = vshll.u32 %v2053_v57, 16  ;;  %v887_v4 = vsel %vm297_vm0, %v1657_v61, 0  ;;  %v757_v5 = vsel %vm390_vm4, %v755_v59, %v756_v60  ;;  %v872_v6 = vshrl.u32 %v1859_v53, 16  ;;  %v1668_v9 = vld [vmem:[%s2185_s3 + $0x10] sm:$0xf]  ;;  %p259_p4 = scmp.ge.s32.totalorder %s262_s10, 16  }
  0x20   : >> { %1768 = vmatprep.subr.bf16.mxu1 %v1881_v1  ;;  %v876_v7 = vrot.slane %v874_v62, 1  ;;  %v879_v8 = vshll.u32 %v1860_v56, 16  ;;  %v936_v10 = vsel %vm390_vm4, %v934_v63, %v935_v0  ;;  %v1052_v11 = vshrl.u32 %v2053_v57, 16  ;;  %v1665_v19 = vld [vmem:[%s2185_s3 + $0xc] sm:$0xf] }
  0x21   : >> { %v1056_v12 = vrot.slane %v1054_v3, 1  ;;  %v1059_v13 = vshll.u32 %v2068_v2, 16  ;;  %v1067_v14 = vsel %vm297_vm0, %v1668_v9, 0  ;;  %v1676_v21 = vld [vmem:[%s2185_s3 + $0x18] sm:$0xf]  ;;  %v1002_v22 = vsel %vm297_vm0, %v1665_v19, 0 }
  0x22   : >> { %v877_v15 = vor.u32 %v876_v7, %v872_v6  ;;  %v881_v16 = vrot.slane %v879_v8, 1  ;;  %v1182_v24 = vsel %vm297_vm0, %v1676_v21, 0  ;;  %v1671_v25 = vld [vmem:[%s2185_s3 + $0x14] sm:$0xf]  ;;  %v1682_v27 = vld [vmem:[%s2185_s3 + $0x20] sm:$0xf] }
  0x23   : >> { %v1057_v17 = vor.u32 %v1056_v12, %v1052_v11  ;;  %v1061_v18 = vrot.slane %v1059_v13, 1  ;;  %v1121_v28 = vsel %vm297_vm0, %v1671_v25, 0  ;;  %v1864_v29 = vld [vmem:[%s1984_s25 + $0x20] ss:$0 sps:$4 sm:$0x11]   ;;  %v1301_v30 = vsel %vm297_vm0, %v1682_v27, 0 }
  0x24   : >> { %1741 = vmatmul.mubr.msk.bf16.vlgmr.msra.gmra.mxu0 %vm293_vm2, %v393_v34  ;;  %v1115_v32 = vrot.slane %v2068_v2, 1  ;;  %v1234_v33 = vshll.u32 %v1863_v26, 16  ;;  %v1294_v34 = vrot.slane %v1863_v26, 1  ;;  %v1295_v35 = vrot.slane %v1864_v29, 1  ;;  %v1679_v36 = vld [vmem:[%s2185_s3 + $0x1c] sm:$0xf] }
  0x25   : >> { %1751 = vmatpush3.bf16.msra.mxu0 %v526_v31  ;;  %1759 = vmatmul.mubr.msk.bf16.vlgmr.msra.gmra.mxu1 %vm293_vm2, %v575_v38  ;;  %v1062_v23 = vsel %vm280_vm3, %v1057_v17, %v1061_v18  ;;  %v1114_v31 = vrot.slane %v2053_v57, 1  ;;  %v1232_v38 = vshrl.u32 %v1863_v26, 16  ;;  %v1239_v40 = vshll.u32 %v1864_v29, 16 }
  0x26   : >> { %1752 = vmatprep.mubr.msk.bf16.mxu0 %vm1882_vm1, %v1881_v1  ;;  %1762 = vmatprep.subr.bf16.mxu0 %v1881_v1  ;;  %v1236_v39 = vrot.slane %v1234_v33, 1  ;;  %v1296_v42 = vsel %vm390_vm4, %v1294_v34, %v1295_v35  ;;  %vm1488_vm5 = vcmask (%p259_p4), 1040384   ;;  %vm1490_vm6 = vcmask (%p259_p4), 1041408  }
  0x27   : >> { %1769 = vmatpush3.bf16.msra.mxu1 %v708_v41  ;;  %1770 = vmatprep.mubr.msk.bf16.mxu1 %vm1882_vm1, %v1881_v1  ;;  %v1116_v37 = vsel %vm390_vm4, %v1114_v31, %v1115_v32  ;;  %v1247_v41 = vsel %vm297_vm0, %v1679_v36, 0  ;;  %v1241_v44 = vrot.slane %v1239_v40, 1 }
  0x28   : >> { %1780 = vmatprep.subr.bf16.mxu1 %v1881_v1  ;;  %v1237_v43 = vor.u32 %v1236_v39, %v1232_v38 }
  0x2a   : >> { %v1242_v45 = vsel %vm280_vm3, %v1237_v43, %v1241_v44 }
  0x2c   : >> { %1753 = vmatmul.mubr.msk.bf16.vlgmr.msra.gmra.mxu0 %vm293_vm2, %v521_v47 }
  0x2d   : >> { %1763 = vmatpush3.bf16.msra.mxu0 %v643_v49  ;;  %1771 = vmatmul.mubr.msk.bf16.vlgmr.msra.gmra.mxu1 %vm293_vm2, %v703_v50 }
  0x2e   : >> { %1764 = vmatprep.mubr.msk.bf16.mxu0 %vm1882_vm1, %v1881_v1  ;;  %1774 = vmatprep.subr.bf16.mxu0 %v1881_v1 }
  0x2f   : >> { %1781 = vmatpush3.bf16.msra.mxu1 %v822_v51  ;;  %1782 = vmatprep.mubr.msk.bf16.mxu1 %vm1882_vm1, %v1881_v1 }
  0x30   : >> { %1792 = vmatprep.subr.bf16.mxu1 %v1881_v1 }
  0x34   : >> { %1765 = vmatmul.mubr.msk.bf16.vlgmr.msra.gmra.mxu0 %vm293_vm2, %v1989_v20  ;;  %v882_v20 = vsel %vm280_vm3, %v877_v15, %v881_v16 }
  0x35   : >> { %1775 = vmatpush3.bf16.msra.mxu0 %v762_v55  ;;  %1783 = vmatmul.mubr.msk.bf16.vlgmr.msra.gmra.mxu1 %vm293_vm2, %v1859_v53 }
  0x36   : >> { %1776 = vmatprep.mubr.msk.bf16.mxu0 %vm1882_vm1, %v1881_v1  ;;  %1786 = vmatprep.subr.bf16.mxu0 %v1881_v1 }
  0x37   : >> { %1793 = vmatpush3.bf16.msra.mxu1 %v941_v58  ;;  %1794 = vmatprep.mubr.msk.bf16.mxu1 %vm1882_vm1, %v1881_v1 }
  0x38   : >> { %1804 = vmatprep.subr.bf16.mxu1 %v1881_v1 }
  0x3c   : >> { %1777 = vmatmul.mubr.msk.bf16.vlgmr.msra.gmra.mxu0 %vm293_vm2, %v757_v5 }
  0x3d   : >> { %1787 = vmatpush3.bf16.msra.mxu0 %v887_v4  ;;  %1795 = vmatmul.mubr.msk.bf16.vlgmr.msra.gmra.mxu1 %vm293_vm2, %v936_v10 }
  0x3e   : >> { %1788 = vmatprep.mubr.msk.bf16.mxu0 %vm1882_vm1, %v1881_v1  ;;  %1798 = vmatprep.subr.bf16.mxu0 %v1881_v1 }
  0x3f   : >> { %1805 = vmatpush3.bf16.msra.mxu1 %v1067_v14  ;;  %1806 = vmatprep.mubr.msk.bf16.mxu1 %vm1882_vm1, %v1881_v1 }
  0x40   : >> { %1816 = vmatprep.subr.bf16.mxu1 %v1881_v1 }
  0x44   : >> { %1789 = vmatmul.mubr.msk.bf16.vlgmr.msra.gmra.mxu0 %vm293_vm2, %v882_v20 }
  0x45   : >> { %1799 = vmatpush3.bf16.msra.mxu0 %v1002_v22  ;;  %1807 = vmatmul.mubr.msk.bf16.vlgmr.msra.gmra.mxu1 %vm293_vm2, %v1062_v23 }
  0x46   : >> { %1800 = vmatprep.mubr.msk.bf16.mxu0 %vm1882_vm1, %v1881_v1  ;;  %1810 = vmatprep.subr.bf16.mxu0 %v1881_v1 }
  0x47   : >> { %1817 = vmatpush3.bf16.msra.mxu1 %v1182_v24  ;;  %1818 = vmatprep.mubr.msk.bf16.mxu1 %vm1882_vm1, %v1881_v1 }
  0x48   : >> { %1828 = vmatprep.subr.bf16.mxu1 %v1881_v1 }
  0x4c   : >> { %1801 = vmatmul.mubr.msk.bf16.vlgmr.msra.gmra.mxu0 %vm293_vm2, %v2053_v57 }
  0x4d   : >> { %1811 = vmatpush3.bf16.msra.mxu0 %v1121_v28  ;;  %1819 = vmatmul.mubr.msk.bf16.vlgmr.msra.gmra.mxu1 %vm293_vm2, %v1863_v26 }
  0x4e   : >> { %1812 = vmatprep.mubr.msk.bf16.mxu0 %vm1882_vm1, %v1881_v1  ;;  %1822 = vmatprep.subr.bf16.mxu0 %v1881_v1 }
  0x4f   : >> { %1829 = vmatpush3.bf16.msra.mxu1 %v1301_v30  ;;  %1830 = vmatprep.mubr.msk.bf16.mxu1 %vm1882_vm1, %v1881_v1 }
  0x54   : >> { %1813 = vmatmul.mubr.msk.bf16.vlgmr.msra.gmra.mxu0 %vm293_vm2, %v1116_v37 }
  0x55   : >> { %1823 = vmatpush3.bf16.msra.mxu0 %v1247_v41  ;;  %1831 = vmatmul.mubr.msk.bf16.vlgmr.msra.gmra.mxu1 %vm293_vm2, %v1296_v42 }
  0x56   : >> { %1824 = vmatprep.mubr.msk.bf16.mxu0 %vm1882_vm1, %v1881_v1 }
  0x5c   : >> { %1825 = vmatmul.mubr.msk.bf16.vlgmr.msra.gmra.mxu0 %vm293_vm2, %v1242_v45 }
  0xd5   : >> { %v381_v46 = vpop.f32.mrf.mxu1 }
  0xd7   : >> { %v1736_v47 = vpop.f32.mrf.mxu1 }
  0xd9   : >> { %v384_v48 = vpop.f32.mrf.mxu1 }
  0xdb   : >> { %v1737_v49 = vpop.f32.mrf.mxu1 }
  0xdc   : >> { %v335_v50 = vpop.f32.mrf.mxu0 }
  0xdd   : >> { %v497_v51 = vpop.f32.mrf.mxu1  ;;  %v382_v7 = vadd.f32 %v381_v46, %v335_v50 }
  0xde   : >> { %v1730_v52 = vpop.f32.mrf.mxu0 }
  0xdf   : >> { %v1748_v53 = vpop.f32.mrf.mxu1 }
  0xe0   : >> { %v338_v54 = vpop.f32.mrf.mxu0 }
  0xe1   : >> { %v500_v55 = vpop.f32.mrf.mxu1  ;;  %v385_v13 = vadd.f32 %v384_v48, %v338_v54 }
  0xe2   : >> { %v1731_v56 = vpop.f32.mrf.mxu0 }
  0xe3   : >> { %v1749_v57 = vpop.f32.mrf.mxu1 }
  0xe4   : >> { %v434_v58 = vpop.f32.mrf.mxu0 }
  0xe5   : >> { %v616_v59 = vpop.f32.mrf.mxu1  ;;  %v441_v10 = vadd.f32 %v434_v58, %v382_v7 }
  0xe6   : >> { %v1742_v60 = vpop.f32.mrf.mxu0 }
  0xe7   : >> { %v1760_v1 = vpop.f32.mrf.mxu1  ;;  %v504_v17 = vadd.f32 %v497_v51, %v441_v10 }
  0xe8   : >> { %v437_v61 = vpop.f32.mrf.mxu0 }
  0xe9   : >> { %v619_v62 = vpop.f32.mrf.mxu1  ;;  %v442_v16 = vadd.f32 %v437_v61, %v385_v13 }
  0xea   : >> { %v1743_v63 = vpop.f32.mrf.mxu0 }
  0xeb   : >> { %v1761_v0 = vpop.f32.mrf.mxu1  ;;  %v505_v23 = vadd.f32 %v500_v55, %v442_v16 }
  0xec   : >> { %v562_v2 = vpop.f32.mrf.mxu0 }
  0xed   : >> { %v744_v3 = vpop.f32.mrf.mxu1  ;;  %v569_v20 = vadd.f32 %v562_v2, %v504_v17 }
  0xee   : >> { %v1754_v4 = vpop.f32.mrf.mxu0 }
  0xef   : >> { %v1772_v5 = vpop.f32.mrf.mxu1  ;;  %v623_v27 = vadd.f32 %v616_v59, %v569_v20 }
  0xf0   : >> { %v565_v6 = vpop.f32.mrf.mxu0 }
  0xf1   : >> { %v747_v8 = vpop.f32.mrf.mxu1  ;;  %v570_v26 = vadd.f32 %v565_v6, %v505_v23 }
  0xf2   : >> { %v1755_v9 = vpop.f32.mrf.mxu0 }
  0xf3   : >> { %v1773_v11 = vpop.f32.mrf.mxu1  ;;  %v624_v33 = vadd.f32 %v619_v62, %v570_v26 }
  0xf4   : >> { %v679_v12 = vpop.f32.mrf.mxu0 }
  0xf5   : >> { %v858_v14 = vpop.f32.mrf.mxu1  ;;  %v686_v30 = vadd.f32 %v679_v12, %v623_v27 }
  0xf6   : >> { %v1766_v15 = vpop.f32.mrf.mxu0 }
  0xf7   : >> { %v1784_v18 = vpop.f32.mrf.mxu1  ;;  %v751_v37 = vadd.f32 %v744_v3, %v686_v30 }
  0xf8   : >> { %v682_v19 = vpop.f32.mrf.mxu0 }
  0xf9   : >> { %v861_v21 = vpop.f32.mrf.mxu1  ;;  %v687_v36 = vadd.f32 %v682_v19, %v624_v33 }
  0xfa   : >> { %v1767_v22 = vpop.f32.mrf.mxu0 }
  0xfb   : >> { %v1785_v24 = vpop.f32.mrf.mxu1  ;;  %v752_v43 = vadd.f32 %v747_v8, %v687_v36 }
  0xfc   : >> { %v798_v25 = vpop.f32.mrf.mxu0 }
  0xfd   : >> { %v977_v28 = vpop.f32.mrf.mxu1  ;;  %v805_v40 = vadd.f32 %v798_v25, %v751_v37 }
  0xfe   : >> { %v1778_v29 = vpop.f32.mrf.mxu0 }
  0xff   : >> { %v1796_v31 = vpop.f32.mrf.mxu1  ;;  %v865_v47 = vadd.f32 %v858_v14, %v805_v40 }
 0x100   : >> { %v801_v32 = vpop.f32.mrf.mxu0 }
 0x101   : >> { %v980_v34 = vpop.f32.mrf.mxu1  ;;  %v806_v46 = vadd.f32 %v801_v32, %v752_v43 }
 0x102   : >> { %v1779_v35 = vpop.f32.mrf.mxu0 }
 0x103   : >> { %v1797_v38 = vpop.f32.mrf.mxu1  ;;  %v866_v53 = vadd.f32 %v861_v21, %v806_v46 }
 0x104   : >> { %v923_v39 = vpop.f32.mrf.mxu0 }
 0x105   : >> { %v1103_v41 = vpop.f32.mrf.mxu1  ;;  %v930_v50 = vadd.f32 %v923_v39, %v865_v47 }
 0x106   : >> { %v1790_v42 = vpop.f32.mrf.mxu0 }
 0x107   : >> { %v1808_v44 = vpop.f32.mrf.mxu1  ;;  %v984_v57 = vadd.f32 %v977_v28, %v930_v50 }
 0x108   : >> { %v926_v45 = vpop.f32.mrf.mxu0 }
 0x109   : >> { %v1106_v48 = vpop.f32.mrf.mxu1  ;;  %v931_v56 = vadd.f32 %v926_v45, %v866_v53 }
 0x10a   : >> { %v1791_v49 = vpop.f32.mrf.mxu0 }
 0x10b   : >> { %v1809_v51 = vpop.f32.mrf.mxu1  ;;  %v985_v62 = vadd.f32 %v980_v34, %v931_v56 }
 0x10c   : >> { %v1038_v52 = vpop.f32.mrf.mxu0 }
 0x10d   : >> { %v1218_v54 = vpop.f32.mrf.mxu1  ;;  %v1045_v60 = vadd.f32 %v1038_v52, %v984_v57 }
 0x10e   : >> { %v1802_v55 = vpop.f32.mrf.mxu0 }
 0x10f   : >> { %v1820_v58 = vpop.f32.mrf.mxu1  ;;  %v1110_v3 = vadd.f32 %v1103_v41, %v1045_v60 }
 0x110   : >> { %v1041_v59 = vpop.f32.mrf.mxu0 }
 0x111   : >> { %v1221_v1 = vpop.f32.mrf.mxu1  ;;  %v1046_v2 = vadd.f32 %v1041_v59, %v985_v62 }
 0x112   : >> { %v1803_v61 = vpop.f32.mrf.mxu0 }
 0x113   : >> { %v1821_v63 = vpop.f32.mrf.mxu1  ;;  %v1111_v9 = vadd.f32 %v1106_v48, %v1046_v2 }
 0x114   : >> { %v1157_v0 = vpop.f32.mrf.mxu0 }
 0x115   : >> { %v1337_v4 = vpop.f32.mrf.mxu1  ;;  %v1164_v6 = vadd.f32 %v1157_v0, %v1110_v3 }
 0x116   : >> { %v1814_v5 = vpop.f32.mrf.mxu0 }
 0x117   : >> { %v1832_v7 = vpop.f32.mrf.mxu1  ;;  %v1225_v13 = vadd.f32 %v1218_v54, %v1164_v6 }
 0x118   : >> { %v1160_v8 = vpop.f32.mrf.mxu0 }
 0x119   : >> { %v1340_v10 = vpop.f32.mrf.mxu1  ;;  %v1165_v12 = vadd.f32 %v1160_v8, %v1111_v9 }
 0x11a   : >> { %v1815_v11 = vpop.f32.mrf.mxu0 }
 0x11b   : >> { %v1833_v14 = vpop.f32.mrf.mxu1  ;;  %v1226_v19 = vadd.f32 %v1221_v1, %v1165_v12 }
 0x11c   : >> { %v1283_v15 = vpop.f32.mrf.mxu0 }
 0x11d   : >> { %v1290_v16 = vadd.f32 %v1283_v15, %v1225_v13 }
 0x11e   : >> { %v1826_v17 = vpop.f32.mrf.mxu0 }
 0x11f   : >> { %v1344_v18 = vadd.f32 %v1337_v4, %v1290_v16 }
 0x120   : >> { %v1286_v20 = vpop.f32.mrf.mxu0 }
 0x121   : >> { %1348 = vst [vmem:[%s1347_s13] sm:$0xff] %v1344_v18  ;;  %v1291_v21 = vadd.f32 %v1286_v20, %v1226_v19  ;;  %261 = sbr.rel (!%p259_p4) target bundleno = 16 (0x10), region = 111 }
 0x122   : >> { %v1827_v22 = vpop.f32.mrf.mxu0 }
 0x123   : >> { %v1345_v23 = vadd.f32 %v1340_v10, %v1291_v21 }
 0x125   : >> { %1349 = vst [vmem:[%s1347_s13 + $0x8] sm:$0xff] %v1345_v23 }
 0x12c   : > { %v1350_v24 = vld [vmem:[%s1924_s24] sm:$0xff]  ;;  %v1351_v25 = vld [vmem:[%s1924_s24 + $0x8] sm:$0xff]  ;;  %v1352_v26 = vld [vmem:[%s1924_s24 + $0x10] sm:$0xff] }
 0x12d   : > { %v1353_v27 = vld [vmem:[%s1924_s24 + $0x18] sm:$0xff]  ;;  %v1382_v28 = vadd.f32 %v1351_v25, %v1350_v24  ;;  %v1419_v29 = vmul.f32 %v1350_v24, %v1350_v24  ;;  %v1420_v30 = vmul.f32 %v1351_v25, %v1351_v25  ;;  %v1421_v31 = vmul.f32 %v1352_v26, %v1352_v26  ;;  %v1354_v32 = vld [vmem:[%s1924_s24 + $0x20] sm:$0xff]  ;;  %v1355_v36 = vld [vmem:[%s1924_s24 + $0x28] sm:$0xff] }
 0x12e   : > { %v1422_v34 = vmul.f32 %v1353_v27, %v1353_v27  ;;  %v1423_v38 = vmul.f32 %v1354_v32, %v1354_v32  ;;  %v1356_v40 = vld [vmem:[%s1924_s24 + $0x30] sm:$0xff]  ;;  %v1424_v42 = vmul.f32 %v1355_v36, %v1355_v36  ;;  %v1357_v44 = vld [vmem:[%s1924_s24 + $0x38] sm:$0xff]  ;;  %v1358_v48 = vld [vmem:[%s1924_s24 + $0x40] sm:$0xff] }
 0x12f   : > { %v1383_v33 = vadd.f32 %v1382_v28, %v1352_v26  ;;  %v1451_v35 = vadd.f32 %v1420_v30, %v1419_v29  ;;  %v1425_v46 = vmul.f32 %v1356_v40, %v1356_v40  ;;  %v1426_v50 = vmul.f32 %v1357_v44, %v1357_v44  ;;  %v1359_v52 = vld [vmem:[%s1924_s24 + $0x48] sm:$0xff]  ;;  %v1360_v56 = vld [vmem:[%s1924_s24 + $0x50] sm:$0xff]  ;;  %v1361_v60 = vld [vmem:[%s1924_s24 + $0x58] sm:$0xff] }
 0x130   : > { %v1427_v54 = vmul.f32 %v1358_v48, %v1358_v48  ;;  %v1428_v58 = vmul.f32 %v1359_v52, %v1359_v52  ;;  %v1429_v61 = vmul.f32 %v1360_v56, %v1360_v56  ;;  %v1362_v63 = vld [vmem:[%s1924_s24 + $0x60] sm:$0xff]  ;;  %v1430_v2 = vmul.f32 %v1361_v60, %v1361_v60  ;;  %v1363_v4 = vld [vmem:[%s1924_s24 + $0x68] sm:$0xff]  ;;  %v1364_v8 = vld [vmem:[%s1924_s24 + $0x70] sm:$0xff] }
 0x131   : > { %v1384_v37 = vadd.f32 %v1383_v33, %v1353_v27  ;;  %v1452_v39 = vadd.f32 %v1451_v35, %v1421_v31  ;;  %v1431_v6 = vmul.f32 %v1362_v63, %v1362_v63  ;;  %v1432_v10 = vmul.f32 %v1363_v4, %v1363_v4  ;;  %v1365_v12 = vld [vmem:[%s1924_s24 + $0x78] sm:$0xff]  ;;  %v1366_v16 = vld [vmem:[%s1924_s24 + $0x80] sm:$0xff]  ;;  %v1367_v20 = vld [vmem:[%s1924_s24 + $0x88] sm:$0xff] }
 0x132   : > { %v1433_v14 = vmul.f32 %v1364_v8, %v1364_v8  ;;  %v1434_v18 = vmul.f32 %v1365_v12, %v1365_v12  ;;  %v1435_v22 = vmul.f32 %v1366_v16, %v1366_v16  ;;  %v1368_v24 = vld [vmem:[%s1924_s24 + $0x90] sm:$0xff]  ;;  %v1436_v26 = vmul.f32 %v1367_v20, %v1367_v20  ;;  %v1369_v28 = vld [vmem:[%s1924_s24 + $0x98] sm:$0xff] }
 0x133   : > { %v1385_v41 = vadd.f32 %v1384_v37, %v1354_v32  ;;  %v1453_v43 = vadd.f32 %v1452_v39, %v1422_v34  ;;  %v1437_v30 = vmul.f32 %v1368_v24, %v1368_v24  ;;  %v1370_v32 = vld [vmem:[%s1924_s24 + $0xa0] sm:$0xff]  ;;  %v1438_v34 = vmul.f32 %v1369_v28, %v1369_v28 }
 0x135   : > { %v1386_v45 = vadd.f32 %v1385_v41, %v1355_v36  ;;  %v1454_v47 = vadd.f32 %v1453_v43, %v1423_v38  ;;  %v1371_v36 = vld [vmem:[%s1924_s24 + $0xa8] sm:$0xff]  ;;  %v1439_v38 = vmul.f32 %v1370_v32, %v1370_v32 }
 0x137   : > { %v1387_v49 = vadd.f32 %v1386_v45, %v1356_v40  ;;  %v1455_v51 = vadd.f32 %v1454_v47, %v1424_v42  ;;  %v1372_v40 = vld [vmem:[%s1924_s24 + $0xb0] sm:$0xff]  ;;  %v1440_v42 = vmul.f32 %v1371_v36, %v1371_v36 }
 0x139   : > { %v1388_v53 = vadd.f32 %v1387_v49, %v1357_v44  ;;  %v1456_v55 = vadd.f32 %v1455_v51, %v1425_v46  ;;  %v1373_v44 = vld [vmem:[%s1924_s24 + $0xb8] sm:$0xff]  ;;  %v1441_v46 = vmul.f32 %v1372_v40, %v1372_v40 }
 0x13b   : > { %v1389_v57 = vadd.f32 %v1388_v53, %v1358_v48  ;;  %v1457_v59 = vadd.f32 %v1456_v55, %v1426_v50  ;;  %v1374_v48 = vld [vmem:[%s1924_s24 + $0xc0] sm:$0xff]  ;;  %v1442_v50 = vmul.f32 %v1373_v44, %v1373_v44 }
 0x13d   : > { %v1390_v1 = vadd.f32 %v1389_v57, %v1359_v52  ;;  %v1458_v62 = vadd.f32 %v1457_v59, %v1427_v54  ;;  %v1375_v52 = vld [vmem:[%s1924_s24 + $0xc8] sm:$0xff]  ;;  %v1443_v54 = vmul.f32 %v1374_v48, %v1374_v48 }
 0x13f   : > { %v1391_v0 = vadd.f32 %v1390_v1, %v1360_v56  ;;  %v1459_v3 = vadd.f32 %v1458_v62, %v1428_v58  ;;  %v1376_v56 = vld [vmem:[%s1924_s24 + $0xd0] sm:$0xff]  ;;  %v1444_v58 = vmul.f32 %v1375_v52, %v1375_v52 }
 0x141   : > { %v1392_v5 = vadd.f32 %v1391_v0, %v1361_v60  ;;  %v1460_v7 = vadd.f32 %v1459_v3, %v1429_v61  ;;  %v1377_v60 = vld [vmem:[%s1924_s24 + $0xd8] sm:$0xff]  ;;  %v1445_v61 = vmul.f32 %v1376_v56, %v1376_v56 }
 0x143   : > { %v1393_v9 = vadd.f32 %v1392_v5, %v1362_v63  ;;  %v1461_v11 = vadd.f32 %v1460_v7, %v1430_v2  ;;  %v1378_v63 = vld [vmem:[%s1924_s24 + $0xe0] sm:$0xff]  ;;  %v1446_v2 = vmul.f32 %v1377_v60, %v1377_v60 }
 0x145   : > { %v1394_v13 = vadd.f32 %v1393_v9, %v1363_v4  ;;  %v1462_v15 = vadd.f32 %v1461_v11, %v1431_v6  ;;  %v1379_v4 = vld [vmem:[%s1924_s24 + $0xe8] sm:$0xff]  ;;  %v1447_v6 = vmul.f32 %v1378_v63, %v1378_v63 }
 0x147   : > { %v1395_v17 = vadd.f32 %v1394_v13, %v1364_v8  ;;  %v1463_v19 = vadd.f32 %v1462_v15, %v1432_v10  ;;  %v1380_v8 = vld [vmem:[%s1924_s24 + $0xf0] sm:$0xff]  ;;  %v1448_v10 = vmul.f32 %v1379_v4, %v1379_v4 }
 0x149   : > { %v1396_v21 = vadd.f32 %v1395_v17, %v1365_v12  ;;  %v1464_v23 = vadd.f32 %v1463_v19, %v1433_v14  ;;  %v1381_v12 = vld [vmem:[%s1924_s24 + $0xf8] sm:$0xff]  ;;  %v1449_v14 = vmul.f32 %v1380_v8, %v1380_v8 }
 0x14a   : > { %v1450_v17 = vmul.f32 %v1381_v12, %v1381_v12 }
 0x14b   : > { %v1397_v25 = vadd.f32 %v1396_v21, %v1366_v16  ;;  %v1465_v27 = vadd.f32 %v1464_v23, %v1434_v18 }
 0x14d   : > { %v1398_v29 = vadd.f32 %v1397_v25, %v1367_v20  ;;  %v1466_v31 = vadd.f32 %v1465_v27, %v1435_v22 }
 0x14f   : > { %v1399_v33 = vadd.f32 %v1398_v29, %v1368_v24  ;;  %v1467_v35 = vadd.f32 %v1466_v31, %v1436_v26 }
 0x151   : > { %v1400_v37 = vadd.f32 %v1399_v33, %v1369_v28  ;;  %v1468_v39 = vadd.f32 %v1467_v35, %v1437_v30 }
 0x153   : > { %v1401_v41 = vadd.f32 %v1400_v37, %v1370_v32  ;;  %v1469_v43 = vadd.f32 %v1468_v39, %v1438_v34 }
 0x155   : > { %v1402_v45 = vadd.f32 %v1401_v41, %v1371_v36  ;;  %v1470_v47 = vadd.f32 %v1469_v43, %v1439_v38 }
 0x157   : > { %v1403_v49 = vadd.f32 %v1402_v45, %v1372_v40  ;;  %v1471_v51 = vadd.f32 %v1470_v47, %v1440_v42 }
 0x159   : > { %v1404_v53 = vadd.f32 %v1403_v49, %v1373_v44  ;;  %v1472_v55 = vadd.f32 %v1471_v51, %v1441_v46 }
 0x15b   : > { %v1405_v57 = vadd.f32 %v1404_v53, %v1374_v48  ;;  %v1473_v59 = vadd.f32 %v1472_v55, %v1442_v50 }
 0x15d   : > { %v1406_v1 = vadd.f32 %v1405_v57, %v1375_v52  ;;  %v1474_v62 = vadd.f32 %v1473_v59, %v1443_v54 }
 0x15f   : > { %v1407_v0 = vadd.f32 %v1406_v1, %v1376_v56  ;;  %v1475_v3 = vadd.f32 %v1474_v62, %v1444_v58 }
 0x161   : > { %v1408_v5 = vadd.f32 %v1407_v0, %v1377_v60  ;;  %v1476_v7 = vadd.f32 %v1475_v3, %v1445_v61 }
 0x163   : > { %v1409_v9 = vadd.f32 %v1408_v5, %v1378_v63  ;;  %v1477_v11 = vadd.f32 %v1476_v7, %v1446_v2 }
 0x165   : > { %v1410_v13 = vadd.f32 %v1409_v9, %v1379_v4  ;;  %v1478_v15 = vadd.f32 %v1477_v11, %v1447_v6 }
 0x167   : > { %v1411_v16 = vadd.f32 %v1410_v13, %v1380_v8  ;;  %v1479_v18 = vadd.f32 %v1478_v15, %v1448_v10 }
 0x169   : > { %v1412_v19 = vadd.f32 %v1411_v16, %v1381_v12  ;;  %v1480_v20 = vadd.f32 %v1479_v18, %v1449_v14 }
 0x16b   : > { %v1413_v21 = vrot.slane %v1412_v19, 4  ;;  %v1481_v22 = vadd.f32 %v1480_v20, %v1450_v17 }
 0x16d   : > { %v1414_v23 = vadd.f32 %v1413_v21, %v1412_v19  ;;  %v1482_v24 = vrot.slane %v1481_v22, 4 }
 0x16f   : > { %v1415_v25 = vrot.slane %v1414_v23, 2  ;;  %v1483_v26 = vadd.f32 %v1482_v24, %v1481_v22 }
 0x171   : > { %v1416_v27 = vadd.f32 %v1415_v25, %v1414_v23  ;;  %v1484_v28 = vrot.slane %v1483_v26, 2 }
 0x173   : > { %v1417_v29 = vrot.slane %v1416_v27, 1  ;;  %v1485_v30 = vadd.f32 %v1484_v28, %v1483_v26 }
 0x175   : > { %v1418_v31 = vadd.f32 %v1417_v29, %v1416_v27  ;;  %v1486_v32 = vrot.slane %v1485_v30, 1 }
 0x177   : > { %v1487_v33 = vadd.f32 %v1486_v32, %v1485_v30 }
 0x179   : > { %v1489_v34 = vsel %vm1488_vm5, %v1418_v31, %v1487_v33 }
 0x17a   : > { %v1491_v35 = vsel %vm1490_vm6, %v1489_v34, 0.0 }
 0x17b   : > { %1492 = vst [vmem:[%s1939_s9] sm:$0xff] %v1491_v35 }
 0x17c PF: > { %s16_s18 = sadd.s32 1, %s1875_s18  }
 0x17d   : > { %p13_p5 = scmp.ge.s32.totalorder %s16_s18, 4  }
 0x17f   :  { %15 = sbr.rel (!%p13_p5) target bundleno = 1 (0x1), region = 122 }

// kernel: deconv2d_fuse_forward.7
= control target key start
LH: loop header
LB: loop body
LE: loop exit
PB: predicated region body
PF: predicated region fallthrough
CT: control target
= control target key end

     0   :  { %s896_s0 = inlined_call_operand.vmem [shape: f32[512,128], index: 0, kind: input, shape index: {}]   ;;  %s897_s1 = inlined_call_operand.vmem [shape: f32[1,128], index: 1, kind: input, shape index: {}]   ;;  %s898_s2 = inlined_call_operand.vmem [shape: f32[1,128], index: 2, kind: input, shape index: {}]   ;;  %s899_s3 = inlined_call_operand.vmem [shape: f32[512,128], index: 3, kind: output, shape index: {}]  }
   0x1   :  { %v14_v0 = vld [vmem:[%s896_s0] sm:$0xff]  ;;  %v15_v4 = vld [vmem:[%s896_s0 + $0x8] sm:$0xff]  ;;  %v16_v5 = vld [vmem:[%s896_s0 + $0x10] sm:$0xff] }
   0x2   :  { %v380_v1 = vld [vmem:[%s897_s1] ss:$0 sm:$0xff]  ;;  %v17_v6 = vld [vmem:[%s896_s0 + $0x18] sm:$0xff]  ;;  %v19_v11 = vld [vmem:[%s896_s0 + $0x28] sm:$0xff] }
   0x3   :  { %v385_v2 = vld [vmem:[%s898_s2] ss:$0 sm:$0xff]  ;;  %v85_v3 = vsub.f32 %v14_v0, %v380_v1  ;;  %v86_v7 = vsub.f32 %v15_v4, %v380_v1  ;;  %v87_v8 = vsub.f32 %v16_v5, %v380_v1  ;;  %v88_v9 = vsub.f32 %v17_v6, %v380_v1  ;;  %v20_v12 = vld [vmem:[%s896_s0 + $0x30] sm:$0xff]  ;;  %v21_v17 = vld [vmem:[%s896_s0 + $0x38] sm:$0xff] }
   0x4   :  { %v18_v10 = vld [vmem:[%s896_s0 + $0x20] sm:$0xff]  ;;  %v90_v15 = vsub.f32 %v19_v11, %v380_v1  ;;  %v91_v16 = vsub.f32 %v20_v12, %v380_v1  ;;  %v92_v21 = vsub.f32 %v21_v17, %v380_v1  ;;  %v23_v27 = vld [vmem:[%s896_s0 + $0x48] sm:$0xff]  ;;  %v24_v28 = vld [vmem:[%s896_s0 + $0x50] sm:$0xff] }
   0x5   :  { %v156_v13 = vmul.f32 %v385_v2, %v85_v3  ;;  %v89_v14 = vsub.f32 %v18_v10, %v380_v1  ;;  %v157_v18 = vmul.f32 %v385_v2, %v86_v7  ;;  %v158_v19 = vmul.f32 %v385_v2, %v87_v8  ;;  %v22_v22 = vld [vmem:[%s896_s0 + $0x40] sm:$0xff]  ;;  %v25_v29 = vld [vmem:[%s896_s0 + $0x58] sm:$0xff]  ;;  %v27_v35 = vld [vmem:[%s896_s0 + $0x68] sm:$0xff] }
   0x6   :  { %v159_v20 = vmul.f32 %v385_v2, %v88_v9  ;;  %v161_v25 = vmul.f32 %v385_v2, %v90_v15  ;;  %v162_v26 = vmul.f32 %v385_v2, %v91_v16  ;;  %v163_v33 = vmul.f32 %v385_v2, %v92_v21  ;;  %v26_v34 = vld [vmem:[%s896_s0 + $0x60] sm:$0xff]  ;;  %v28_v36 = vld [vmem:[%s896_s0 + $0x70] sm:$0xff]  ;;  %v29_v41 = vld [vmem:[%s896_s0 + $0x78] sm:$0xff] }
   0x7   :  { %v220_v23 = vmax.f32 %v156_v13, 0.0  ;;  %v160_v24 = vmul.f32 %v385_v2, %v89_v14  ;;  %v221_v30 = vmax.f32 %v157_v18, 0.0  ;;  %v222_v31 = vmax.f32 %v158_v19, 0.0  ;;  %v30_v54 = vld [vmem:[%s896_s0 + $0x80] sm:$0xff]  ;;  %v31_v59 = vld [vmem:[%s896_s0 + $0x88] sm:$0xff]  ;;  %v32_v60 = vld [vmem:[%s896_s0 + $0x90] sm:$0xff] }
   0x8   :  { %v223_v32 = vmax.f32 %v159_v20, 0.0  ;;  %v225_v38 = vmax.f32 %v161_v25, 0.0  ;;  %v226_v39 = vmax.f32 %v162_v26, 0.0  ;;  %v93_v40 = vsub.f32 %v22_v22, %v380_v1  ;;  %v33_v61 = vld [vmem:[%s896_s0 + $0x98] sm:$0xff]  ;;  %v34_v4 = vld [vmem:[%s896_s0 + $0xa0] sm:$0xff]  ;;  %v35_v5 = vld [vmem:[%s896_s0 + $0xa8] sm:$0xff] }
   0x9   :  { %284 = vst [vmem:[%s899_s3] sm:$0xff] %v220_v23  ;;  %v224_v37 = vmax.f32 %v160_v24, 0.0  ;;  %285 = vst [vmem:[%s899_s3 + $0x8] sm:$0xff] %v221_v30  ;;  %v227_v42 = vmax.f32 %v163_v33, 0.0  ;;  %v94_v43 = vsub.f32 %v23_v27, %v380_v1  ;;  %v95_v44 = vsub.f32 %v24_v28, %v380_v1  ;;  %v36_v6 = vld [vmem:[%s896_s0 + $0xb0] sm:$0xff]  ;;  %v37_v11 = vld [vmem:[%s896_s0 + $0xb8] sm:$0xff] }
   0xa   :  { %286 = vst [vmem:[%s899_s3 + $0x10] sm:$0xff] %v222_v31  ;;  %287 = vst [vmem:[%s899_s3 + $0x18] sm:$0xff] %v223_v32  ;;  %v96_v45 = vsub.f32 %v25_v29, %v380_v1  ;;  %v164_v46 = vmul.f32 %v385_v2, %v93_v40  ;;  %v97_v47 = vsub.f32 %v26_v34, %v380_v1  ;;  %v38_v24 = vld [vmem:[%s896_s0 + $0xc0] sm:$0xff]  ;;  %v39_v29 = vld [vmem:[%s896_s0 + $0xc8] sm:$0xff] }
   0xb   :  { %288 = vst [vmem:[%s899_s3 + $0x20] sm:$0xff] %v224_v37  ;;  %289 = vst [vmem:[%s899_s3 + $0x28] sm:$0xff] %v225_v38  ;;  %v98_v48 = vsub.f32 %v27_v35, %v380_v1  ;;  %v99_v49 = vsub.f32 %v28_v36, %v380_v1  ;;  %v165_v50 = vmul.f32 %v385_v2, %v94_v43  ;;  %v40_v30 = vld [vmem:[%s896_s0 + $0xd0] sm:$0xff]  ;;  %v41_v31 = vld [vmem:[%s896_s0 + $0xd8] sm:$0xff] }
   0xc   :  { %290 = vst [vmem:[%s899_s3 + $0x30] sm:$0xff] %v226_v39  ;;  %291 = vst [vmem:[%s899_s3 + $0x38] sm:$0xff] %v227_v42  ;;  %v166_v51 = vmul.f32 %v385_v2, %v95_v44  ;;  %v167_v52 = vmul.f32 %v385_v2, %v96_v45  ;;  %v100_v53 = vsub.f32 %v29_v41, %v380_v1  ;;  %v228_v55 = vmax.f32 %v164_v46, 0.0  ;;  %v42_v36 = vld [vmem:[%s896_s0 + $0xe0] sm:$0xff]  ;;  %v43_v37 = vld [vmem:[%s896_s0 + $0xe8] sm:$0xff] }
   0xd   :  { %v168_v56 = vmul.f32 %v385_v2, %v97_v47  ;;  %v169_v57 = vmul.f32 %v385_v2, %v98_v48  ;;  %v170_v58 = vmul.f32 %v385_v2, %v99_v49  ;;  %v229_v62 = vmax.f32 %v165_v50, 0.0  ;;  %v44_v38 = vld [vmem:[%s896_s0 + $0xf0] sm:$0xff]  ;;  %v45_v43 = vld [vmem:[%s896_s0 + $0xf8] sm:$0xff] }
   0xe   :  { %v230_v63 = vmax.f32 %v166_v51, 0.0  ;;  %v231_v0 = vmax.f32 %v167_v52, 0.0  ;;  %v171_v3 = vmul.f32 %v385_v2, %v100_v53  ;;  %292 = vst [vmem:[%s899_s3 + $0x40] sm:$0xff] %v228_v55  ;;  %v101_v10 = vsub.f32 %v30_v54, %v380_v1 }
   0xf   :  { %v232_v7 = vmax.f32 %v168_v56, 0.0  ;;  %v233_v8 = vmax.f32 %v169_v57, 0.0  ;;  %v234_v9 = vmax.f32 %v170_v58, 0.0  ;;  %293 = vst [vmem:[%s899_s3 + $0x48] sm:$0xff] %v229_v62  ;;  %v102_v13 = vsub.f32 %v31_v59, %v380_v1  ;;  %v46_v56 = vld [vmem:[%s896_s0 + $0x100] sm:$0xff]  ;;  %v48_v62 = vld [vmem:[%s896_s0 + $0x110] sm:$0xff] }
  0x10   :  { %294 = vst [vmem:[%s899_s3 + $0x50] sm:$0xff] %v230_v63  ;;  %295 = vst [vmem:[%s899_s3 + $0x58] sm:$0xff] %v231_v0  ;;  %v235_v12 = vmax.f32 %v171_v3, 0.0  ;;  %v103_v14 = vsub.f32 %v32_v60, %v380_v1  ;;  %v104_v15 = vsub.f32 %v33_v61, %v380_v1  ;;  %v172_v16 = vmul.f32 %v385_v2, %v101_v10  ;;  %v47_v61 = vld [vmem:[%s896_s0 + $0x108] sm:$0xff]  ;;  %v49_v63 = vld [vmem:[%s896_s0 + $0x118] sm:$0xff] }
  0x11   :  { %296 = vst [vmem:[%s899_s3 + $0x60] sm:$0xff] %v232_v7  ;;  %297 = vst [vmem:[%s899_s3 + $0x68] sm:$0xff] %v233_v8  ;;  %v105_v17 = vsub.f32 %v34_v4, %v380_v1  ;;  %v106_v18 = vsub.f32 %v35_v5, %v380_v1  ;;  %v107_v19 = vsub.f32 %v36_v6, %v380_v1  ;;  %v50_v6 = vld [vmem:[%s896_s0 + $0x120] sm:$0xff]  ;;  %v51_v7 = vld [vmem:[%s896_s0 + $0x128] sm:$0xff] }
  0x12   :  { %298 = vst [vmem:[%s899_s3 + $0x70] sm:$0xff] %v234_v9  ;;  %299 = vst [vmem:[%s899_s3 + $0x78] sm:$0xff] %v235_v12  ;;  %v173_v20 = vmul.f32 %v385_v2, %v102_v13  ;;  %v174_v21 = vmul.f32 %v385_v2, %v103_v14  ;;  %v175_v22 = vmul.f32 %v385_v2, %v104_v15  ;;  %v236_v25 = vmax.f32 %v172_v16, 0.0  ;;  %v52_v8 = vld [vmem:[%s896_s0 + $0x130] sm:$0xff]  ;;  %v53_v13 = vld [vmem:[%s896_s0 + $0x138] sm:$0xff] }
  0x13   :  { %v108_v23 = vsub.f32 %v37_v11, %v380_v1  ;;  %v176_v26 = vmul.f32 %v385_v2, %v105_v17  ;;  %v177_v27 = vmul.f32 %v385_v2, %v106_v18  ;;  %v178_v28 = vmul.f32 %v385_v2, %v107_v19 }
  0x14   :  { %v237_v32 = vmax.f32 %v173_v20, 0.0  ;;  %v238_v33 = vmax.f32 %v174_v21, 0.0  ;;  %v239_v34 = vmax.f32 %v175_v22, 0.0  ;;  %300 = vst [vmem:[%s899_s3 + $0x80] sm:$0xff] %v236_v25  ;;  %v109_v42 = vsub.f32 %v38_v24, %v380_v1 }
  0x15   :  { %v179_v35 = vmul.f32 %v385_v2, %v108_v23  ;;  %v240_v39 = vmax.f32 %v176_v26, 0.0  ;;  %v241_v40 = vmax.f32 %v177_v27, 0.0  ;;  %v242_v41 = vmax.f32 %v178_v28, 0.0  ;;  %v54_v26 = vld [vmem:[%s896_s0 + $0x140] sm:$0xff] }
  0x16   :  { %301 = vst [vmem:[%s899_s3 + $0x88] sm:$0xff] %v237_v32  ;;  %302 = vst [vmem:[%s899_s3 + $0x90] sm:$0xff] %v238_v33  ;;  %v110_v45 = vsub.f32 %v39_v29, %v380_v1  ;;  %v111_v46 = vsub.f32 %v40_v30, %v380_v1  ;;  %v112_v47 = vsub.f32 %v41_v31, %v380_v1  ;;  %v55_v31 = vld [vmem:[%s896_s0 + $0x148] sm:$0xff]  ;;  %v56_v32 = vld [vmem:[%s896_s0 + $0x150] sm:$0xff] }
  0x17   :  { %303 = vst [vmem:[%s899_s3 + $0x98] sm:$0xff] %v239_v34  ;;  %v243_v44 = vmax.f32 %v179_v35, 0.0  ;;  %304 = vst [vmem:[%s899_s3 + $0xa0] sm:$0xff] %v240_v39  ;;  %v180_v48 = vmul.f32 %v385_v2, %v109_v42  ;;  %v113_v49 = vsub.f32 %v42_v36, %v380_v1  ;;  %v114_v50 = vsub.f32 %v43_v37, %v380_v1  ;;  %v57_v33 = vld [vmem:[%s896_s0 + $0x158] sm:$0xff]  ;;  %v59_v39 = vld [vmem:[%s896_s0 + $0x168] sm:$0xff] }
  0x18   :  { %305 = vst [vmem:[%s899_s3 + $0xa8] sm:$0xff] %v241_v40  ;;  %306 = vst [vmem:[%s899_s3 + $0xb0] sm:$0xff] %v242_v41  ;;  %v115_v51 = vsub.f32 %v44_v38, %v380_v1  ;;  %v181_v52 = vmul.f32 %v385_v2, %v110_v45  ;;  %v182_v53 = vmul.f32 %v385_v2, %v111_v46  ;;  %v58_v38 = vld [vmem:[%s896_s0 + $0x160] sm:$0xff]  ;;  %v60_v40 = vld [vmem:[%s896_s0 + $0x170] sm:$0xff] }
  0x19   :  { %307 = vst [vmem:[%s899_s3 + $0xb8] sm:$0xff] %v243_v44  ;;  %v183_v54 = vmul.f32 %v385_v2, %v112_v47  ;;  %v116_v55 = vsub.f32 %v45_v43, %v380_v1  ;;  %v244_v57 = vmax.f32 %v180_v48, 0.0  ;;  %v184_v58 = vmul.f32 %v385_v2, %v113_v49  ;;  %v61_v45 = vld [vmem:[%s896_s0 + $0x178] sm:$0xff] }
  0x1a   :  { %v185_v59 = vmul.f32 %v385_v2, %v114_v50  ;;  %v186_v60 = vmul.f32 %v385_v2, %v115_v51  ;;  %v245_v0 = vmax.f32 %v181_v52, 0.0  ;;  %v246_v3 = vmax.f32 %v182_v53, 0.0 }
  0x1b   :  { %v247_v4 = vmax.f32 %v183_v54, 0.0  ;;  %v187_v5 = vmul.f32 %v385_v2, %v116_v55  ;;  %308 = vst [vmem:[%s899_s3 + $0xc0] sm:$0xff] %v244_v57  ;;  %v248_v9 = vmax.f32 %v184_v58, 0.0  ;;  %v117_v12 = vsub.f32 %v46_v56, %v380_v1  ;;  %v62_v58 = vld [vmem:[%s896_s0 + $0x180] sm:$0xff] }
  0x1c   :  { %v249_v10 = vmax.f32 %v185_v59, 0.0  ;;  %v250_v11 = vmax.f32 %v186_v60, 0.0  ;;  %309 = vst [vmem:[%s899_s3 + $0xc8] sm:$0xff] %v245_v0  ;;  %310 = vst [vmem:[%s899_s3 + $0xd0] sm:$0xff] %v246_v3  ;;  %v118_v15 = vsub.f32 %v47_v61, %v380_v1  ;;  %v119_v16 = vsub.f32 %v48_v62, %v380_v1  ;;  %v64_v0 = vld [vmem:[%s896_s0 + $0x190] sm:$0xff]  ;;  %v65_v3 = vld [vmem:[%s896_s0 + $0x198] sm:$0xff] }
  0x1d   :  { %311 = vst [vmem:[%s899_s3 + $0xd8] sm:$0xff] %v247_v4  ;;  %v251_v14 = vmax.f32 %v187_v5, 0.0  ;;  %v120_v17 = vsub.f32 %v49_v63, %v380_v1  ;;  %312 = vst [vmem:[%s899_s3 + $0xe0] sm:$0xff] %v248_v9  ;;  %v188_v18 = vmul.f32 %v385_v2, %v117_v12  ;;  %v121_v19 = vsub.f32 %v50_v6, %v380_v1  ;;  %v63_v63 = vld [vmem:[%s896_s0 + $0x188] sm:$0xff] }
  0x1e   :  { %313 = vst [vmem:[%s899_s3 + $0xe8] sm:$0xff] %v249_v10  ;;  %314 = vst [vmem:[%s899_s3 + $0xf0] sm:$0xff] %v250_v11  ;;  %v122_v20 = vsub.f32 %v51_v7, %v380_v1  ;;  %v123_v21 = vsub.f32 %v52_v8, %v380_v1  ;;  %v189_v22 = vmul.f32 %v385_v2, %v118_v15  ;;  %v66_v8 = vld [vmem:[%s896_s0 + $0x1a0] sm:$0xff]  ;;  %v67_v9 = vld [vmem:[%s896_s0 + $0x1a8] sm:$0xff] }
  0x1f   :  { %315 = vst [vmem:[%s899_s3 + $0xf8] sm:$0xff] %v251_v14  ;;  %v190_v23 = vmul.f32 %v385_v2, %v119_v16  ;;  %v191_v24 = vmul.f32 %v385_v2, %v120_v17  ;;  %v124_v25 = vsub.f32 %v53_v13, %v380_v1  ;;  %v252_v27 = vmax.f32 %v188_v18, 0.0  ;;  %v68_v10 = vld [vmem:[%s896_s0 + $0x1b0] sm:$0xff]  ;;  %v69_v15 = vld [vmem:[%s896_s0 + $0x1b8] sm:$0xff] }
  0x20   :  { %v192_v28 = vmul.f32 %v385_v2, %v121_v19  ;;  %v193_v29 = vmul.f32 %v385_v2, %v122_v20  ;;  %v194_v30 = vmul.f32 %v385_v2, %v123_v21  ;;  %v253_v34 = vmax.f32 %v189_v22, 0.0 }
  0x21   :  { %v254_v35 = vmax.f32 %v190_v23, 0.0  ;;  %v255_v36 = vmax.f32 %v191_v24, 0.0  ;;  %v195_v37 = vmul.f32 %v385_v2, %v124_v25  ;;  %316 = vst [vmem:[%s899_s3 + $0x100] sm:$0xff] %v252_v27  ;;  %v125_v44 = vsub.f32 %v54_v26, %v380_v1 }
  0x22   :  { %v256_v41 = vmax.f32 %v192_v28, 0.0  ;;  %v257_v42 = vmax.f32 %v193_v29, 0.0  ;;  %v258_v43 = vmax.f32 %v194_v30, 0.0  ;;  %317 = vst [vmem:[%s899_s3 + $0x108] sm:$0xff] %v253_v34  ;;  %v126_v47 = vsub.f32 %v55_v31, %v380_v1  ;;  %v70_v28 = vld [vmem:[%s896_s0 + $0x1c0] sm:$0xff]  ;;  %v72_v34 = vld [vmem:[%s896_s0 + $0x1d0] sm:$0xff] }
  0x23   :  { %318 = vst [vmem:[%s899_s3 + $0x110] sm:$0xff] %v254_v35  ;;  %319 = vst [vmem:[%s899_s3 + $0x118] sm:$0xff] %v255_v36  ;;  %v259_v46 = vmax.f32 %v195_v37, 0.0  ;;  %v127_v48 = vsub.f32 %v56_v32, %v380_v1  ;;  %v128_v49 = vsub.f32 %v57_v33, %v380_v1  ;;  %v196_v50 = vmul.f32 %v385_v2, %v125_v44  ;;  %v71_v33 = vld [vmem:[%s896_s0 + $0x1c8] sm:$0xff]  ;;  %v73_v35 = vld [vmem:[%s896_s0 + $0x1d8] sm:$0xff] }
  0x24   :  { %320 = vst [vmem:[%s899_s3 + $0x120] sm:$0xff] %v256_v41  ;;  %321 = vst [vmem:[%s899_s3 + $0x128] sm:$0xff] %v257_v42  ;;  %v129_v51 = vsub.f32 %v58_v38, %v380_v1  ;;  %v130_v52 = vsub.f32 %v59_v39, %v380_v1  ;;  %v131_v53 = vsub.f32 %v60_v40, %v380_v1  ;;  %v74_v40 = vld [vmem:[%s896_s0 + $0x1e0] sm:$0xff]  ;;  %v75_v41 = vld [vmem:[%s896_s0 + $0x1e8] sm:$0xff] }
  0x25   :  { %322 = vst [vmem:[%s899_s3 + $0x130] sm:$0xff] %v258_v43  ;;  %323 = vst [vmem:[%s899_s3 + $0x138] sm:$0xff] %v259_v46  ;;  %v197_v54 = vmul.f32 %v385_v2, %v126_v47  ;;  %v198_v55 = vmul.f32 %v385_v2, %v127_v48  ;;  %v199_v56 = vmul.f32 %v385_v2, %v128_v49  ;;  %v260_v59 = vmax.f32 %v196_v50, 0.0  ;;  %v76_v42 = vld [vmem:[%s896_s0 + $0x1f0] sm:$0xff]  ;;  %v77_v47 = vld [vmem:[%s896_s0 + $0x1f8] sm:$0xff] }
  0x26   :  { %v132_v57 = vsub.f32 %v61_v45, %v380_v1  ;;  %v200_v60 = vmul.f32 %v385_v2, %v129_v51  ;;  %v201_v61 = vmul.f32 %v385_v2, %v130_v52  ;;  %v202_v62 = vmul.f32 %v385_v2, %v131_v53 }
  0x27   :  { %v261_v4 = vmax.f32 %v197_v54, 0.0  ;;  %v262_v5 = vmax.f32 %v198_v55, 0.0  ;;  %v263_v6 = vmax.f32 %v199_v56, 0.0  ;;  %324 = vst [vmem:[%s899_s3 + $0x140] sm:$0xff] %v260_v59  ;;  %v133_v14 = vsub.f32 %v62_v58, %v380_v1 }
  0x28   :  { %v203_v7 = vmul.f32 %v385_v2, %v132_v57  ;;  %v264_v11 = vmax.f32 %v200_v60, 0.0  ;;  %v265_v12 = vmax.f32 %v201_v61, 0.0  ;;  %v266_v13 = vmax.f32 %v202_v62, 0.0 }
  0x29   :  { %325 = vst [vmem:[%s899_s3 + $0x148] sm:$0xff] %v261_v4  ;;  %326 = vst [vmem:[%s899_s3 + $0x150] sm:$0xff] %v262_v5  ;;  %v134_v17 = vsub.f32 %v63_v63, %v380_v1  ;;  %v135_v18 = vsub.f32 %v64_v0, %v380_v1  ;;  %v136_v19 = vsub.f32 %v65_v3, %v380_v1 }
  0x2a   :  { %327 = vst [vmem:[%s899_s3 + $0x158] sm:$0xff] %v263_v6  ;;  %v267_v16 = vmax.f32 %v203_v7, 0.0  ;;  %328 = vst [vmem:[%s899_s3 + $0x160] sm:$0xff] %v264_v11  ;;  %v204_v20 = vmul.f32 %v385_v2, %v133_v14  ;;  %v137_v21 = vsub.f32 %v66_v8, %v380_v1  ;;  %v138_v22 = vsub.f32 %v67_v9, %v380_v1 }
  0x2b   :  { %329 = vst [vmem:[%s899_s3 + $0x168] sm:$0xff] %v265_v12  ;;  %330 = vst [vmem:[%s899_s3 + $0x170] sm:$0xff] %v266_v13  ;;  %v139_v23 = vsub.f32 %v68_v10, %v380_v1  ;;  %v205_v24 = vmul.f32 %v385_v2, %v134_v17  ;;  %v206_v25 = vmul.f32 %v385_v2, %v135_v18 }
  0x2c   :  { %331 = vst [vmem:[%s899_s3 + $0x178] sm:$0xff] %v267_v16  ;;  %v207_v26 = vmul.f32 %v385_v2, %v136_v19  ;;  %v140_v27 = vsub.f32 %v69_v15, %v380_v1  ;;  %v268_v29 = vmax.f32 %v204_v20, 0.0  ;;  %v208_v30 = vmul.f32 %v385_v2, %v137_v21 }
  0x2d   :  { %v209_v31 = vmul.f32 %v385_v2, %v138_v22  ;;  %v210_v32 = vmul.f32 %v385_v2, %v139_v23  ;;  %v269_v36 = vmax.f32 %v205_v24, 0.0  ;;  %v270_v37 = vmax.f32 %v206_v25, 0.0 }
  0x2e   :  { %v271_v38 = vmax.f32 %v207_v26, 0.0  ;;  %v211_v39 = vmul.f32 %v385_v2, %v140_v27  ;;  %332 = vst [vmem:[%s899_s3 + $0x180] sm:$0xff] %v268_v29  ;;  %v272_v43 = vmax.f32 %v208_v30, 0.0  ;;  %v141_v46 = vsub.f32 %v70_v28, %v380_v1 }
  0x2f   :  { %v273_v44 = vmax.f32 %v209_v31, 0.0  ;;  %v274_v45 = vmax.f32 %v210_v32, 0.0  ;;  %333 = vst [vmem:[%s899_s3 + $0x188] sm:$0xff] %v269_v36  ;;  %334 = vst [vmem:[%s899_s3 + $0x190] sm:$0xff] %v270_v37  ;;  %v142_v49 = vsub.f32 %v71_v33, %v380_v1  ;;  %v143_v50 = vsub.f32 %v72_v34, %v380_v1 }
  0x30   :  { %335 = vst [vmem:[%s899_s3 + $0x198] sm:$0xff] %v271_v38  ;;  %v275_v48 = vmax.f32 %v211_v39, 0.0  ;;  %v144_v51 = vsub.f32 %v73_v35, %v380_v1  ;;  %336 = vst [vmem:[%s899_s3 + $0x1a0] sm:$0xff] %v272_v43  ;;  %v212_v52 = vmul.f32 %v385_v2, %v141_v46  ;;  %v145_v53 = vsub.f32 %v74_v40, %v380_v1 }
  0x31   :  { %337 = vst [vmem:[%s899_s3 + $0x1a8] sm:$0xff] %v273_v44  ;;  %338 = vst [vmem:[%s899_s3 + $0x1b0] sm:$0xff] %v274_v45  ;;  %v146_v54 = vsub.f32 %v75_v41, %v380_v1  ;;  %v147_v55 = vsub.f32 %v76_v42, %v380_v1  ;;  %v213_v56 = vmul.f32 %v385_v2, %v142_v49 }
  0x32   :  { %339 = vst [vmem:[%s899_s3 + $0x1b8] sm:$0xff] %v275_v48  ;;  %v214_v57 = vmul.f32 %v385_v2, %v143_v50  ;;  %v215_v58 = vmul.f32 %v385_v2, %v144_v51  ;;  %v148_v59 = vsub.f32 %v77_v47, %v380_v1  ;;  %v276_v60 = vmax.f32 %v212_v52, 0.0 }
  0x33   :  { %v216_v61 = vmul.f32 %v385_v2, %v145_v53  ;;  %v217_v62 = vmul.f32 %v385_v2, %v146_v54  ;;  %v218_v63 = vmul.f32 %v385_v2, %v147_v55  ;;  %v277_v0 = vmax.f32 %v213_v56, 0.0 }
  0x34   :  { %v278_v3 = vmax.f32 %v214_v57, 0.0  ;;  %v279_v4 = vmax.f32 %v215_v58, 0.0  ;;  %v219_v5 = vmul.f32 %v385_v2, %v148_v59  ;;  %340 = vst [vmem:[%s899_s3 + $0x1c0] sm:$0xff] %v276_v60 }
  0x35   :  { %v280_v6 = vmax.f32 %v216_v61, 0.0  ;;  %v281_v7 = vmax.f32 %v217_v62, 0.0  ;;  %v282_v8 = vmax.f32 %v218_v63, 0.0  ;;  %341 = vst [vmem:[%s899_s3 + $0x1c8] sm:$0xff] %v277_v0 }
  0x36   :  { %342 = vst [vmem:[%s899_s3 + $0x1d0] sm:$0xff] %v278_v3  ;;  %343 = vst [vmem:[%s899_s3 + $0x1d8] sm:$0xff] %v279_v4  ;;  %v283_v1 = vmax.f32 %v219_v5, 0.0 }
  0x37   :  { %344 = vst [vmem:[%s899_s3 + $0x1e0] sm:$0xff] %v280_v6  ;;  %345 = vst [vmem:[%s899_s3 + $0x1e8] sm:$0xff] %v281_v7 }
  0x38   :  { %346 = vst [vmem:[%s899_s3 + $0x1f0] sm:$0xff] %v282_v8  ;;  %347 = vst [vmem:[%s899_s3 + $0x1f8] sm:$0xff] %v283_v1 }

</bundles_post_ra>
